<compile_context>
chip_gen: v5e
topology: v5e:2x2
jax: 0.10.0
libtpu: 0.0.40
codegen_flags: <defaults>
</compile_context>

<pallas_src>
import functools

import numpy as np
import jax
import jax.numpy as jnp
from jax.experimental import pallas as pl
from jax.experimental.pallas import tpu as pltpu


# ----------------------------- configuration --------------------------------
EMB_DIM = 8
D_MODEL = 32
PITCH_DIM = 1
ENERGY_DIM = 1
N_LAYERS = 2
N_HEAD = 2
D_K = 16
D_V = 16
D_INNER = 64
FFT_K = 3
FFT_PAD = 1
MAX_SEQ_LEN = 64
NEG_INF = -1e9


# -------------------- in-kernel helpers (VMEM-resident values) ---------------
def _conv1d(x, w, b, pad, act):
    """'same' temporal conv as shifted-slice matmuls.

    x:(T,Cin), w:(K,Cin,Cout), b:(1,Cout).  out[t] = sum_k x[t+k-pad] @ w[k].
    Zero-pads once (single concat) then takes K static slices -> no per-tap
    concatenate, no gather.
    """
    T, cin = x.shape
    K, _, cout = w.shape
    if pad > 0:
        z = jnp.zeros((pad, cin), x.dtype)
        xp = jnp.concatenate([z, x, z], axis=0)          # (T + 2*pad, Cin)
    else:
        xp = x
    acc = jnp.zeros((T, cout), jnp.float32) + b
    for k in range(K):                                    # static unroll
        acc = acc + jnp.dot(xp[k:k + T, :], w[k],
                            preferred_element_type=jnp.float32)
    if act == "tanh":
        return jnp.tanh(acc)
    if act == "relu":
        return jnp.maximum(acc, 0.0)
    return acc


def _layernorm(x, g, b, eps=1e-5):
    mu = jnp.mean(x, axis=-1, keepdims=True)
    var = jnp.mean((x - mu) * (x - mu), axis=-1, keepdims=True)
    return (x - mu) * jax.lax.rsqrt(var + eps) * g + b


# ------------------------------ fused kernel ---------------------------------
def _embvc_kernel(len_ref,
                  emb_ref, pe_ref, pos_ref,
                  w_in_ref, b_in_ref,
                  pc_w0, pc_b0, pc_w1, pc_b1, pc_w2, pc_b2, pc_w3, pc_b3,
                  wqkv_ref, bqkv_ref, wfc_ref, bfc_ref,
                  ln1g_ref, ln1b_ref,
                  w1_ref, b1_ref, w2_ref, b2_ref,
                  ln2g_ref, ln2b_ref,
                  content_ref, feat_ref,
                  *, n_layers, n_head, d_k, d_v, fft_pad):
    b_idx = pl.program_id(0)
    length = len_ref[b_idx]                       # scalar from SMEM

    x = emb_ref[0]                                # (T, E)
    T = x.shape[0]

    # masks built in-kernel from the length (no (B*H,T,T) HBM mask)
    row = jax.lax.broadcasted_iota(jnp.int32, (T, 1), 0)
    non_pad = (row < length).astype(jnp.float32)                      # (T, 1)
    key = jax.lax.broadcasted_iota(jnp.int32, (T, T), 1)
    attn_bias = jnp.where(key < length, 0.0, NEG_INF).astype(jnp.float32)

    # in_linear + sinusoidal positional embedding (pad rows: pos 0 -> zero row)
    enc = jnp.dot(x, w_in_ref[...], preferred_element_type=jnp.float32) + b_in_ref[...]
    enc = enc + pos_ref[...] * non_pad

    hk = n_head * d_k
    for l in range(n_layers):                     # static unroll over layers
        # ---- multi-head self-attention (QKV fused, scale folded into Wq) ----
        residual = enc
        qkv = jnp.dot(enc, wqkv_ref[l], preferred_element_type=jnp.float32) + bqkv_ref[l]
        heads = []
        for h in range(n_head):                   # static unroll over heads
            q = qkv[:, h * d_k:(h + 1) * d_k]
            k = qkv[:, hk + h * d_k: hk + (h + 1) * d_k]
            v = qkv[:, 2 * hk + h * d_v: 2 * hk + (h + 1) * d_v]
            s = jnp.dot(q, k.T, preferred_element_type=jnp.float32) + attn_bias
            s = s - jnp.max(s, axis=-1, keepdims=True)
            p = jnp.exp(s)
            # fully padded query rows give a uniform softmax here; they are
            # zeroed by non_pad below (matches the PyTorch module).
            p = p * pl.reciprocal(jnp.sum(p, axis=-1, keepdims=True), approx=True)
            heads.append(jnp.dot(p, v, preferred_element_type=jnp.float32))
        attn = jnp.concatenate(heads, axis=-1)                        # (T, H*dv)
        out = jnp.dot(attn, wfc_ref[l], preferred_element_type=jnp.float32) + bfc_ref[l]
        out = _layernorm(out + residual, ln1g_ref[l], ln1b_ref[l]) * non_pad

        # ---- position-wise conv feed-forward ----
        h1 = _conv1d(out, w1_ref[l], b1_ref[l], fft_pad, "relu")
        h2 = _conv1d(h1, w2_ref[l], b2_ref[l], fft_pad, "none")
        enc = _layernorm(h2 + out, ln2g_ref[l], ln2b_ref[l]) * non_pad

    content_ref[0] = enc.astype(content_ref.dtype)

    # ---- pitch/energy encoder conv stack (same fused kernel) ----
    pe = pe_ref[0]                                                    # (T, 2)
    pe = _conv1d(pe, pc_w0[...], pc_b0[...], 3, "tanh")
    pe = _conv1d(pe, pc_w1[...], pc_b1[...], 1, "tanh")
    pe = _conv1d(pe, pc_w2[...], pc_b2[...], 1, "tanh")
    pe = _conv1d(pe, pc_w3[...], pc_b3[...], 0, "none")
    feat_ref[0] = (enc + pe).astype(feat_ref.dtype)


# ------------------------------ parameter init --------------------------------
def sinusoid_table(n_position, d_hid):
    pos = np.arange(n_position)[:, None].astype(np.float64)
    i = np.arange(d_hid)[None, :]
    angle = pos / np.power(10000.0, 2 * (i // 2) / d_hid)
    tab = np.zeros((n_position, d_hid), dtype=np.float64)
    tab[:, 0::2] = np.sin(angle[:, 0::2])
    tab[:, 1::2] = np.cos(angle[:, 1::2])
    tab[0] = 0.0  # padding_idx = 0
    return jnp.asarray(tab, jnp.float32)


def init_params(key):
    keys = iter(jax.random.split(key, 48))

    def unif(shape, fan_in):
        s = 1.0 / np.sqrt(fan_in)
        return jax.random.uniform(next(keys), shape, jnp.float32, -s, s)

    p = {}
    # in_linear
    p["w_in"] = unif((EMB_DIM, D_MODEL), EMB_DIM)
    p["b_in"] = unif((1, D_MODEL), EMB_DIM)

    # pitch encoder convs -- weights directly in (K, Cin, Cout) matmul layout
    pc_shapes = [(7, PITCH_DIM + ENERGY_DIM, D_MODEL),
                 (3, D_MODEL, D_MODEL),
                 (3, D_MODEL, D_MODEL),
                 (1, D_MODEL, D_MODEL)]
    p["pc_w"], p["pc_b"] = [], []
    for ksz, cin, cout in pc_shapes:
        p["pc_w"].append(unif((ksz, cin, cout), cin * ksz))
        p["pc_b"].append(unif((1, cout), cin * ksz))

    # encoder layers (stacked over L); QKV fused, 1/sqrt(d_k) folded into Q
    scale = 1.0 / np.sqrt(D_K)
    wqkv, bqkv, wfc, bfc, w1, b1, w2, b2 = ([] for _ in range(8))
    for _ in range(N_LAYERS):
        wq = unif((D_MODEL, N_HEAD * D_K), D_MODEL) * scale
        bq = unif((1, N_HEAD * D_K), D_MODEL) * scale
        wk = unif((D_MODEL, N_HEAD * D_K), D_MODEL)
        bk = unif((1, N_HEAD * D_K), D_MODEL)
        wv = unif((D_MODEL, N_HEAD * D_V), D_MODEL)
        bv = unif((1, N_HEAD * D_V), D_MODEL)
        wqkv.append(jnp.concatenate([wq, wk, wv], axis=1))
        bqkv.append(jnp.concatenate([bq, bk, bv], axis=1))
        wfc.append(unif((N_HEAD * D_V, D_MODEL), N_HEAD * D_V))
        bfc.append(unif((1, D_MODEL), N_HEAD * D_V))
        w1.append(unif((FFT_K, D_MODEL, D_INNER), D_MODEL * FFT_K))
        b1.append(unif((1, D_INNER), D_MODEL * FFT_K))
        w2.append(unif((FFT_K, D_INNER, D_MODEL), D_INNER * FFT_K))
        b2.append(unif((1, D_MODEL), D_INNER * FFT_K))
    p["wqkv"] = jnp.stack(wqkv)
    p["bqkv"] = jnp.stack(bqkv)
    p["wfc"] = jnp.stack(wfc)
    p["bfc"] = jnp.stack(bfc)
    p["ffn_w1"] = jnp.stack(w1)
    p["ffn_b1"] = jnp.stack(b1)
    p["ffn_w2"] = jnp.stack(w2)
    p["ffn_b2"] = jnp.stack(b2)
    p["ln1_g"] = jnp.ones((N_LAYERS, 1, D_MODEL), jnp.float32)
    p["ln1_b"] = jnp.zeros((N_LAYERS, 1, D_MODEL), jnp.float32)
    p["ln2_g"] = jnp.ones((N_LAYERS, 1, D_MODEL), jnp.float32)
    p["ln2_b"] = jnp.zeros((N_LAYERS, 1, D_MODEL), jnp.float32)
    p["pos_table"] = sinusoid_table(MAX_SEQ_LEN + 1, D_MODEL)
    return p


# ------------------------------- forward pass ---------------------------------
def embvc_forward(params, emb, emb_length, pitch, energy):
    B, T, _E = emb.shape
    D = params["w_in"].shape[1]
    if T > MAX_SEQ_LEN:   # PyTorch would error past the positional table
        raise ValueError(f"T={T} exceeds max_seq_len={MAX_SEQ_LEN}")

    pe_in = jnp.concatenate([pitch, energy], axis=-1)          # (B, T, 2)
    pos_slab = params["pos_table"][1:T + 1]                    # (T, D), rows pos=1..T

    ins = [
        emb, pe_in, pos_slab,
        params["w_in"], params["b_in"],
        params["pc_w"][0], params["pc_b"][0],
        params["pc_w"][1], params["pc_b"][1],
        params["pc_w"][2], params["pc_b"][2],
        params["pc_w"][3], params["pc_b"][3],
        params["wqkv"], params["bqkv"], params["wfc"], params["bfc"],
        params["ln1_g"], params["ln1_b"],
        params["ffn_w1"], params["ffn_b1"], params["ffn_w2"], params["ffn_b2"],
        params["ln2_g"], params["ln2_b"],
    ]

    def batch_block(shape):
        blk = (1,) + tuple(shape[1:])
        zeros = (0,) * (len(shape) - 1)
        return pl.BlockSpec(blk, lambda b, lens, _z=zeros: (b,) + _z)

    def full_block(shape):
        zeros = (0,) * len(shape)
        return pl.BlockSpec(tuple(shape), lambda b, lens, _z=zeros: _z)

    in_specs = ([batch_block(emb.shape), batch_block(pe_in.shape)]
                + [full_block(a.shape) for a in ins[2:]])
    out_specs = [batch_block((B, T, D)), batch_block((B, T, D))]
    out_shape = (jax.ShapeDtypeStruct((B, T, D), jnp.float32),
                 jax.ShapeDtypeStruct((B, T, D), jnp.float32))

    kernel = functools.partial(_embvc_kernel, n_layers=N_LAYERS, n_head=N_HEAD,
                               d_k=D_K, d_v=D_V, fft_pad=FFT_PAD)

    content, feat = pl.pallas_call(
        kernel,
        out_shape=out_shape,
        grid_spec=pltpu.PrefetchScalarGridSpec(
            num_scalar_prefetch=1,          # emb_length -> SMEM
            grid=(B,),                      # one step per batch element
            in_specs=in_specs,
            out_specs=out_specs,
        ),
        compiler_params=pltpu.CompilerParams(
            dimension_semantics=("parallel",),   # v7x: 2 TCs split the batch
        ),
    )(emb_length.astype(jnp.int32), *ins)

    # MAMSEncoder with downsample_scales=[1]: single scale, no avg_pool path.
    outputs = [(feat, emb_length)]
    output_dict = {
        "encoder_outputs": tuple(o for o, _ in outputs)[::-1],
        "encoder_lengths": tuple(l for _, l in outputs)[::-1],
        "content_representations": content,
    }
    # TODO(synk): HifiGANGenerator decoder source not provided; window=None
    # (decoder branch skipped).  global_encoder / frame_decoder / mel_predictor
    # are not configured.
    return output_dict


# -------------------------------------------------------------------------------
if __name__ == "__main__":
    B, T = 2, 16
    root = jax.random.PRNGKey(0)
    k_param, k_emb, k_pitch, k_energy = jax.random.split(root, 4)

    params = init_params(k_param)
    emb = jax.random.normal(k_emb, (B, T, EMB_DIM), jnp.float32)
    emb_length = jnp.array([T, T - 3], jnp.int32)
    pitch = jax.random.normal(k_pitch, (B, T, PITCH_DIM), jnp.float32)
    energy = jax.random.normal(k_energy, (B, T, ENERGY_DIM), jnp.float32)

    fwd = jax.jit(embvc_forward)
    out = fwd(params, emb, emb_length, pitch, energy)

    jax.block_until_ready(out["encoder_outputs"][0])
    jax.block_until_ready(out["content_representations"])
    assert out["encoder_outputs"][0].shape == (B, T, D_MODEL)
    assert out["content_representations"].shape == (B, T, D_MODEL)
    assert bool(jnp.all(jnp.isfinite(out["encoder_outputs"][0])))
    assert bool(jnp.all(jnp.isfinite(out["content_representations"])))
    # padded rows of the content representation must be exactly zero
    assert bool(jnp.all(out["content_representations"][1, T - 3:, :] == 0.0))
    print("KERNEL_OK")
</pallas_src>

<mosaic_0001>
module attributes {stable_mosaic.version = 11 : i64} {
  func.func @_embvc_kernel(%arg0: i32, %arg1: memref<2xi32, #tpu.memory_space<smem>>, %arg2: memref<1x16x8xf32, #tpu.memory_space<vmem>>, %arg3: memref<1x16x2xf32, #tpu.memory_space<vmem>>, %arg4: memref<16x32xf32, #tpu.memory_space<vmem>>, %arg5: memref<8x32xf32, #tpu.memory_space<vmem>>, %arg6: memref<1x32xf32, #tpu.memory_space<vmem>>, %arg7: memref<7x2x32xf32, #tpu.memory_space<vmem>>, %arg8: memref<1x32xf32, #tpu.memory_space<vmem>>, %arg9: memref<3x32x32xf32, #tpu.memory_space<vmem>>, %arg10: memref<1x32xf32, #tpu.memory_space<vmem>>, %arg11: memref<3x32x32xf32, #tpu.memory_space<vmem>>, %arg12: memref<1x32xf32, #tpu.memory_space<vmem>>, %arg13: memref<1x32x32xf32, #tpu.memory_space<vmem>>, %arg14: memref<1x32xf32, #tpu.memory_space<vmem>>, %arg15: memref<2x32x96xf32, #tpu.memory_space<vmem>>, %arg16: memref<2x1x96xf32, #tpu.memory_space<vmem>>, %arg17: memref<2x32x32xf32, #tpu.memory_space<vmem>>, %arg18: memref<2x1x32xf32, #tpu.memory_space<vmem>>, %arg19: memref<2x1x32xf32, #tpu.memory_space<vmem>>, %arg20: memref<2x1x32xf32, #tpu.memory_space<vmem>>, %arg21: memref<2x3x32x64xf32, #tpu.memory_space<vmem>>, %arg22: memref<2x1x64xf32, #tpu.memory_space<vmem>>, %arg23: memref<2x3x64x32xf32, #tpu.memory_space<vmem>>, %arg24: memref<2x1x32xf32, #tpu.memory_space<vmem>>, %arg25: memref<2x1x32xf32, #tpu.memory_space<vmem>>, %arg26: memref<2x1x32xf32, #tpu.memory_space<vmem>>, %arg27: memref<1x16x32xf32, #tpu.memory_space<vmem>>, %arg28: memref<1x16x32xf32, #tpu.memory_space<vmem>>) attributes {dimension_semantics = [#tpu.dimension_semantics<parallel>], iteration_bounds = array<i64: 2>, scalar_prefetch = 1 : i64, scratch_operands = 0 : i64, tpu.core_type = #tpu.core_type<tc>, window_params = [{transform_indices = @transform_0, window_bounds = array<i64: 1, 16, 8>}, {transform_indices = @transform_1, window_bounds = array<i64: 1, 16, 2>}, {pipeline_mode = #tpu.pipeline_mode<synchronous>, transform_indices = @transform_2, window_bounds = array<i64: 16, 32>}, {pipeline_mode = #tpu.pipeline_mode<synchronous>, transform_indices = @transform_3, window_bounds = array<i64: 8, 32>}, {pipeline_mode = #tpu.pipeline_mode<synchronous>, transform_indices = @transform_4, window_bounds = array<i64: 1, 32>}, {pipeline_mode = #tpu.pipeline_mode<synchronous>, transform_indices = @transform_5, window_bounds = array<i64: 7, 2, 32>}, {pipeline_mode = #tpu.pipeline_mode<synchronous>, transform_indices = @transform_6, window_bounds = array<i64: 1, 32>}, {pipeline_mode = #tpu.pipeline_mode<synchronous>, transform_indices = @transform_7, window_bounds = array<i64: 3, 32, 32>}, {pipeline_mode = #tpu.pipeline_mode<synchronous>, transform_indices = @transform_8, window_bounds = array<i64: 1, 32>}, {pipeline_mode = #tpu.pipeline_mode<synchronous>, transform_indices = @transform_9, window_bounds = array<i64: 3, 32, 32>}, {pipeline_mode = #tpu.pipeline_mode<synchronous>, transform_indices = @transform_10, window_bounds = array<i64: 1, 32>}, {pipeline_mode = #tpu.pipeline_mode<synchronous>, transform_indices = @transform_11, window_bounds = array<i64: 1, 32, 32>}, {pipeline_mode = #tpu.pipeline_mode<synchronous>, transform_indices = @transform_12, window_bounds = array<i64: 1, 32>}, {pipeline_mode = #tpu.pipeline_mode<synchronous>, transform_indices = @transform_13, window_bounds = array<i64: 2, 32, 96>}, {pipeline_mode = #tpu.pipeline_mode<synchronous>, transform_indices = @transform_14, window_bounds = array<i64: 2, 1, 96>}, {pipeline_mode = #tpu.pipeline_mode<synchronous>, transform_indices = @transform_15, window_bounds = array<i64: 2, 32, 32>}, {pipeline_mode = #tpu.pipeline_mode<synchronous>, transform_indices = @transform_16, window_bounds = array<i64: 2, 1, 32>}, {pipeline_mode = #tpu.pipeline_mode<synchronous>, transform_indices = @transform_17, window_bounds = array<i64: 2, 1, 32>}, {pipeline_mode = #tpu.pipeline_mode<synchronous>, transform_indices = @transform_18, window_bounds = array<i64: 2, 1, 32>}, {pipeline_mode = #tpu.pipeline_mode<synchronous>, transform_indices = @transform_19, window_bounds = array<i64: 2, 3, 32, 64>}, {pipeline_mode = #tpu.pipeline_mode<synchronous>, transform_indices = @transform_20, window_bounds = array<i64: 2, 1, 64>}, {pipeline_mode = #tpu.pipeline_mode<synchronous>, transform_indices = @transform_21, window_bounds = array<i64: 2, 3, 64, 32>}, {pipeline_mode = #tpu.pipeline_mode<synchronous>, transform_indices = @transform_22, window_bounds = array<i64: 2, 1, 32>}, {pipeline_mode = #tpu.pipeline_mode<synchronous>, transform_indices = @transform_23, window_bounds = array<i64: 2, 1, 32>}, {pipeline_mode = #tpu.pipeline_mode<synchronous>, transform_indices = @transform_24, window_bounds = array<i64: 2, 1, 32>}, {transform_indices = @transform_25, window_bounds = array<i64: 1, 16, 32>}, {transform_indices = @transform_26, window_bounds = array<i64: 1, 16, 32>}]} {
    %0 = arith.index_cast %arg0 : i32 to index
    %1 = memref.load %arg1[%0] : memref<2xi32, #tpu.memory_space<smem>>
    %c0 = arith.constant 0 : index
    %c0_0 = arith.constant 0 : index
    %c0_1 = arith.constant 0 : index
    %2 = vector.load %arg2[%c0, %c0_0, %c0_1] : memref<1x16x8xf32, #tpu.memory_space<vmem>>, vector<1x16x8xf32>
    %3 = vector.shape_cast %2 : vector<1x16x8xf32> to vector<16x8xf32>
    %4 = tpu.iota {dimensions = array<i32: 0>} : vector<16x1xi32>
    %5 = vector.broadcast %1 : i32 to vector<16x1xi32>
    %6 = arith.cmpi slt, %4, %5 : vector<16x1xi32>
    %7 = arith.extui %6 : vector<16x1xi1> to vector<16x1xi32>
    %8 = arith.sitofp %7 : vector<16x1xi32> to vector<16x1xf32>
    %9 = tpu.iota {dimensions = array<i32: 1>} : vector<16x16xi32>
    %10 = vector.broadcast %1 : i32 to vector<16x16xi32>
    %11 = arith.cmpi slt, %9, %10 : vector<16x16xi32>
    %cst = arith.constant 0.000000e+00 : f32
    %cst_2 = arith.constant -1.000000e+09 : f32
    %12 = vector.broadcast %cst : f32 to vector<16x16xf32>
    %13 = vector.broadcast %cst_2 : f32 to vector<16x16xf32>
    %14 = arith.select %11, %12, %13 : vector<16x16xi1>, vector<16x16xf32>
    %c0_3 = arith.constant 0 : index
    %c0_4 = arith.constant 0 : index
    %15 = vector.load %arg5[%c0_3, %c0_4] : memref<8x32xf32, #tpu.memory_space<vmem>>, vector<8x32xf32>
    %cst_5 = arith.constant dense<0.000000e+00> : vector<16x32xf32>
    %16 = tpu.matmul %3, %15, %cst_5 {dimension_numbers = #tpu.dot_dimension_numbers<[1], [0], [0], [1], [0, 0, 1, 1], [], []>} : vector<16x8xf32>, vector<8x32xf32>, vector<16x32xf32> -> vector<16x32xf32>
    %c0_6 = arith.constant 0 : index
    %c0_7 = arith.constant 0 : index
    %17 = vector.load %arg6[%c0_6, %c0_7] : memref<1x32xf32, #tpu.memory_space<vmem>>, vector<1x32xf32>
    %18 = vector.broadcast %17 : vector<1x32xf32> to vector<16x32xf32>
    %19 = arith.addf %16, %18 : vector<16x32xf32>
    %c0_8 = arith.constant 0 : index
    %c0_9 = arith.constant 0 : index
    %20 = vector.load %arg4[%c0_8, %c0_9] : memref<16x32xf32, #tpu.memory_space<vmem>>, vector<16x32xf32>
    %21 = vector.broadcast %8 : vector<16x1xf32> to vector<16x32xf32>
    %22 = arith.mulf %20, %21 : vector<16x32xf32>
    %23 = arith.addf %19, %22 : vector<16x32xf32>
    %c0_10 = arith.constant 0 : index
    %c0_11 = arith.constant 0 : index
    %c0_12 = arith.constant 0 : index
    %24 = vector.load %arg15[%c0_10, %c0_11, %c0_12] : memref<2x32x96xf32, #tpu.memory_space<vmem>>, vector<1x32x96xf32>
    %25 = vector.shape_cast %24 : vector<1x32x96xf32> to vector<32x96xf32>
    %cst_13 = arith.constant dense<0.000000e+00> : vector<16x96xf32>
    %26 = tpu.matmul %23, %25, %cst_13 {dimension_numbers = #tpu.dot_dimension_numbers<[1], [0], [0], [1], [0, 0, 1, 1], [], []>} : vector<16x32xf32>, vector<32x96xf32>, vector<16x96xf32> -> vector<16x96xf32>
    %c0_14 = arith.constant 0 : index
    %c0_15 = arith.constant 0 : index
    %c0_16 = arith.constant 0 : index
    %27 = vector.load %arg16[%c0_14, %c0_15, %c0_16] : memref<2x1x96xf32, #tpu.memory_space<vmem>>, vector<1x1x96xf32>
    %28 = vector.shape_cast %27 : vector<1x1x96xf32> to vector<1x96xf32>
    %29 = vector.broadcast %28 : vector<1x96xf32> to vector<16x96xf32>
    %30 = arith.addf %26, %29 : vector<16x96xf32>
    %31 = vector.extract_strided_slice %30 {offsets = [0, 0], sizes = [16, 16], strides = [1, 1]} : vector<16x96xf32> to vector<16x16xf32>
    %32 = vector.extract_strided_slice %30 {offsets = [0, 32], sizes = [16, 16], strides = [1, 1]} : vector<16x96xf32> to vector<16x16xf32>
    %33 = vector.extract_strided_slice %30 {offsets = [0, 64], sizes = [16, 16], strides = [1, 1]} : vector<16x96xf32> to vector<16x16xf32>
    %34 = tpu.transpose %32, [1, 0] : vector<16x16xf32> -> vector<16x16xf32>
    %cst_17 = arith.constant dense<0.000000e+00> : vector<16x16xf32>
    %35 = tpu.matmul %31, %34, %cst_17 {dimension_numbers = #tpu.dot_dimension_numbers<[1], [0], [0], [1], [0, 0, 1, 1], [], []>} : vector<16x16xf32>, vector<16x16xf32>, vector<16x16xf32> -> vector<16x16xf32>
    %36 = arith.addf %35, %14 : vector<16x16xf32>
    %cst_18 = arith.constant dense<0xFF800000> : vector<16xf32>
    %37 = vector.multi_reduction <maximumf>, %36, %cst_18 [1] : vector<16x16xf32> to vector<16xf32>
    %38 = vector.shape_cast %37 : vector<16xf32> to vector<16x1xf32>
    %39 = vector.broadcast %38 : vector<16x1xf32> to vector<16x16xf32>
    %40 = arith.subf %36, %39 : vector<16x16xf32>
    %41 = math.exp %40 : vector<16x16xf32>
    %cst_19 = arith.constant dense<0.000000e+00> : vector<16xf32>
    %42 = vector.multi_reduction <add>, %41, %cst_19 [1] : vector<16x16xf32> to vector<16xf32>
    %43 = vector.shape_cast %42 : vector<16xf32> to vector<16x1xf32>
    %44 = tpu.reciprocal %43 {approx = true} : vector<16x1xf32> -> vector<16x1xf32>
    %45 = vector.broadcast %44 : vector<16x1xf32> to vector<16x16xf32>
    %46 = arith.mulf %41, %45 : vector<16x16xf32>
    %cst_20 = arith.constant dense<0.000000e+00> : vector<16x16xf32>
    %47 = tpu.matmul %46, %33, %cst_20 {dimension_numbers = #tpu.dot_dimension_numbers<[1], [0], [0], [1], [0, 0, 1, 1], [], []>} : vector<16x16xf32>, vector<16x16xf32>, vector<16x16xf32> -> vector<16x16xf32>
    %48 = vector.extract_strided_slice %30 {offsets = [0, 16], sizes = [16, 16], strides = [1, 1]} : vector<16x96xf32> to vector<16x16xf32>
    %49 = vector.extract_strided_slice %30 {offsets = [0, 48], sizes = [16, 16], strides = [1, 1]} : vector<16x96xf32> to vector<16x16xf32>
    %50 = vector.extract_strided_slice %30 {offsets = [0, 80], sizes = [16, 16], strides = [1, 1]} : vector<16x96xf32> to vector<16x16xf32>
    %51 = tpu.transpose %49, [1, 0] : vector<16x16xf32> -> vector<16x16xf32>
    %cst_21 = arith.constant dense<0.000000e+00> : vector<16x16xf32>
    %52 = tpu.matmul %48, %51, %cst_21 {dimension_numbers = #tpu.dot_dimension_numbers<[1], [0], [0], [1], [0, 0, 1, 1], [], []>} : vector<16x16xf32>, vector<16x16xf32>, vector<16x16xf32> -> vector<16x16xf32>
    %53 = arith.addf %52, %14 : vector<16x16xf32>
    %cst_22 = arith.constant dense<0xFF800000> : vector<16xf32>
    %54 = vector.multi_reduction <maximumf>, %53, %cst_22 [1] : vector<16x16xf32> to vector<16xf32>
    %55 = vector.shape_cast %54 : vector<16xf32> to vector<16x1xf32>
    %56 = vector.broadcast %55 : vector<16x1xf32> to vector<16x16xf32>
    %57 = arith.subf %53, %56 : vector<16x16xf32>
    %58 = math.exp %57 : vector<16x16xf32>
    %cst_23 = arith.constant dense<0.000000e+00> : vector<16xf32>
    %59 = vector.multi_reduction <add>, %58, %cst_23 [1] : vector<16x16xf32> to vector<16xf32>
    %60 = vector.shape_cast %59 : vector<16xf32> to vector<16x1xf32>
    %61 = tpu.reciprocal %60 {approx = true} : vector<16x1xf32> -> vector<16x1xf32>
    %62 = vector.broadcast %61 : vector<16x1xf32> to vector<16x16xf32>
    %63 = arith.mulf %58, %62 : vector<16x16xf32>
    %cst_24 = arith.constant dense<0.000000e+00> : vector<16x16xf32>
    %64 = tpu.matmul %63, %50, %cst_24 {dimension_numbers = #tpu.dot_dimension_numbers<[1], [0], [0], [1], [0, 0, 1, 1], [], []>} : vector<16x16xf32>, vector<16x16xf32>, vector<16x16xf32> -> vector<16x16xf32>
    %65 = tpu.concatenate %47, %64 in 1 : vector<16x16xf32>, vector<16x16xf32> -> vector<16x32xf32>
    %c0_25 = arith.constant 0 : index
    %c0_26 = arith.constant 0 : index
    %c0_27 = arith.constant 0 : index
    %66 = vector.load %arg17[%c0_25, %c0_26, %c0_27] : memref<2x32x32xf32, #tpu.memory_space<vmem>>, vector<1x32x32xf32>
    %67 = vector.shape_cast %66 : vector<1x32x32xf32> to vector<32x32xf32>
    %cst_28 = arith.constant dense<0.000000e+00> : vector<16x32xf32>
    %68 = tpu.matmul %65, %67, %cst_28 {dimension_numbers = #tpu.dot_dimension_numbers<[1], [0], [0], [1], [0, 0, 1, 1], [], []>} : vector<16x32xf32>, vector<32x32xf32>, vector<16x32xf32> -> vector<16x32xf32>
    %c0_29 = arith.constant 0 : index
    %c0_30 = arith.constant 0 : index
    %c0_31 = arith.constant 0 : index
    %69 = vector.load %arg18[%c0_29, %c0_30, %c0_31] : memref<2x1x32xf32, #tpu.memory_space<vmem>>, vector<1x1x32xf32>
    %70 = vector.shape_cast %69 : vector<1x1x32xf32> to vector<1x32xf32>
    %71 = vector.broadcast %70 : vector<1x32xf32> to vector<16x32xf32>
    %72 = arith.addf %68, %71 : vector<16x32xf32>
    %73 = arith.addf %72, %23 : vector<16x32xf32>
    %c0_32 = arith.constant 0 : index
    %c0_33 = arith.constant 0 : index
    %c0_34 = arith.constant 0 : index
    %74 = vector.load %arg19[%c0_32, %c0_33, %c0_34] : memref<2x1x32xf32, #tpu.memory_space<vmem>>, vector<1x1x32xf32>
    %75 = vector.shape_cast %74 : vector<1x1x32xf32> to vector<1x32xf32>
    %c0_35 = arith.constant 0 : index
    %c0_36 = arith.constant 0 : index
    %c0_37 = arith.constant 0 : index
    %76 = vector.load %arg20[%c0_35, %c0_36, %c0_37] : memref<2x1x32xf32, #tpu.memory_space<vmem>>, vector<1x1x32xf32>
    %77 = vector.shape_cast %76 : vector<1x1x32xf32> to vector<1x32xf32>
    %cst_38 = arith.constant dense<0.000000e+00> : vector<16xf32>
    %78 = vector.multi_reduction <add>, %73, %cst_38 [1] : vector<16x32xf32> to vector<16xf32>
    %79 = vector.shape_cast %78 : vector<16xf32> to vector<16x1xf32>
    %cst_39 = arith.constant 3.200000e+01 : f32
    %80 = vector.broadcast %cst_39 : f32 to vector<16x1xf32>
    %81 = arith.divf %79, %80 : vector<16x1xf32>
    %82 = vector.broadcast %81 : vector<16x1xf32> to vector<16x32xf32>
    %83 = arith.subf %73, %82 : vector<16x32xf32>
    %84 = vector.broadcast %81 : vector<16x1xf32> to vector<16x32xf32>
    %85 = arith.subf %73, %84 : vector<16x32xf32>
    %86 = arith.mulf %83, %85 : vector<16x32xf32>
    %cst_40 = arith.constant dense<0.000000e+00> : vector<16xf32>
    %87 = vector.multi_reduction <add>, %86, %cst_40 [1] : vector<16x32xf32> to vector<16xf32>
    %88 = vector.shape_cast %87 : vector<16xf32> to vector<16x1xf32>
    %cst_41 = arith.constant 3.200000e+01 : f32
    %89 = vector.broadcast %cst_41 : f32 to vector<16x1xf32>
    %90 = arith.divf %88, %89 : vector<16x1xf32>
    %91 = vector.broadcast %81 : vector<16x1xf32> to vector<16x32xf32>
    %92 = arith.subf %73, %91 : vector<16x32xf32>
    %cst_42 = arith.constant 9.99999974E-6 : f32
    %93 = vector.broadcast %cst_42 : f32 to vector<16x1xf32>
    %94 = arith.addf %90, %93 : vector<16x1xf32>
    %95 = math.rsqrt %94 : vector<16x1xf32>
    %96 = vector.broadcast %95 : vector<16x1xf32> to vector<16x32xf32>
    %97 = arith.mulf %92, %96 : vector<16x32xf32>
    %98 = vector.broadcast %75 : vector<1x32xf32> to vector<16x32xf32>
    %99 = arith.mulf %97, %98 : vector<16x32xf32>
    %100 = vector.broadcast %77 : vector<1x32xf32> to vector<16x32xf32>
    %101 = arith.addf %99, %100 : vector<16x32xf32>
    %102 = vector.broadcast %8 : vector<16x1xf32> to vector<16x32xf32>
    %103 = arith.mulf %101, %102 : vector<16x32xf32>
    %c0_43 = arith.constant 0 : index
    %c0_44 = arith.constant 0 : index
    %c0_45 = arith.constant 0 : index
    %c0_46 = arith.constant 0 : index
    %104 = vector.load %arg21[%c0_43, %c0_44, %c0_45, %c0_46] : memref<2x3x32x64xf32, #tpu.memory_space<vmem>>, vector<1x3x32x64xf32>
    %105 = vector.shape_cast %104 : vector<1x3x32x64xf32> to vector<3x32x64xf32>
    %c0_47 = arith.constant 0 : index
    %c0_48 = arith.constant 0 : index
    %c0_49 = arith.constant 0 : index
    %106 = vector.load %arg22[%c0_47, %c0_48, %c0_49] : memref<2x1x64xf32, #tpu.memory_space<vmem>>, vector<1x1x64xf32>
    %107 = vector.shape_cast %106 : vector<1x1x64xf32> to vector<1x64xf32>
    %cst_50 = arith.constant 0.000000e+00 : f32
    %108 = vector.broadcast %cst_50 : f32 to vector<1x32xf32>
    %109 = tpu.concatenate %108, %103, %108 in 0 : vector<1x32xf32>, vector<16x32xf32>, vector<1x32xf32> -> vector<18x32xf32>
    %cst_51 = arith.constant 0.000000e+00 : f32
    %110 = vector.broadcast %cst_51 : f32 to vector<16x64xf32>
    %111 = vector.broadcast %107 : vector<1x64xf32> to vector<16x64xf32>
    %112 = arith.addf %110, %111 : vector<16x64xf32>
    %113 = vector.extract_strided_slice %109 {offsets = [0, 0], sizes = [16, 32], strides = [1, 1]} : vector<18x32xf32> to vector<16x32xf32>
    %114 = vector.extract_strided_slice %105 {offsets = [0, 0, 0], sizes = [1, 32, 64], strides = [1, 1, 1]} : vector<3x32x64xf32> to vector<1x32x64xf32>
    %115 = vector.shape_cast %114 : vector<1x32x64xf32> to vector<32x64xf32>
    %cst_52 = arith.constant dense<0.000000e+00> : vector<16x64xf32>
    %116 = tpu.matmul %113, %115, %cst_52 {dimension_numbers = #tpu.dot_dimension_numbers<[1], [0], [0], [1], [0, 0, 1, 1], [], []>} : vector<16x32xf32>, vector<32x64xf32>, vector<16x64xf32> -> vector<16x64xf32>
    %117 = arith.addf %112, %116 : vector<16x64xf32>
    %118 = vector.extract_strided_slice %109 {offsets = [1, 0], sizes = [16, 32], strides = [1, 1]} : vector<18x32xf32> to vector<16x32xf32>
    %119 = vector.extract_strided_slice %105 {offsets = [1, 0, 0], sizes = [1, 32, 64], strides = [1, 1, 1]} : vector<3x32x64xf32> to vector<1x32x64xf32>
    %120 = vector.shape_cast %119 : vector<1x32x64xf32> to vector<32x64xf32>
    %cst_53 = arith.constant dense<0.000000e+00> : vector<16x64xf32>
    %121 = tpu.matmul %118, %120, %cst_53 {dimension_numbers = #tpu.dot_dimension_numbers<[1], [0], [0], [1], [0, 0, 1, 1], [], []>} : vector<16x32xf32>, vector<32x64xf32>, vector<16x64xf32> -> vector<16x64xf32>
    %122 = arith.addf %117, %121 : vector<16x64xf32>
    %123 = vector.extract_strided_slice %109 {offsets = [2, 0], sizes = [16, 32], strides = [1, 1]} : vector<18x32xf32> to vector<16x32xf32>
    %124 = vector.extract_strided_slice %105 {offsets = [2, 0, 0], sizes = [1, 32, 64], strides = [1, 1, 1]} : vector<3x32x64xf32> to vector<1x32x64xf32>
    %125 = vector.shape_cast %124 : vector<1x32x64xf32> to vector<32x64xf32>
    %cst_54 = arith.constant dense<0.000000e+00> : vector<16x64xf32>
    %126 = tpu.matmul %123, %125, %cst_54 {dimension_numbers = #tpu.dot_dimension_numbers<[1], [0], [0], [1], [0, 0, 1, 1], [], []>} : vector<16x32xf32>, vector<32x64xf32>, vector<16x64xf32> -> vector<16x64xf32>
    %127 = arith.addf %122, %126 : vector<16x64xf32>
    %cst_55 = arith.constant 0.000000e+00 : f32
    %128 = vector.broadcast %cst_55 : f32 to vector<16x64xf32>
    %129 = arith.maximumf %127, %128 : vector<16x64xf32>
    %c0_56 = arith.constant 0 : index
    %c0_57 = arith.constant 0 : index
    %c0_58 = arith.constant 0 : index
    %c0_59 = arith.constant 0 : index
    %130 = vector.load %arg23[%c0_56, %c0_57, %c0_58, %c0_59] : memref<2x3x64x32xf32, #tpu.memory_space<vmem>>, vector<1x3x64x32xf32>
    %131 = vector.shape_cast %130 : vector<1x3x64x32xf32> to vector<3x64x32xf32>
    %c0_60 = arith.constant 0 : index
    %c0_61 = arith.constant 0 : index
    %c0_62 = arith.constant 0 : index
    %132 = vector.load %arg24[%c0_60, %c0_61, %c0_62] : memref<2x1x32xf32, #tpu.memory_space<vmem>>, vector<1x1x32xf32>
    %133 = vector.shape_cast %132 : vector<1x1x32xf32> to vector<1x32xf32>
    %cst_63 = arith.constant 0.000000e+00 : f32
    %134 = vector.broadcast %cst_63 : f32 to vector<1x64xf32>
    %135 = tpu.concatenate %134, %129, %134 in 0 : vector<1x64xf32>, vector<16x64xf32>, vector<1x64xf32> -> vector<18x64xf32>
    %cst_64 = arith.constant 0.000000e+00 : f32
    %136 = vector.broadcast %cst_64 : f32 to vector<16x32xf32>
    %137 = vector.broadcast %133 : vector<1x32xf32> to vector<16x32xf32>
    %138 = arith.addf %136, %137 : vector<16x32xf32>
    %139 = vector.extract_strided_slice %135 {offsets = [0, 0], sizes = [16, 64], strides = [1, 1]} : vector<18x64xf32> to vector<16x64xf32>
    %140 = vector.extract_strided_slice %131 {offsets = [0, 0, 0], sizes = [1, 64, 32], strides = [1, 1, 1]} : vector<3x64x32xf32> to vector<1x64x32xf32>
    %141 = vector.shape_cast %140 : vector<1x64x32xf32> to vector<64x32xf32>
    %cst_65 = arith.constant dense<0.000000e+00> : vector<16x32xf32>
    %142 = tpu.matmul %139, %141, %cst_65 {dimension_numbers = #tpu.dot_dimension_numbers<[1], [0], [0], [1], [0, 0, 1, 1], [], []>} : vector<16x64xf32>, vector<64x32xf32>, vector<16x32xf32> -> vector<16x32xf32>
    %143 = arith.addf %138, %142 : vector<16x32xf32>
    %144 = vector.extract_strided_slice %135 {offsets = [1, 0], sizes = [16, 64], strides = [1, 1]} : vector<18x64xf32> to vector<16x64xf32>
    %145 = vector.extract_strided_slice %131 {offsets = [1, 0, 0], sizes = [1, 64, 32], strides = [1, 1, 1]} : vector<3x64x32xf32> to vector<1x64x32xf32>
    %146 = vector.shape_cast %145 : vector<1x64x32xf32> to vector<64x32xf32>
    %cst_66 = arith.constant dense<0.000000e+00> : vector<16x32xf32>
    %147 = tpu.matmul %144, %146, %cst_66 {dimension_numbers = #tpu.dot_dimension_numbers<[1], [0], [0], [1], [0, 0, 1, 1], [], []>} : vector<16x64xf32>, vector<64x32xf32>, vector<16x32xf32> -> vector<16x32xf32>
    %148 = arith.addf %143, %147 : vector<16x32xf32>
    %149 = vector.extract_strided_slice %135 {offsets = [2, 0], sizes = [16, 64], strides = [1, 1]} : vector<18x64xf32> to vector<16x64xf32>
    %150 = vector.extract_strided_slice %131 {offsets = [2, 0, 0], sizes = [1, 64, 32], strides = [1, 1, 1]} : vector<3x64x32xf32> to vector<1x64x32xf32>
    %151 = vector.shape_cast %150 : vector<1x64x32xf32> to vector<64x32xf32>
    %cst_67 = arith.constant dense<0.000000e+00> : vector<16x32xf32>
    %152 = tpu.matmul %149, %151, %cst_67 {dimension_numbers = #tpu.dot_dimension_numbers<[1], [0], [0], [1], [0, 0, 1, 1], [], []>} : vector<16x64xf32>, vector<64x32xf32>, vector<16x32xf32> -> vector<16x32xf32>
    %153 = arith.addf %148, %152 : vector<16x32xf32>
    %154 = arith.addf %153, %103 : vector<16x32xf32>
    %c0_68 = arith.constant 0 : index
    %c0_69 = arith.constant 0 : index
    %c0_70 = arith.constant 0 : index
    %155 = vector.load %arg25[%c0_68, %c0_69, %c0_70] : memref<2x1x32xf32, #tpu.memory_space<vmem>>, vector<1x1x32xf32>
    %156 = vector.shape_cast %155 : vector<1x1x32xf32> to vector<1x32xf32>
    %c0_71 = arith.constant 0 : index
    %c0_72 = arith.constant 0 : index
    %c0_73 = arith.constant 0 : index
    %157 = vector.load %arg26[%c0_71, %c0_72, %c0_73] : memref<2x1x32xf32, #tpu.memory_space<vmem>>, vector<1x1x32xf32>
    %158 = vector.shape_cast %157 : vector<1x1x32xf32> to vector<1x32xf32>
    %cst_74 = arith.constant dense<0.000000e+00> : vector<16xf32>
    %159 = vector.multi_reduction <add>, %154, %cst_74 [1] : vector<16x32xf32> to vector<16xf32>
    %160 = vector.shape_cast %159 : vector<16xf32> to vector<16x1xf32>
    %cst_75 = arith.constant 3.200000e+01 : f32
    %161 = vector.broadcast %cst_75 : f32 to vector<16x1xf32>
    %162 = arith.divf %160, %161 : vector<16x1xf32>
    %163 = vector.broadcast %162 : vector<16x1xf32> to vector<16x32xf32>
    %164 = arith.subf %154, %163 : vector<16x32xf32>
    %165 = vector.broadcast %162 : vector<16x1xf32> to vector<16x32xf32>
    %166 = arith.subf %154, %165 : vector<16x32xf32>
    %167 = arith.mulf %164, %166 : vector<16x32xf32>
    %cst_76 = arith.constant dense<0.000000e+00> : vector<16xf32>
    %168 = vector.multi_reduction <add>, %167, %cst_76 [1] : vector<16x32xf32> to vector<16xf32>
    %169 = vector.shape_cast %168 : vector<16xf32> to vector<16x1xf32>
    %cst_77 = arith.constant 3.200000e+01 : f32
    %170 = vector.broadcast %cst_77 : f32 to vector<16x1xf32>
    %171 = arith.divf %169, %170 : vector<16x1xf32>
    %172 = vector.broadcast %162 : vector<16x1xf32> to vector<16x32xf32>
    %173 = arith.subf %154, %172 : vector<16x32xf32>
    %cst_78 = arith.constant 9.99999974E-6 : f32
    %174 = vector.broadcast %cst_78 : f32 to vector<16x1xf32>
    %175 = arith.addf %171, %174 : vector<16x1xf32>
    %176 = math.rsqrt %175 : vector<16x1xf32>
    %177 = vector.broadcast %176 : vector<16x1xf32> to vector<16x32xf32>
    %178 = arith.mulf %173, %177 : vector<16x32xf32>
    %179 = vector.broadcast %156 : vector<1x32xf32> to vector<16x32xf32>
    %180 = arith.mulf %178, %179 : vector<16x32xf32>
    %181 = vector.broadcast %158 : vector<1x32xf32> to vector<16x32xf32>
    %182 = arith.addf %180, %181 : vector<16x32xf32>
    %183 = vector.broadcast %8 : vector<16x1xf32> to vector<16x32xf32>
    %184 = arith.mulf %182, %183 : vector<16x32xf32>
    %c1 = arith.constant 1 : index
    %c0_79 = arith.constant 0 : index
    %c0_80 = arith.constant 0 : index
    %185 = vector.load %arg15[%c1, %c0_79, %c0_80] : memref<2x32x96xf32, #tpu.memory_space<vmem>>, vector<1x32x96xf32>
    %186 = vector.shape_cast %185 : vector<1x32x96xf32> to vector<32x96xf32>
    %cst_81 = arith.constant dense<0.000000e+00> : vector<16x96xf32>
    %187 = tpu.matmul %184, %186, %cst_81 {dimension_numbers = #tpu.dot_dimension_numbers<[1], [0], [0], [1], [0, 0, 1, 1], [], []>} : vector<16x32xf32>, vector<32x96xf32>, vector<16x96xf32> -> vector<16x96xf32>
    %c1_82 = arith.constant 1 : index
    %c0_83 = arith.constant 0 : index
    %c0_84 = arith.constant 0 : index
    %188 = vector.load %arg16[%c1_82, %c0_83, %c0_84] : memref<2x1x96xf32, #tpu.memory_space<vmem>>, vector<1x1x96xf32>
    %189 = vector.shape_cast %188 : vector<1x1x96xf32> to vector<1x96xf32>
    %190 = vector.broadcast %189 : vector<1x96xf32> to vector<16x96xf32>
    %191 = arith.addf %187, %190 : vector<16x96xf32>
    %192 = vector.extract_strided_slice %191 {offsets = [0, 0], sizes = [16, 16], strides = [1, 1]} : vector<16x96xf32> to vector<16x16xf32>
    %193 = vector.extract_strided_slice %191 {offsets = [0, 32], sizes = [16, 16], strides = [1, 1]} : vector<16x96xf32> to vector<16x16xf32>
    %194 = vector.extract_strided_slice %191 {offsets = [0, 64], sizes = [16, 16], strides = [1, 1]} : vector<16x96xf32> to vector<16x16xf32>
    %195 = tpu.transpose %193, [1, 0] : vector<16x16xf32> -> vector<16x16xf32>
    %cst_85 = arith.constant dense<0.000000e+00> : vector<16x16xf32>
    %196 = tpu.matmul %192, %195, %cst_85 {dimension_numbers = #tpu.dot_dimension_numbers<[1], [0], [0], [1], [0, 0, 1, 1], [], []>} : vector<16x16xf32>, vector<16x16xf32>, vector<16x16xf32> -> vector<16x16xf32>
    %197 = arith.addf %196, %14 : vector<16x16xf32>
    %cst_86 = arith.constant dense<0xFF800000> : vector<16xf32>
    %198 = vector.multi_reduction <maximumf>, %197, %cst_86 [1] : vector<16x16xf32> to vector<16xf32>
    %199 = vector.shape_cast %198 : vector<16xf32> to vector<16x1xf32>
    %200 = vector.broadcast %199 : vector<16x1xf32> to vector<16x16xf32>
    %201 = arith.subf %197, %200 : vector<16x16xf32>
    %202 = math.exp %201 : vector<16x16xf32>
    %cst_87 = arith.constant dense<0.000000e+00> : vector<16xf32>
    %203 = vector.multi_reduction <add>, %202, %cst_87 [1] : vector<16x16xf32> to vector<16xf32>
    %204 = vector.shape_cast %203 : vector<16xf32> to vector<16x1xf32>
    %205 = tpu.reciprocal %204 {approx = true} : vector<16x1xf32> -> vector<16x1xf32>
    %206 = vector.broadcast %205 : vector<16x1xf32> to vector<16x16xf32>
    %207 = arith.mulf %202, %206 : vector<16x16xf32>
    %cst_88 = arith.constant dense<0.000000e+00> : vector<16x16xf32>
    %208 = tpu.matmul %207, %194, %cst_88 {dimension_numbers = #tpu.dot_dimension_numbers<[1], [0], [0], [1], [0, 0, 1, 1], [], []>} : vector<16x16xf32>, vector<16x16xf32>, vector<16x16xf32> -> vector<16x16xf32>
    %209 = vector.extract_strided_slice %191 {offsets = [0, 16], sizes = [16, 16], strides = [1, 1]} : vector<16x96xf32> to vector<16x16xf32>
    %210 = vector.extract_strided_slice %191 {offsets = [0, 48], sizes = [16, 16], strides = [1, 1]} : vector<16x96xf32> to vector<16x16xf32>
    %211 = vector.extract_strided_slice %191 {offsets = [0, 80], sizes = [16, 16], strides = [1, 1]} : vector<16x96xf32> to vector<16x16xf32>
    %212 = tpu.transpose %210, [1, 0] : vector<16x16xf32> -> vector<16x16xf32>
    %cst_89 = arith.constant dense<0.000000e+00> : vector<16x16xf32>
    %213 = tpu.matmul %209, %212, %cst_89 {dimension_numbers = #tpu.dot_dimension_numbers<[1], [0], [0], [1], [0, 0, 1, 1], [], []>} : vector<16x16xf32>, vector<16x16xf32>, vector<16x16xf32> -> vector<16x16xf32>
    %214 = arith.addf %213, %14 : vector<16x16xf32>
    %cst_90 = arith.constant dense<0xFF800000> : vector<16xf32>
    %215 = vector.multi_reduction <maximumf>, %214, %cst_90 [1] : vector<16x16xf32> to vector<16xf32>
    %216 = vector.shape_cast %215 : vector<16xf32> to vector<16x1xf32>
    %217 = vector.broadcast %216 : vector<16x1xf32> to vector<16x16xf32>
    %218 = arith.subf %214, %217 : vector<16x16xf32>
    %219 = math.exp %218 : vector<16x16xf32>
    %cst_91 = arith.constant dense<0.000000e+00> : vector<16xf32>
    %220 = vector.multi_reduction <add>, %219, %cst_91 [1] : vector<16x16xf32> to vector<16xf32>
    %221 = vector.shape_cast %220 : vector<16xf32> to vector<16x1xf32>
    %222 = tpu.reciprocal %221 {approx = true} : vector<16x1xf32> -> vector<16x1xf32>
    %223 = vector.broadcast %222 : vector<16x1xf32> to vector<16x16xf32>
    %224 = arith.mulf %219, %223 : vector<16x16xf32>
    %cst_92 = arith.constant dense<0.000000e+00> : vector<16x16xf32>
    %225 = tpu.matmul %224, %211, %cst_92 {dimension_numbers = #tpu.dot_dimension_numbers<[1], [0], [0], [1], [0, 0, 1, 1], [], []>} : vector<16x16xf32>, vector<16x16xf32>, vector<16x16xf32> -> vector<16x16xf32>
    %226 = tpu.concatenate %208, %225 in 1 : vector<16x16xf32>, vector<16x16xf32> -> vector<16x32xf32>
    %c1_93 = arith.constant 1 : index
    %c0_94 = arith.constant 0 : index
    %c0_95 = arith.constant 0 : index
    %227 = vector.load %arg17[%c1_93, %c0_94, %c0_95] : memref<2x32x32xf32, #tpu.memory_space<vmem>>, vector<1x32x32xf32>
    %228 = vector.shape_cast %227 : vector<1x32x32xf32> to vector<32x32xf32>
    %cst_96 = arith.constant dense<0.000000e+00> : vector<16x32xf32>
    %229 = tpu.matmul %226, %228, %cst_96 {dimension_numbers = #tpu.dot_dimension_numbers<[1], [0], [0], [1], [0, 0, 1, 1], [], []>} : vector<16x32xf32>, vector<32x32xf32>, vector<16x32xf32> -> vector<16x32xf32>
    %c1_97 = arith.constant 1 : index
    %c0_98 = arith.constant 0 : index
    %c0_99 = arith.constant 0 : index
    %230 = vector.load %arg18[%c1_97, %c0_98, %c0_99] : memref<2x1x32xf32, #tpu.memory_space<vmem>>, vector<1x1x32xf32>
    %231 = vector.shape_cast %230 : vector<1x1x32xf32> to vector<1x32xf32>
    %232 = vector.broadcast %231 : vector<1x32xf32> to vector<16x32xf32>
    %233 = arith.addf %229, %232 : vector<16x32xf32>
    %234 = arith.addf %233, %184 : vector<16x32xf32>
    %c1_100 = arith.constant 1 : index
    %c0_101 = arith.constant 0 : index
    %c0_102 = arith.constant 0 : index
    %235 = vector.load %arg19[%c1_100, %c0_101, %c0_102] : memref<2x1x32xf32, #tpu.memory_space<vmem>>, vector<1x1x32xf32>
    %236 = vector.shape_cast %235 : vector<1x1x32xf32> to vector<1x32xf32>
    %c1_103 = arith.constant 1 : index
    %c0_104 = arith.constant 0 : index
    %c0_105 = arith.constant 0 : index
    %237 = vector.load %arg20[%c1_103, %c0_104, %c0_105] : memref<2x1x32xf32, #tpu.memory_space<vmem>>, vector<1x1x32xf32>
    %238 = vector.shape_cast %237 : vector<1x1x32xf32> to vector<1x32xf32>
    %cst_106 = arith.constant dense<0.000000e+00> : vector<16xf32>
    %239 = vector.multi_reduction <add>, %234, %cst_106 [1] : vector<16x32xf32> to vector<16xf32>
    %240 = vector.shape_cast %239 : vector<16xf32> to vector<16x1xf32>
    %cst_107 = arith.constant 3.200000e+01 : f32
    %241 = vector.broadcast %cst_107 : f32 to vector<16x1xf32>
    %242 = arith.divf %240, %241 : vector<16x1xf32>
    %243 = vector.broadcast %242 : vector<16x1xf32> to vector<16x32xf32>
    %244 = arith.subf %234, %243 : vector<16x32xf32>
    %245 = vector.broadcast %242 : vector<16x1xf32> to vector<16x32xf32>
    %246 = arith.subf %234, %245 : vector<16x32xf32>
    %247 = arith.mulf %244, %246 : vector<16x32xf32>
    %cst_108 = arith.constant dense<0.000000e+00> : vector<16xf32>
    %248 = vector.multi_reduction <add>, %247, %cst_108 [1] : vector<16x32xf32> to vector<16xf32>
    %249 = vector.shape_cast %248 : vector<16xf32> to vector<16x1xf32>
    %cst_109 = arith.constant 3.200000e+01 : f32
    %250 = vector.broadcast %cst_109 : f32 to vector<16x1xf32>
    %251 = arith.divf %249, %250 : vector<16x1xf32>
    %252 = vector.broadcast %242 : vector<16x1xf32> to vector<16x32xf32>
    %253 = arith.subf %234, %252 : vector<16x32xf32>
    %cst_110 = arith.constant 9.99999974E-6 : f32
    %254 = vector.broadcast %cst_110 : f32 to vector<16x1xf32>
    %255 = arith.addf %251, %254 : vector<16x1xf32>
    %256 = math.rsqrt %255 : vector<16x1xf32>
    %257 = vector.broadcast %256 : vector<16x1xf32> to vector<16x32xf32>
    %258 = arith.mulf %253, %257 : vector<16x32xf32>
    %259 = vector.broadcast %236 : vector<1x32xf32> to vector<16x32xf32>
    %260 = arith.mulf %258, %259 : vector<16x32xf32>
    %261 = vector.broadcast %238 : vector<1x32xf32> to vector<16x32xf32>
    %262 = arith.addf %260, %261 : vector<16x32xf32>
    %263 = vector.broadcast %8 : vector<16x1xf32> to vector<16x32xf32>
    %264 = arith.mulf %262, %263 : vector<16x32xf32>
    %c1_111 = arith.constant 1 : index
    %c0_112 = arith.constant 0 : index
    %c0_113 = arith.constant 0 : index
    %c0_114 = arith.constant 0 : index
    %265 = vector.load %arg21[%c1_111, %c0_112, %c0_113, %c0_114] : memref<2x3x32x64xf32, #tpu.memory_space<vmem>>, vector<1x3x32x64xf32>
    %266 = vector.shape_cast %265 : vector<1x3x32x64xf32> to vector<3x32x64xf32>
    %c1_115 = arith.constant 1 : index
    %c0_116 = arith.constant 0 : index
    %c0_117 = arith.constant 0 : index
    %267 = vector.load %arg22[%c1_115, %c0_116, %c0_117] : memref<2x1x64xf32, #tpu.memory_space<vmem>>, vector<1x1x64xf32>
    %268 = vector.shape_cast %267 : vector<1x1x64xf32> to vector<1x64xf32>
    %cst_118 = arith.constant 0.000000e+00 : f32
    %269 = vector.broadcast %cst_118 : f32 to vector<1x32xf32>
    %270 = tpu.concatenate %269, %264, %269 in 0 : vector<1x32xf32>, vector<16x32xf32>, vector<1x32xf32> -> vector<18x32xf32>
    %cst_119 = arith.constant 0.000000e+00 : f32
    %271 = vector.broadcast %cst_119 : f32 to vector<16x64xf32>
    %272 = vector.broadcast %268 : vector<1x64xf32> to vector<16x64xf32>
    %273 = arith.addf %271, %272 : vector<16x64xf32>
    %274 = vector.extract_strided_slice %270 {offsets = [0, 0], sizes = [16, 32], strides = [1, 1]} : vector<18x32xf32> to vector<16x32xf32>
    %275 = vector.extract_strided_slice %266 {offsets = [0, 0, 0], sizes = [1, 32, 64], strides = [1, 1, 1]} : vector<3x32x64xf32> to vector<1x32x64xf32>
    %276 = vector.shape_cast %275 : vector<1x32x64xf32> to vector<32x64xf32>
    %cst_120 = arith.constant dense<0.000000e+00> : vector<16x64xf32>
    %277 = tpu.matmul %274, %276, %cst_120 {dimension_numbers = #tpu.dot_dimension_numbers<[1], [0], [0], [1], [0, 0, 1, 1], [], []>} : vector<16x32xf32>, vector<32x64xf32>, vector<16x64xf32> -> vector<16x64xf32>
    %278 = arith.addf %273, %277 : vector<16x64xf32>
    %279 = vector.extract_strided_slice %270 {offsets = [1, 0], sizes = [16, 32], strides = [1, 1]} : vector<18x32xf32> to vector<16x32xf32>
    %280 = vector.extract_strided_slice %266 {offsets = [1, 0, 0], sizes = [1, 32, 64], strides = [1, 1, 1]} : vector<3x32x64xf32> to vector<1x32x64xf32>
    %281 = vector.shape_cast %280 : vector<1x32x64xf32> to vector<32x64xf32>
    %cst_121 = arith.constant dense<0.000000e+00> : vector<16x64xf32>
    %282 = tpu.matmul %279, %281, %cst_121 {dimension_numbers = #tpu.dot_dimension_numbers<[1], [0], [0], [1], [0, 0, 1, 1], [], []>} : vector<16x32xf32>, vector<32x64xf32>, vector<16x64xf32> -> vector<16x64xf32>
    %283 = arith.addf %278, %282 : vector<16x64xf32>
    %284 = vector.extract_strided_slice %270 {offsets = [2, 0], sizes = [16, 32], strides = [1, 1]} : vector<18x32xf32> to vector<16x32xf32>
    %285 = vector.extract_strided_slice %266 {offsets = [2, 0, 0], sizes = [1, 32, 64], strides = [1, 1, 1]} : vector<3x32x64xf32> to vector<1x32x64xf32>
    %286 = vector.shape_cast %285 : vector<1x32x64xf32> to vector<32x64xf32>
    %cst_122 = arith.constant dense<0.000000e+00> : vector<16x64xf32>
    %287 = tpu.matmul %284, %286, %cst_122 {dimension_numbers = #tpu.dot_dimension_numbers<[1], [0], [0], [1], [0, 0, 1, 1], [], []>} : vector<16x32xf32>, vector<32x64xf32>, vector<16x64xf32> -> vector<16x64xf32>
    %288 = arith.addf %283, %287 : vector<16x64xf32>
    %cst_123 = arith.constant 0.000000e+00 : f32
    %289 = vector.broadcast %cst_123 : f32 to vector<16x64xf32>
    %290 = arith.maximumf %288, %289 : vector<16x64xf32>
    %c1_124 = arith.constant 1 : index
    %c0_125 = arith.constant 0 : index
    %c0_126 = arith.constant 0 : index
    %c0_127 = arith.constant 0 : index
    %291 = vector.load %arg23[%c1_124, %c0_125, %c0_126, %c0_127] : memref<2x3x64x32xf32, #tpu.memory_space<vmem>>, vector<1x3x64x32xf32>
    %292 = vector.shape_cast %291 : vector<1x3x64x32xf32> to vector<3x64x32xf32>
    %c1_128 = arith.constant 1 : index
    %c0_129 = arith.constant 0 : index
    %c0_130 = arith.constant 0 : index
    %293 = vector.load %arg24[%c1_128, %c0_129, %c0_130] : memref<2x1x32xf32, #tpu.memory_space<vmem>>, vector<1x1x32xf32>
    %294 = vector.shape_cast %293 : vector<1x1x32xf32> to vector<1x32xf32>
    %cst_131 = arith.constant 0.000000e+00 : f32
    %295 = vector.broadcast %cst_131 : f32 to vector<1x64xf32>
    %296 = tpu.concatenate %295, %290, %295 in 0 : vector<1x64xf32>, vector<16x64xf32>, vector<1x64xf32> -> vector<18x64xf32>
    %cst_132 = arith.constant 0.000000e+00 : f32
    %297 = vector.broadcast %cst_132 : f32 to vector<16x32xf32>
    %298 = vector.broadcast %294 : vector<1x32xf32> to vector<16x32xf32>
    %299 = arith.addf %297, %298 : vector<16x32xf32>
    %300 = vector.extract_strided_slice %296 {offsets = [0, 0], sizes = [16, 64], strides = [1, 1]} : vector<18x64xf32> to vector<16x64xf32>
    %301 = vector.extract_strided_slice %292 {offsets = [0, 0, 0], sizes = [1, 64, 32], strides = [1, 1, 1]} : vector<3x64x32xf32> to vector<1x64x32xf32>
    %302 = vector.shape_cast %301 : vector<1x64x32xf32> to vector<64x32xf32>
    %cst_133 = arith.constant dense<0.000000e+00> : vector<16x32xf32>
    %303 = tpu.matmul %300, %302, %cst_133 {dimension_numbers = #tpu.dot_dimension_numbers<[1], [0], [0], [1], [0, 0, 1, 1], [], []>} : vector<16x64xf32>, vector<64x32xf32>, vector<16x32xf32> -> vector<16x32xf32>
    %304 = arith.addf %299, %303 : vector<16x32xf32>
    %305 = vector.extract_strided_slice %296 {offsets = [1, 0], sizes = [16, 64], strides = [1, 1]} : vector<18x64xf32> to vector<16x64xf32>
    %306 = vector.extract_strided_slice %292 {offsets = [1, 0, 0], sizes = [1, 64, 32], strides = [1, 1, 1]} : vector<3x64x32xf32> to vector<1x64x32xf32>
    %307 = vector.shape_cast %306 : vector<1x64x32xf32> to vector<64x32xf32>
    %cst_134 = arith.constant dense<0.000000e+00> : vector<16x32xf32>
    %308 = tpu.matmul %305, %307, %cst_134 {dimension_numbers = #tpu.dot_dimension_numbers<[1], [0], [0], [1], [0, 0, 1, 1], [], []>} : vector<16x64xf32>, vector<64x32xf32>, vector<16x32xf32> -> vector<16x32xf32>
    %309 = arith.addf %304, %308 : vector<16x32xf32>
    %310 = vector.extract_strided_slice %296 {offsets = [2, 0], sizes = [16, 64], strides = [1, 1]} : vector<18x64xf32> to vector<16x64xf32>
    %311 = vector.extract_strided_slice %292 {offsets = [2, 0, 0], sizes = [1, 64, 32], strides = [1, 1, 1]} : vector<3x64x32xf32> to vector<1x64x32xf32>
    %312 = vector.shape_cast %311 : vector<1x64x32xf32> to vector<64x32xf32>
    %cst_135 = arith.constant dense<0.000000e+00> : vector<16x32xf32>
    %313 = tpu.matmul %310, %312, %cst_135 {dimension_numbers = #tpu.dot_dimension_numbers<[1], [0], [0], [1], [0, 0, 1, 1], [], []>} : vector<16x64xf32>, vector<64x32xf32>, vector<16x32xf32> -> vector<16x32xf32>
    %314 = arith.addf %309, %313 : vector<16x32xf32>
    %315 = arith.addf %314, %264 : vector<16x32xf32>
    %c1_136 = arith.constant 1 : index
    %c0_137 = arith.constant 0 : index
    %c0_138 = arith.constant 0 : index
    %316 = vector.load %arg25[%c1_136, %c0_137, %c0_138] : memref<2x1x32xf32, #tpu.memory_space<vmem>>, vector<1x1x32xf32>
    %317 = vector.shape_cast %316 : vector<1x1x32xf32> to vector<1x32xf32>
    %c1_139 = arith.constant 1 : index
    %c0_140 = arith.constant 0 : index
    %c0_141 = arith.constant 0 : index
    %318 = vector.load %arg26[%c1_139, %c0_140, %c0_141] : memref<2x1x32xf32, #tpu.memory_space<vmem>>, vector<1x1x32xf32>
    %319 = vector.shape_cast %318 : vector<1x1x32xf32> to vector<1x32xf32>
    %cst_142 = arith.constant dense<0.000000e+00> : vector<16xf32>
    %320 = vector.multi_reduction <add>, %315, %cst_142 [1] : vector<16x32xf32> to vector<16xf32>
    %321 = vector.shape_cast %320 : vector<16xf32> to vector<16x1xf32>
    %cst_143 = arith.constant 3.200000e+01 : f32
    %322 = vector.broadcast %cst_143 : f32 to vector<16x1xf32>
    %323 = arith.divf %321, %322 : vector<16x1xf32>
    %324 = vector.broadcast %323 : vector<16x1xf32> to vector<16x32xf32>
    %325 = arith.subf %315, %324 : vector<16x32xf32>
    %326 = vector.broadcast %323 : vector<16x1xf32> to vector<16x32xf32>
    %327 = arith.subf %315, %326 : vector<16x32xf32>
    %328 = arith.mulf %325, %327 : vector<16x32xf32>
    %cst_144 = arith.constant dense<0.000000e+00> : vector<16xf32>
    %329 = vector.multi_reduction <add>, %328, %cst_144 [1] : vector<16x32xf32> to vector<16xf32>
    %330 = vector.shape_cast %329 : vector<16xf32> to vector<16x1xf32>
    %cst_145 = arith.constant 3.200000e+01 : f32
    %331 = vector.broadcast %cst_145 : f32 to vector<16x1xf32>
    %332 = arith.divf %330, %331 : vector<16x1xf32>
    %333 = vector.broadcast %323 : vector<16x1xf32> to vector<16x32xf32>
    %334 = arith.subf %315, %333 : vector<16x32xf32>
    %cst_146 = arith.constant 9.99999974E-6 : f32
    %335 = vector.broadcast %cst_146 : f32 to vector<16x1xf32>
    %336 = arith.addf %332, %335 : vector<16x1xf32>
    %337 = math.rsqrt %336 : vector<16x1xf32>
    %338 = vector.broadcast %337 : vector<16x1xf32> to vector<16x32xf32>
    %339 = arith.mulf %334, %338 : vector<16x32xf32>
    %340 = vector.broadcast %317 : vector<1x32xf32> to vector<16x32xf32>
    %341 = arith.mulf %339, %340 : vector<16x32xf32>
    %342 = vector.broadcast %319 : vector<1x32xf32> to vector<16x32xf32>
    %343 = arith.addf %341, %342 : vector<16x32xf32>
    %344 = vector.broadcast %8 : vector<16x1xf32> to vector<16x32xf32>
    %345 = arith.mulf %343, %344 : vector<16x32xf32>
    %c0_147 = arith.constant 0 : index
    %c0_148 = arith.constant 0 : index
    %c0_149 = arith.constant 0 : index
    %346 = vector.load %arg27[%c0_147, %c0_148, %c0_149] : memref<1x16x32xf32, #tpu.memory_space<vmem>>, vector<1x16x32xf32>
    %347 = vector.shape_cast %346 : vector<1x16x32xf32> to vector<16x32xf32>
    %348 = vector.shape_cast %345 : vector<16x32xf32> to vector<1x16x32xf32>
    tpu.vector_store %arg27[%c0_147, %c0_148, %c0_149], %348 {strides = array<i32>} : memref<1x16x32xf32, #tpu.memory_space<vmem>>, vector<1x16x32xf32>,
    %c0_150 = arith.constant 0 : index
    %c0_151 = arith.constant 0 : index
    %c0_152 = arith.constant 0 : index
    %349 = vector.load %arg3[%c0_150, %c0_151, %c0_152] : memref<1x16x2xf32, #tpu.memory_space<vmem>>, vector<1x16x2xf32>
    %350 = vector.shape_cast %349 : vector<1x16x2xf32> to vector<16x2xf32>
    %c0_153 = arith.constant 0 : index
    %c0_154 = arith.constant 0 : index
    %c0_155 = arith.constant 0 : index
    %351 = vector.load %arg7[%c0_153, %c0_154, %c0_155] : memref<7x2x32xf32, #tpu.memory_space<vmem>>, vector<7x2x32xf32>
    %c0_156 = arith.constant 0 : index
    %c0_157 = arith.constant 0 : index
    %352 = vector.load %arg8[%c0_156, %c0_157] : memref<1x32xf32, #tpu.memory_space<vmem>>, vector<1x32xf32>
    %cst_158 = arith.constant 0.000000e+00 : f32
    %353 = vector.broadcast %cst_158 : f32 to vector<3x2xf32>
    %354 = tpu.concatenate %353, %350, %353 in 0 : vector<3x2xf32>, vector<16x2xf32>, vector<3x2xf32> -> vector<22x2xf32>
    %cst_159 = arith.constant 0.000000e+00 : f32
    %355 = vector.broadcast %cst_159 : f32 to vector<16x32xf32>
    %356 = vector.broadcast %352 : vector<1x32xf32> to vector<16x32xf32>
    %357 = arith.addf %355, %356 : vector<16x32xf32>
    %358 = vector.extract_strided_slice %354 {offsets = [0, 0], sizes = [16, 2], strides = [1, 1]} : vector<22x2xf32> to vector<16x2xf32>
    %359 = vector.extract_strided_slice %351 {offsets = [0, 0, 0], sizes = [1, 2, 32], strides = [1, 1, 1]} : vector<7x2x32xf32> to vector<1x2x32xf32>
    %360 = vector.shape_cast %359 : vector<1x2x32xf32> to vector<2x32xf32>
    %cst_160 = arith.constant dense<0.000000e+00> : vector<16x32xf32>
    %361 = tpu.matmul %358, %360, %cst_160 {dimension_numbers = #tpu.dot_dimension_numbers<[1], [0], [0], [1], [0, 0, 1, 1], [], []>} : vector<16x2xf32>, vector<2x32xf32>, vector<16x32xf32> -> vector<16x32xf32>
    %362 = arith.addf %357, %361 : vector<16x32xf32>
    %363 = vector.extract_strided_slice %354 {offsets = [1, 0], sizes = [16, 2], strides = [1, 1]} : vector<22x2xf32> to vector<16x2xf32>
    %364 = vector.extract_strided_slice %351 {offsets = [1, 0, 0], sizes = [1, 2, 32], strides = [1, 1, 1]} : vector<7x2x32xf32> to vector<1x2x32xf32>
    %365 = vector.shape_cast %364 : vector<1x2x32xf32> to vector<2x32xf32>
    %cst_161 = arith.constant dense<0.000000e+00> : vector<16x32xf32>
    %366 = tpu.matmul %363, %365, %cst_161 {dimension_numbers = #tpu.dot_dimension_numbers<[1], [0], [0], [1], [0, 0, 1, 1], [], []>} : vector<16x2xf32>, vector<2x32xf32>, vector<16x32xf32> -> vector<16x32xf32>
    %367 = arith.addf %362, %366 : vector<16x32xf32>
    %368 = vector.extract_strided_slice %354 {offsets = [2, 0], sizes = [16, 2], strides = [1, 1]} : vector<22x2xf32> to vector<16x2xf32>
    %369 = vector.extract_strided_slice %351 {offsets = [2, 0, 0], sizes = [1, 2, 32], strides = [1, 1, 1]} : vector<7x2x32xf32> to vector<1x2x32xf32>
    %370 = vector.shape_cast %369 : vector<1x2x32xf32> to vector<2x32xf32>
    %cst_162 = arith.constant dense<0.000000e+00> : vector<16x32xf32>
    %371 = tpu.matmul %368, %370, %cst_162 {dimension_numbers = #tpu.dot_dimension_numbers<[1], [0], [0], [1], [0, 0, 1, 1], [], []>} : vector<16x2xf32>, vector<2x32xf32>, vector<16x32xf32> -> vector<16x32xf32>
    %372 = arith.addf %367, %371 : vector<16x32xf32>
    %373 = vector.extract_strided_slice %354 {offsets = [3, 0], sizes = [16, 2], strides = [1, 1]} : vector<22x2xf32> to vector<16x2xf32>
    %374 = vector.extract_strided_slice %351 {offsets = [3, 0, 0], sizes = [1, 2, 32], strides = [1, 1, 1]} : vector<7x2x32xf32> to vector<1x2x32xf32>
    %375 = vector.shape_cast %374 : vector<1x2x32xf32> to vector<2x32xf32>
    %cst_163 = arith.constant dense<0.000000e+00> : vector<16x32xf32>
    %376 = tpu.matmul %373, %375, %cst_163 {dimension_numbers = #tpu.dot_dimension_numbers<[1], [0], [0], [1], [0, 0, 1, 1], [], []>} : vector<16x2xf32>, vector<2x32xf32>, vector<16x32xf32> -> vector<16x32xf32>
    %377 = arith.addf %372, %376 : vector<16x32xf32>
    %378 = vector.extract_strided_slice %354 {offsets = [4, 0], sizes = [16, 2], strides = [1, 1]} : vector<22x2xf32> to vector<16x2xf32>
    %379 = vector.extract_strided_slice %351 {offsets = [4, 0, 0], sizes = [1, 2, 32], strides = [1, 1, 1]} : vector<7x2x32xf32> to vector<1x2x32xf32>
    %380 = vector.shape_cast %379 : vector<1x2x32xf32> to vector<2x32xf32>
    %cst_164 = arith.constant dense<0.000000e+00> : vector<16x32xf32>
    %381 = tpu.matmul %378, %380, %cst_164 {dimension_numbers = #tpu.dot_dimension_numbers<[1], [0], [0], [1], [0, 0, 1, 1], [], []>} : vector<16x2xf32>, vector<2x32xf32>, vector<16x32xf32> -> vector<16x32xf32>
    %382 = arith.addf %377, %381 : vector<16x32xf32>
    %383 = vector.extract_strided_slice %354 {offsets = [5, 0], sizes = [16, 2], strides = [1, 1]} : vector<22x2xf32> to vector<16x2xf32>
    %384 = vector.extract_strided_slice %351 {offsets = [5, 0, 0], sizes = [1, 2, 32], strides = [1, 1, 1]} : vector<7x2x32xf32> to vector<1x2x32xf32>
    %385 = vector.shape_cast %384 : vector<1x2x32xf32> to vector<2x32xf32>
    %cst_165 = arith.constant dense<0.000000e+00> : vector<16x32xf32>
    %386 = tpu.matmul %383, %385, %cst_165 {dimension_numbers = #tpu.dot_dimension_numbers<[1], [0], [0], [1], [0, 0, 1, 1], [], []>} : vector<16x2xf32>, vector<2x32xf32>, vector<16x32xf32> -> vector<16x32xf32>
    %387 = arith.addf %382, %386 : vector<16x32xf32>
    %388 = vector.extract_strided_slice %354 {offsets = [6, 0], sizes = [16, 2], strides = [1, 1]} : vector<22x2xf32> to vector<16x2xf32>
    %389 = vector.extract_strided_slice %351 {offsets = [6, 0, 0], sizes = [1, 2, 32], strides = [1, 1, 1]} : vector<7x2x32xf32> to vector<1x2x32xf32>
    %390 = vector.shape_cast %389 : vector<1x2x32xf32> to vector<2x32xf32>
    %cst_166 = arith.constant dense<0.000000e+00> : vector<16x32xf32>
    %391 = tpu.matmul %388, %390, %cst_166 {dimension_numbers = #tpu.dot_dimension_numbers<[1], [0], [0], [1], [0, 0, 1, 1], [], []>} : vector<16x2xf32>, vector<2x32xf32>, vector<16x32xf32> -> vector<16x32xf32>
    %392 = arith.addf %387, %391 : vector<16x32xf32>
    %393 = math.tanh %392 : vector<16x32xf32>
    %c0_167 = arith.constant 0 : index
    %c0_168 = arith.constant 0 : index
    %c0_169 = arith.constant 0 : index
    %394 = vector.load %arg9[%c0_167, %c0_168, %c0_169] : memref<3x32x32xf32, #tpu.memory_space<vmem>>, vector<3x32x32xf32>
    %c0_170 = arith.constant 0 : index
    %c0_171 = arith.constant 0 : index
    %395 = vector.load %arg10[%c0_170, %c0_171] : memref<1x32xf32, #tpu.memory_space<vmem>>, vector<1x32xf32>
    %cst_172 = arith.constant 0.000000e+00 : f32
    %396 = vector.broadcast %cst_172 : f32 to vector<1x32xf32>
    %397 = tpu.concatenate %396, %393, %396 in 0 : vector<1x32xf32>, vector<16x32xf32>, vector<1x32xf32> -> vector<18x32xf32>
    %cst_173 = arith.constant 0.000000e+00 : f32
    %398 = vector.broadcast %cst_173 : f32 to vector<16x32xf32>
    %399 = vector.broadcast %395 : vector<1x32xf32> to vector<16x32xf32>
    %400 = arith.addf %398, %399 : vector<16x32xf32>
    %401 = vector.extract_strided_slice %397 {offsets = [0, 0], sizes = [16, 32], strides = [1, 1]} : vector<18x32xf32> to vector<16x32xf32>
    %402 = vector.extract_strided_slice %394 {offsets = [0, 0, 0], sizes = [1, 32, 32], strides = [1, 1, 1]} : vector<3x32x32xf32> to vector<1x32x32xf32>
    %403 = vector.shape_cast %402 : vector<1x32x32xf32> to vector<32x32xf32>
    %cst_174 = arith.constant dense<0.000000e+00> : vector<16x32xf32>
    %404 = tpu.matmul %401, %403, %cst_174 {dimension_numbers = #tpu.dot_dimension_numbers<[1], [0], [0], [1], [0, 0, 1, 1], [], []>} : vector<16x32xf32>, vector<32x32xf32>, vector<16x32xf32> -> vector<16x32xf32>
    %405 = arith.addf %400, %404 : vector<16x32xf32>
    %406 = vector.extract_strided_slice %397 {offsets = [1, 0], sizes = [16, 32], strides = [1, 1]} : vector<18x32xf32> to vector<16x32xf32>
    %407 = vector.extract_strided_slice %394 {offsets = [1, 0, 0], sizes = [1, 32, 32], strides = [1, 1, 1]} : vector<3x32x32xf32> to vector<1x32x32xf32>
    %408 = vector.shape_cast %407 : vector<1x32x32xf32> to vector<32x32xf32>
    %cst_175 = arith.constant dense<0.000000e+00> : vector<16x32xf32>
    %409 = tpu.matmul %406, %408, %cst_175 {dimension_numbers = #tpu.dot_dimension_numbers<[1], [0], [0], [1], [0, 0, 1, 1], [], []>} : vector<16x32xf32>, vector<32x32xf32>, vector<16x32xf32> -> vector<16x32xf32>
    %410 = arith.addf %405, %409 : vector<16x32xf32>
    %411 = vector.extract_strided_slice %397 {offsets = [2, 0], sizes = [16, 32], strides = [1, 1]} : vector<18x32xf32> to vector<16x32xf32>
    %412 = vector.extract_strided_slice %394 {offsets = [2, 0, 0], sizes = [1, 32, 32], strides = [1, 1, 1]} : vector<3x32x32xf32> to vector<1x32x32xf32>
    %413 = vector.shape_cast %412 : vector<1x32x32xf32> to vector<32x32xf32>
    %cst_176 = arith.constant dense<0.000000e+00> : vector<16x32xf32>
    %414 = tpu.matmul %411, %413, %cst_176 {dimension_numbers = #tpu.dot_dimension_numbers<[1], [0], [0], [1], [0, 0, 1, 1], [], []>} : vector<16x32xf32>, vector<32x32xf32>, vector<16x32xf32> -> vector<16x32xf32>
    %415 = arith.addf %410, %414 : vector<16x32xf32>
    %416 = math.tanh %415 : vector<16x32xf32>
    %c0_177 = arith.constant 0 : index
    %c0_178 = arith.constant 0 : index
    %c0_179 = arith.constant 0 : index
    %417 = vector.load %arg11[%c0_177, %c0_178, %c0_179] : memref<3x32x32xf32, #tpu.memory_space<vmem>>, vector<3x32x32xf32>
    %c0_180 = arith.constant 0 : index
    %c0_181 = arith.constant 0 : index
    %418 = vector.load %arg12[%c0_180, %c0_181] : memref<1x32xf32, #tpu.memory_space<vmem>>, vector<1x32xf32>
    %cst_182 = arith.constant 0.000000e+00 : f32
    %419 = vector.broadcast %cst_182 : f32 to vector<1x32xf32>
    %420 = tpu.concatenate %419, %416, %419 in 0 : vector<1x32xf32>, vector<16x32xf32>, vector<1x32xf32> -> vector<18x32xf32>
    %cst_183 = arith.constant 0.000000e+00 : f32
    %421 = vector.broadcast %cst_183 : f32 to vector<16x32xf32>
    %422 = vector.broadcast %418 : vector<1x32xf32> to vector<16x32xf32>
    %423 = arith.addf %421, %422 : vector<16x32xf32>
    %424 = vector.extract_strided_slice %420 {offsets = [0, 0], sizes = [16, 32], strides = [1, 1]} : vector<18x32xf32> to vector<16x32xf32>
    %425 = vector.extract_strided_slice %417 {offsets = [0, 0, 0], sizes = [1, 32, 32], strides = [1, 1, 1]} : vector<3x32x32xf32> to vector<1x32x32xf32>
    %426 = vector.shape_cast %425 : vector<1x32x32xf32> to vector<32x32xf32>
    %cst_184 = arith.constant dense<0.000000e+00> : vector<16x32xf32>
    %427 = tpu.matmul %424, %426, %cst_184 {dimension_numbers = #tpu.dot_dimension_numbers<[1], [0], [0], [1], [0, 0, 1, 1], [], []>} : vector<16x32xf32>, vector<32x32xf32>, vector<16x32xf32> -> vector<16x32xf32>
    %428 = arith.addf %423, %427 : vector<16x32xf32>
    %429 = vector.extract_strided_slice %420 {offsets = [1, 0], sizes = [16, 32], strides = [1, 1]} : vector<18x32xf32> to vector<16x32xf32>
    %430 = vector.extract_strided_slice %417 {offsets = [1, 0, 0], sizes = [1, 32, 32], strides = [1, 1, 1]} : vector<3x32x32xf32> to vector<1x32x32xf32>
    %431 = vector.shape_cast %430 : vector<1x32x32xf32> to vector<32x32xf32>
    %cst_185 = arith.constant dense<0.000000e+00> : vector<16x32xf32>
    %432 = tpu.matmul %429, %431, %cst_185 {dimension_numbers = #tpu.dot_dimension_numbers<[1], [0], [0], [1], [0, 0, 1, 1], [], []>} : vector<16x32xf32>, vector<32x32xf32>, vector<16x32xf32> -> vector<16x32xf32>
    %433 = arith.addf %428, %432 : vector<16x32xf32>
    %434 = vector.extract_strided_slice %420 {offsets = [2, 0], sizes = [16, 32], strides = [1, 1]} : vector<18x32xf32> to vector<16x32xf32>
    %435 = vector.extract_strided_slice %417 {offsets = [2, 0, 0], sizes = [1, 32, 32], strides = [1, 1, 1]} : vector<3x32x32xf32> to vector<1x32x32xf32>
    %436 = vector.shape_cast %435 : vector<1x32x32xf32> to vector<32x32xf32>
    %cst_186 = arith.constant dense<0.000000e+00> : vector<16x32xf32>
    %437 = tpu.matmul %434, %436, %cst_186 {dimension_numbers = #tpu.dot_dimension_numbers<[1], [0], [0], [1], [0, 0, 1, 1], [], []>} : vector<16x32xf32>, vector<32x32xf32>, vector<16x32xf32> -> vector<16x32xf32>
    %438 = arith.addf %433, %437 : vector<16x32xf32>
    %439 = math.tanh %438 : vector<16x32xf32>
    %c0_187 = arith.constant 0 : index
    %c0_188 = arith.constant 0 : index
    %c0_189 = arith.constant 0 : index
    %440 = vector.load %arg13[%c0_187, %c0_188, %c0_189] : memref<1x32x32xf32, #tpu.memory_space<vmem>>, vector<1x32x32xf32>
    %c0_190 = arith.constant 0 : index
    %c0_191 = arith.constant 0 : index
    %441 = vector.load %arg14[%c0_190, %c0_191] : memref<1x32xf32, #tpu.memory_space<vmem>>, vector<1x32xf32>
    %cst_192 = arith.constant 0.000000e+00 : f32
    %442 = vector.broadcast %cst_192 : f32 to vector<16x32xf32>
    %443 = vector.broadcast %441 : vector<1x32xf32> to vector<16x32xf32>
    %444 = arith.addf %442, %443 : vector<16x32xf32>
    %445 = vector.shape_cast %440 : vector<1x32x32xf32> to vector<32x32xf32>
    %cst_193 = arith.constant dense<0.000000e+00> : vector<16x32xf32>
    %446 = tpu.matmul %439, %445, %cst_193 {dimension_numbers = #tpu.dot_dimension_numbers<[1], [0], [0], [1], [0, 0, 1, 1], [], []>} : vector<16x32xf32>, vector<32x32xf32>, vector<16x32xf32> -> vector<16x32xf32>
    %447 = arith.addf %444, %446 : vector<16x32xf32>
    %448 = arith.addf %345, %447 : vector<16x32xf32>
    %c0_194 = arith.constant 0 : index
    %c0_195 = arith.constant 0 : index
    %c0_196 = arith.constant 0 : index
    %449 = vector.load %arg28[%c0_194, %c0_195, %c0_196] : memref<1x16x32xf32, #tpu.memory_space<vmem>>, vector<1x16x32xf32>
    %450 = vector.shape_cast %449 : vector<1x16x32xf32> to vector<16x32xf32>
    %451 = vector.shape_cast %448 : vector<16x32xf32> to vector<1x16x32xf32>
    tpu.vector_store %arg28[%c0_194, %c0_195, %c0_196], %451 {strides = array<i32>} : memref<1x16x32xf32, #tpu.memory_space<vmem>>, vector<1x16x32xf32>,
    return
  }
  func.func @transform_0(%arg0: i32, %arg1: memref<2xi32, #tpu.memory_space<smem>>) -> (i32, i32, i32) {
    %c0_i32 = arith.constant 0 : i32
    %c0_i32_0 = arith.constant 0 : i32
    %c0_i32_1 = arith.constant 0 : i32
    return %arg0, %c0_i32, %c0_i32_0 : i32, i32, i32
  }
  func.func @transform_1(%arg0: i32, %arg1: memref<2xi32, #tpu.memory_space<smem>>) -> (i32, i32, i32) {
    %c0_i32 = arith.constant 0 : i32
    %c0_i32_0 = arith.constant 0 : i32
    %c0_i32_1 = arith.constant 0 : i32
    return %arg0, %c0_i32, %c0_i32_0 : i32, i32, i32
  }
  func.func @transform_2(%arg0: i32, %arg1: memref<2xi32, #tpu.memory_space<smem>>) -> (i32, i32) {
    %c0_i32 = arith.constant 0 : i32
    %c0_i32_0 = arith.constant 0 : i32
    %c0_i32_1 = arith.constant 0 : i32
    return %c0_i32, %c0_i32_0 : i32, i32
  }
  func.func @transform_3(%arg0: i32, %arg1: memref<2xi32, #tpu.memory_space<smem>>) -> (i32, i32) {
    %c0_i32 = arith.constant 0 : i32
    %c0_i32_0 = arith.constant 0 : i32
    %c0_i32_1 = arith.constant 0 : i32
    return %c0_i32, %c0_i32_0 : i32, i32
  }
  func.func @transform_4(%arg0: i32, %arg1: memref<2xi32, #tpu.memory_space<smem>>) -> (i32, i32) {
    %c0_i32 = arith.constant 0 : i32
    %c0_i32_0 = arith.constant 0 : i32
    %c0_i32_1 = arith.constant 0 : i32
    return %c0_i32, %c0_i32_0 : i32, i32
  }
  func.func @transform_5(%arg0: i32, %arg1: memref<2xi32, #tpu.memory_space<smem>>) -> (i32, i32, i32) {
    %c0_i32 = arith.constant 0 : i32
    %c0_i32_0 = arith.constant 0 : i32
    %c0_i32_1 = arith.constant 0 : i32
    %c0_i32_2 = arith.constant 0 : i32
    return %c0_i32, %c0_i32_0, %c0_i32_1 : i32, i32, i32
  }
  func.func @transform_6(%arg0: i32, %arg1: memref<2xi32, #tpu.memory_space<smem>>) -> (i32, i32) {
    %c0_i32 = arith.constant 0 : i32
    %c0_i32_0 = arith.constant 0 : i32
    %c0_i32_1 = arith.constant 0 : i32
    return %c0_i32, %c0_i32_0 : i32, i32
  }
  func.func @transform_7(%arg0: i32, %arg1: memref<2xi32, #tpu.memory_space<smem>>) -> (i32, i32, i32) {
    %c0_i32 = arith.constant 0 : i32
    %c0_i32_0 = arith.constant 0 : i32
    %c0_i32_1 = arith.constant 0 : i32
    %c0_i32_2 = arith.constant 0 : i32
    return %c0_i32, %c0_i32_0, %c0_i32_1 : i32, i32, i32
  }
  func.func @transform_8(%arg0: i32, %arg1: memref<2xi32, #tpu.memory_space<smem>>) -> (i32, i32) {
    %c0_i32 = arith.constant 0 : i32
    %c0_i32_0 = arith.constant 0 : i32
    %c0_i32_1 = arith.constant 0 : i32
    return %c0_i32, %c0_i32_0 : i32, i32
  }
  func.func @transform_9(%arg0: i32, %arg1: memref<2xi32, #tpu.memory_space<smem>>) -> (i32, i32, i32) {
    %c0_i32 = arith.constant 0 : i32
    %c0_i32_0 = arith.constant 0 : i32
    %c0_i32_1 = arith.constant 0 : i32
    %c0_i32_2 = arith.constant 0 : i32
    return %c0_i32, %c0_i32_0, %c0_i32_1 : i32, i32, i32
  }
  func.func @transform_10(%arg0: i32, %arg1: memref<2xi32, #tpu.memory_space<smem>>) -> (i32, i32) {
    %c0_i32 = arith.constant 0 : i32
    %c0_i32_0 = arith.constant 0 : i32
    %c0_i32_1 = arith.constant 0 : i32
    return %c0_i32, %c0_i32_0 : i32, i32
  }
  func.func @transform_11(%arg0: i32, %arg1: memref<2xi32, #tpu.memory_space<smem>>) -> (i32, i32, i32) {
    %c0_i32 = arith.constant 0 : i32
    %c0_i32_0 = arith.constant 0 : i32
    %c0_i32_1 = arith.constant 0 : i32
    %c0_i32_2 = arith.constant 0 : i32
    return %c0_i32, %c0_i32_0, %c0_i32_1 : i32, i32, i32
  }
  func.func @transform_12(%arg0: i32, %arg1: memref<2xi32, #tpu.memory_space<smem>>) -> (i32, i32) {
    %c0_i32 = arith.constant 0 : i32
    %c0_i32_0 = arith.constant 0 : i32
    %c0_i32_1 = arith.constant 0 : i32
    return %c0_i32, %c0_i32_0 : i32, i32
  }
  func.func @transform_13(%arg0: i32, %arg1: memref<2xi32, #tpu.memory_space<smem>>) -> (i32, i32, i32) {
    %c0_i32 = arith.constant 0 : i32
    %c0_i32_0 = arith.constant 0 : i32
    %c0_i32_1 = arith.constant 0 : i32
    %c0_i32_2 = arith.constant 0 : i32
    return %c0_i32, %c0_i32_0, %c0_i32_1 : i32, i32, i32
  }
  func.func @transform_14(%arg0: i32, %arg1: memref<2xi32, #tpu.memory_space<smem>>) -> (i32, i32, i32) {
    %c0_i32 = arith.constant 0 : i32
    %c0_i32_0 = arith.constant 0 : i32
    %c0_i32_1 = arith.constant 0 : i32
    %c0_i32_2 = arith.constant 0 : i32
    return %c0_i32, %c0_i32_0, %c0_i32_1 : i32, i32, i32
  }
  func.func @transform_15(%arg0: i32, %arg1: memref<2xi32, #tpu.memory_space<smem>>) -> (i32, i32, i32) {
    %c0_i32 = arith.constant 0 : i32
    %c0_i32_0 = arith.constant 0 : i32
    %c0_i32_1 = arith.constant 0 : i32
    %c0_i32_2 = arith.constant 0 : i32
    return %c0_i32, %c0_i32_0, %c0_i32_1 : i32, i32, i32
  }
  func.func @transform_16(%arg0: i32, %arg1: memref<2xi32, #tpu.memory_space<smem>>) -> (i32, i32, i32) {
    %c0_i32 = arith.constant 0 : i32
    %c0_i32_0 = arith.constant 0 : i32
    %c0_i32_1 = arith.constant 0 : i32
    %c0_i32_2 = arith.constant 0 : i32
    return %c0_i32, %c0_i32_0, %c0_i32_1 : i32, i32, i32
  }
  func.func @transform_17(%arg0: i32, %arg1: memref<2xi32, #tpu.memory_space<smem>>) -> (i32, i32, i32) {
    %c0_i32 = arith.constant 0 : i32
    %c0_i32_0 = arith.constant 0 : i32
    %c0_i32_1 = arith.constant 0 : i32
    %c0_i32_2 = arith.constant 0 : i32
    return %c0_i32, %c0_i32_0, %c0_i32_1 : i32, i32, i32
  }
  func.func @transform_18(%arg0: i32, %arg1: memref<2xi32, #tpu.memory_space<smem>>) -> (i32, i32, i32) {
    %c0_i32 = arith.constant 0 : i32
    %c0_i32_0 = arith.constant 0 : i32
    %c0_i32_1 = arith.constant 0 : i32
    %c0_i32_2 = arith.constant 0 : i32
    return %c0_i32, %c0_i32_0, %c0_i32_1 : i32, i32, i32
  }
  func.func @transform_19(%arg0: i32, %arg1: memref<2xi32, #tpu.memory_space<smem>>) -> (i32, i32, i32, i32) {
    %c0_i32 = arith.constant 0 : i32
    %c0_i32_0 = arith.constant 0 : i32
    %c0_i32_1 = arith.constant 0 : i32
    %c0_i32_2 = arith.constant 0 : i32
    %c0_i32_3 = arith.constant 0 : i32
    return %c0_i32, %c0_i32_0, %c0_i32_1, %c0_i32_2 : i32, i32, i32, i32
  }
  func.func @transform_20(%arg0: i32, %arg1: memref<2xi32, #tpu.memory_space<smem>>) -> (i32, i32, i32) {
    %c0_i32 = arith.constant 0 : i32
    %c0_i32_0 = arith.constant 0 : i32
    %c0_i32_1 = arith.constant 0 : i32
    %c0_i32_2 = arith.constant 0 : i32
    return %c0_i32, %c0_i32_0, %c0_i32_1 : i32, i32, i32
  }
  func.func @transform_21(%arg0: i32, %arg1: memref<2xi32, #tpu.memory_space<smem>>) -> (i32, i32, i32, i32) {
    %c0_i32 = arith.constant 0 : i32
    %c0_i32_0 = arith.constant 0 : i32
    %c0_i32_1 = arith.constant 0 : i32
    %c0_i32_2 = arith.constant 0 : i32
    %c0_i32_3 = arith.constant 0 : i32
    return %c0_i32, %c0_i32_0, %c0_i32_1, %c0_i32_2 : i32, i32, i32, i32
  }
  func.func @transform_22(%arg0: i32, %arg1: memref<2xi32, #tpu.memory_space<smem>>) -> (i32, i32, i32) {
    %c0_i32 = arith.constant 0 : i32
    %c0_i32_0 = arith.constant 0 : i32
    %c0_i32_1 = arith.constant 0 : i32
    %c0_i32_2 = arith.constant 0 : i32
    return %c0_i32, %c0_i32_0, %c0_i32_1 : i32, i32, i32
  }
  func.func @transform_23(%arg0: i32, %arg1: memref<2xi32, #tpu.memory_space<smem>>) -> (i32, i32, i32) {
    %c0_i32 = arith.constant 0 : i32
    %c0_i32_0 = arith.constant 0 : i32
    %c0_i32_1 = arith.constant 0 : i32
    %c0_i32_2 = arith.constant 0 : i32
    return %c0_i32, %c0_i32_0, %c0_i32_1 : i32, i32, i32
  }
  func.func @transform_24(%arg0: i32, %arg1: memref<2xi32, #tpu.memory_space<smem>>) -> (i32, i32, i32) {
    %c0_i32 = arith.constant 0 : i32
    %c0_i32_0 = arith.constant 0 : i32
    %c0_i32_1 = arith.constant 0 : i32
    %c0_i32_2 = arith.constant 0 : i32
    return %c0_i32, %c0_i32_0, %c0_i32_1 : i32, i32, i32
  }
  func.func @transform_25(%arg0: i32, %arg1: memref<2xi32, #tpu.memory_space<smem>>) -> (i32, i32, i32) {
    %c0_i32 = arith.constant 0 : i32
    %c0_i32_0 = arith.constant 0 : i32
    %c0_i32_1 = arith.constant 0 : i32
    return %arg0, %c0_i32, %c0_i32_0 : i32, i32, i32
  }
  func.func @transform_26(%arg0: i32, %arg1: memref<2xi32, #tpu.memory_space<smem>>) -> (i32, i32, i32) {
    %c0_i32 = arith.constant 0 : i32
    %c0_i32_0 = arith.constant 0 : i32
    %c0_i32_1 = arith.constant 0 : i32
    return %arg0, %c0_i32, %c0_i32_0 : i32, i32, i32
  }
}

</mosaic_0001>

<bundles_post_ra>
// kernel: embvc_forward.1
= control target key start
LH: loop header
LB: loop body
LE: loop exit
PB: predicated region body
PF: predicated region fallthrough
CT: control target
= control target key end

     0   :  { %s3402_s30 = smov [#allocation3]   ;;  %s4453_s0 = inlined_call_operand.vmem [shape: s32[2], index: 0, kind: input, shape index: {}]   ;;  %s4454_s1 = inlined_call_operand.vmem [shape: f32[2,16,8], index: 1, kind: input, shape index: {}]   ;;  %s4455_s2 = inlined_call_operand.vmem [shape: f32[2,16,2], index: 2, kind: input, shape index: {}]   ;;  %s4456_s3 = inlined_call_operand.vmem [shape: f32[16,32], index: 3, kind: input, shape index: {}]   ;;  %s4457_s4 = inlined_call_operand.vmem [shape: f32[8,32], index: 4, kind: input, shape index: {}]   ;;  %s4458_s5 = inlined_call_operand.vmem [shape: f32[1,32], index: 5, kind: input, shape index: {}]   ;;  %s4459_s6 = inlined_call_operand.vmem [shape: f32[7,2,32], index: 6, kind: input, shape index: {}]   ;;  %s4460_s7 = inlined_call_operand.vmem [shape: f32[1,32], index: 7, kind: input, shape index: {}]   ;;  %s4461_s8 = inlined_call_operand.vmem [shape: f32[3,32,32], index: 8, kind: input, shape index: {}]   ;;  %s4462_s9 = inlined_call_operand.vmem [shape: f32[1,32], index: 9, kind: input, shape index: {}]   ;;  %s4463_s10 = inlined_call_operand.vmem [shape: f32[3,32,32], index: 10, kind: input, shape index: {}]   ;;  %s4464_s11 = inlined_call_operand.vmem [shape: f32[1,32], index: 11, kind: input, shape index: {}]   ;;  %s4465_s12 = inlined_call_operand.vmem [shape: f32[1,32,32], index: 12, kind: input, shape index: {}]   ;;  %s4466_s13 = inlined_call_operand.vmem [shape: f32[1,32], index: 13, kind: input, shape index: {}]   ;;  %s4467_s14 = inlined_call_operand.vmem [shape: f32[2,32,96], index: 14, kind: input, shape index: {}]   ;;  %s4468_s15 = inlined_call_operand.vmem [shape: f32[2,1,96], index: 15, kind: input, shape index: {}]   ;;  %s4469_s16 = inlined_call_operand.vmem [shape: f32[2,32,32], index: 16, kind: input, shape index: {}]   ;;  %s4470_s17 = inlined_call_operand.vmem [shape: f32[2,1,32], index: 17, kind: input, shape index: {}]   ;;  %s4471_s18 = inlined_call_operand.vmem [shape: f32[2,1,32], index: 18, kind: input, shape index: {}]   ;;  %s4472_s19 = inlined_call_operand.vmem [shape: f32[2,1,32], index: 19, kind: input, shape index: {}]   ;;  %s4473_s20 = inlined_call_operand.vmem [shape: f32[2,3,32,64], index: 20, kind: input, shape index: {}]   ;;  %s4474_s21 = inlined_call_operand.vmem [shape: f32[2,1,64], index: 21, kind: input, shape index: {}]   ;;  %s4475_s22 = inlined_call_operand.vmem [shape: f32[2,3,64,32], index: 22, kind: input, shape index: {}]   ;;  %s4476_s23 = inlined_call_operand.vmem [shape: f32[2,1,32], index: 23, kind: input, shape index: {}]   ;;  %s4477_s24 = inlined_call_operand.vmem [shape: f32[2,1,32], index: 24, kind: input, shape index: {}]   ;;  %s4478_s25 = inlined_call_operand.vmem [shape: f32[2,1,32], index: 25, kind: input, shape index: {}]   ;;  %s4479_s26 = inlined_call_operand.hbm [shape: f32[2,16,32], index: 26, kind: output, shape index: {0}]   ;;  %s4480_s27 = inlined_call_operand.hbm [shape: f32[2,16,32], index: 27, kind: output, shape index: {1}]  }
   0x1   :  { %4505 = sst [smem:[#allocation16_spill]] %s4453_s0 }
   0x2   :  { %4506 = sst [smem:[#allocation17_spill]] %s4454_s1 }
   0x3   :  { %4507 = sst [smem:[#allocation18_spill]] %s4455_s2 }
   0x4   :  { %4508 = sst [smem:[#allocation19_spill]] %s4456_s3 }
   0x5   :  { %4509 = sst [smem:[#allocation20_spill]] %s4457_s4 }
   0x6   :  { %4510 = sst [smem:[#allocation21_spill]] %s4458_s5 }
   0x7   :  { %4511 = sst [smem:[#allocation22_spill]] %s4459_s6 }
   0x8   :  { %4512 = sst [smem:[#allocation23_spill]] %s4460_s7 }
   0x9   :  { %4513 = sst [smem:[#allocation24_spill]] %s4461_s8 }
   0xa   :  { %4514 = sst [smem:[#allocation25_spill]] %s4462_s9 }
   0xb   :  { %4515 = sst [smem:[#allocation26_spill]] %s4463_s10 }
   0xc   :  { %4516 = sst [smem:[#allocation27_spill]] %s4464_s11 }
   0xd   :  { %4517 = sst [smem:[#allocation28_spill]] %s4465_s12 }
   0xe   :  { %4518 = sst [smem:[#allocation29_spill]] %s4466_s13 }
   0xf   :  { %4519 = sst [smem:[#allocation30_spill]] %s4467_s14 }
  0x10   :  { %4520 = sst [smem:[#allocation31_spill]] %s4468_s15 }
  0x11   :  { %4521 = sst [smem:[#allocation32_spill]] %s4469_s16 }
  0x12   :  { %s4522_s8 = sld [smem:[#allocation16_spill]] }
  0x18   :  { %s34_s13 = sshll.u32 %s4522_s8, 4  ;;  %s35_s13 = int_to_ptr.vmem [resolvable:$true] %s34_s13 }
  0x19   :  { %37 = dma.vmem_to_smem %s35_s13, 16, %s3402_s30, [#allocation2] }
  0x1a   :  { %3376 = dma.done.wait [#allocation2], 16 }
  0x1b   :  { %3377 = vsyncadd [#allocation2], 4294967280 }
  0x1c   :  { %40 = sfence }
  0x1d   :  { %41 = vsyncpa [#allocation5], 0 }
  0x1e   :  { %43 = vsyncpa [#allocation5 + $0x1], 0 }
  0x1f   :  { %44 = vsyncpa [#allocation7], 0 }
  0x20   :  { %46 = vsyncpa [#allocation7 + $0x1], 0  ;;  %s3557_s9 = smov 0   ;;  %s3559_s5 = smov 0  }
  0x21   :  { %s3561_s28 = smov 0   ;;  %s3563_s0 = smov 0  }
  0x22 LB: > { %4523 = sst [smem:[#allocation11_spill]] %s3388_s9  ;;  %s3578_s13 = sadd.s32 4294967295, %s3400_s0   ;;  %s3400_s0 = sphi %s3563_s0, %s4557_s0   ;;  %s3396_s28 = sphi %s3561_s28, %s4559_s28   ;;  %s3392_s5 = sphi %s3559_s5, %s4561_s5   ;;  %s3388_s9 = sphi %s3557_s9, %s4560_s9  }
  0x23   : > { %4524 = sst [smem:[#allocation12_spill]] %s3396_s28  ;;  %s2960_s10 = sadd.s32 4294967294, %s3400_s0  }
  0x24   : > { %s3582_s29 = sadd.s32 1, %s3400_s0   ;;  %s594_s1 = sadd.s32 1, %s3396_s28 }
  0x25   : > { %4525 = sst [smem:[#allocation13_spill]] %s3582_s29  ;;  %s591_s6 = ssub.s32 %s3400_s0, %s3582_s29 }
  0x26   : > { %p604_p0 = scmp.ne.s32.totalorder %s3396_s28, %s3392_s5  ;;  %p592_p1 = scmp.eq.s32.totalorder %s591_s6, 0 }
  0x27   : > { %p605_p2 = scmp.eq.s32.totalorder %s3578_s13, 1  ;;  %p610_p3 = scmp.ne.s32.totalorder %s3392_s5, %s3388_s9 }
  0x28   : > { %p611_p4 = scmp.eq.s32.totalorder %s2960_s10, 1  ;;  %p2963_p7 = scmp.ge.s32.totalorder %s3400_s0, 1 }
  0x29   : > { %s3593_s11 = scalar_select %p592_p1, %s3396_s28, %s594_s1  }
  0x2a   : > { %p3595_p5 = por %p605_p2, %p604_p0  ;;  %p3599_p6 = por %p611_p4, %p610_p3 }
  0x2b   : > { %4526 = sst [smem:[#allocation14_spill]] %s3593_s11  ;;  %p740_p8 = scmp.lt.s32.totalorder %s3400_s0, 3 }
  0x2c   : > { %s4528_s3 = scalar_select %p3599_p6, 1, 0 }
  0x2d   : > { %p741_p9 = pnand %p2963_p7, %p740_p8 }
  0x2e   : > { %4529 = sst [smem:[#allocation15_spill]] %s4528_s3  ;;  %p820_p10 = scmp.lt.s32.totalorder (!%p741_p9), %s3578_s13, 1 }
  0x2f   : > { %744 = sbr.rel (%p741_p9) target bundleno = 4164 (0x1044), region = 120  ;;  %s4530_s8 = sld [smem:[#allocation20_spill]] (!%p741_p9) }
  0x30   : > { %s4531_s14 = sld [smem:[#allocation30_spill]] (!%p741_p9)  ;;  %s4497_s4 = smov (!%p741_p9), 112  }
  0x31   : > { %s4532_s11 = sld [smem:[#allocation17_spill]] (!%p741_p9)  ;;  %s4491_s30 = smov (!%p741_p9), 64  }
  0x32   : > { %s4533_s28 = sld [smem:[#allocation19_spill]] (!%p741_p9) }
  0x33   : > { %s4535_s10 = sld [smem:[#allocation21_spill]] (!%p741_p9) }
  0x34   : > { %s3613_s1 = scalar_select %p820_p10, %s3578_s13, 1  ;;  %vm852_vm0 = vcmask 64512   ;;  %v833_v7 = vlaneseq  ;;  %v3403_v10 = vmov 0.0   ;;  %vm896_vm3 = vcmask 261120  }
  0x35   : > { %v847_v0 = vld [vmem:[%s4530_s8] sm:$0xff]  ;;  %s4536_s15 = sld [smem:[#allocation31_spill]]  ;;  %vm932_vm4 = vcmask 130048   ;;  %v3407_v37 = vmov -1e+09   ;;  %vm1246_vm13 = vcmask 1040384  }
  0x36   : > { %v891_v1 = vld [vmem:[%s4531_s14 + $0x18] sm:$0xff]  ;;  %874 = vmatpush.msra.mxu0 %v847_v0  ;;  %s4490_s6 = sshll.u32 %s3613_s1, 4  ;;  %v890_v4 = vld [vmem:[%s4531_s14 + $0x10] sm:$0xff]  ;;  %v889_v5 = vld [vmem:[%s4531_s14 + $0x8] sm:$0xff]  ;;  %v834_v8 = vshrl.u32 %v833_v7, 7  ;;  %v844_v36 = vand.u32 127, %v833_v7 }
  0x37   : > { %915 = vmatpush.msra.mxu1 %v891_v1  ;;  %3129 = vmatpush.msra.mxu2 %v891_v1  ;;  %s824_s8 = scalar_lea.vmem %s4532_s11, %s4490_s6  ;;  %v888_v6 = vld [vmem:[%s4531_s14] sm:$0xff]  ;;  %s830_s11 = sld [smem:[#allocation3 + %s3578_s13]]  ;;  %vm1289_vm14 = vcmask 1046528   ;;  %vm1324_vm15 = vcmask 1045504  }
  0x38   : > { %v831_v2 = vld [vmem:[%s824_s8] sm:$0xff]  ;;  %v832_v3 = vld [vmem:[%s824_s8 + $0x8] sm:$0xff]  ;;  %s4534_s29 = smov %s4533_s28  ;;  %v835_v14 = vadd.s32 8, %v834_v8  ;;  %s4495_s8 = smov 96  }
  0x39   : > { %2972 = vmatmul.msk.f32.vlgmr.msra.gmra.mxu0 %vm852_vm0, %v831_v2  ;;  %916 = vmatpush.msra.mxu1 %v890_v4  ;;  %v882_v12 = vld [vmem:[%s4533_s28] sm:$0xff]  ;;  %v883_v20 = vld [vmem:[%s4534_s29 + $0x8] sm:$0xff]  ;;  %s4499_s28 = smov 80   ;;  %s4537_s16 = sld [smem:[#allocation32_spill]] }
  0x3a   : > { %3130 = vmatpush.msra.mxu2 %v890_v4  ;;  %v3209_v13 = vld [vmem:[%s4535_s10] ss:$0 sm:$0xff]  ;;  %s4492_s10 = smov 48   ;;  %s4538_s6 = smov 80  }
  0x3b   : > { %917 = vmatpush.msra.mxu1 %v889_v5  ;;  %v3210_v25 = vld [vmem:[%s4536_s15] ss:$0 sm:$0xff]  ;;  %s4544_s7 = sshll.u32 %s3613_s1, 4  ;;  %s4548_s9 = sld [smem:[#allocation23_spill]] }
  0x3c   : > { %3131 = vmatpush.msra.mxu2 %v889_v5  ;;  %s4549_s3 = sld [smem:[#allocation26_spill]] }
  0x3d   : > { %918 = vmatpush.msra.mxu1 %v888_v6  ;;  %v836_v9 = vstv %s830_s11  ;;  %s4542_s11 = smov 64   ;;  %s4551_s12 = sld [smem:[#allocation28_spill]] }
  0x3e   : > { %3132 = vmatpush.msra.mxu2 %v888_v6  ;;  %vm837_vm1 = vcmp.lt.s32.totalorder %v834_v8, %v836_v9  ;;  %vm838_vm2 = vcmp.lt.s32.totalorder %v835_v14, %v836_v9  ;;  %vm845_vm5 = vcmp.lt.s32.totalorder %v844_v36, %v836_v9 }
  0x3f   : > { %v3631_v11 = vsel %vm837_vm1, 1.0, %v3403_v10  ;;  %v3642_v19 = vsel %vm838_vm2, 1.0, %v3403_v10  ;;  %v3671_v38 = vsel %vm845_vm5, 0.0, %v3407_v37  ;;  %v1127_v37 = vld [vmem:[%s4537_s16] sm:$0xff] }
  0x40   : > { %v884_v15 = vmul.f32 %v3631_v11, %v882_v12  ;;  %v885_v21 = vmul.f32 %v3642_v19, %v883_v20 }
  0x41   : > { %2973 = vmatmul.msk.f32.gmra.mxu0 %vm852_vm0, %v832_v3  ;;  %vm1399_vm0 = vcmask 523264  }
  0xb6   : > { %v876_v16 = vpop.f32.mrf.mxu0 }
  0xb7   : > { %v877_v17 = vadd.f32 %v3209_v13, %v876_v16 }
  0xb9   : > { %v3640_v18 = vadd.f32 %v884_v15, %v877_v17 }
  0xbb   : > { %2974 = vmatmul.msk.f32.vlgmr.msra.gmra.mxu1 %vm896_vm3, %v3640_v18 }
  0xbe   : > { %v879_v22 = vpop.f32.mrf.mxu0 }
  0xbf   : > { %v880_v23 = vadd.f32 %v3209_v13, %v879_v22 }
  0xc1   : > { %v3650_v24 = vadd.f32 %v885_v21, %v880_v23 }
  0xc3   : > { %2975 = vmatmul.msk.f32.vlgmr.msra.gmra.mxu2 %vm896_vm3, %v3650_v24 }
 0x138   : > { %v920_v26 = vpop.f32.mrf.mxu1 }
 0x139   : > { %v921_v27 = vadd.f32 %v3210_v25, %v920_v26 }
 0x13b   : > { %1021 = vrot.lane.b32.xlu2 %v921_v27, %s4497_s4 }
 0x146   : > { %v923_v28 = vpop.f32.mrf.mxu2 }
 0x147   : > { %v924_v29 = vadd.f32 %v3210_v25, %v923_v28 }
 0x149   : > { %1027 = vrot.lane.b32.xlu1 %v924_v29, %s4499_s28  ;;  %930 = vrot.lane.b32.xlu0 %v924_v29, %s4495_s8  ;;  %v3189_v51 = vpack.i.bf16 %v921_v27, %v924_v29 }
 0x14a   : > { %1023 = vrot.lane.b32.xlu2 %v924_v29, %s4497_s4  ;;  %s4543_s4 = smov 16  }
 0x151   : > { %1025 = vrot.lane.b32.xlu1 %v921_v27, %s4499_s28  ;;  %928 = vrot.lane.b32.xlu0 %v921_v27, %s4495_s8  ;;  %s4540_s8 = smov 96  }
 0x195   : > { %v1022_v34 = vpop.permute.xlu2 %1021 }
 0x1a4   : > { %v1024_v35 = vpop.permute.xlu2 %1023 }
 0x1bb   : > { %v1028_v30 = vpop.permute.xlu1 %1027  ;;  %v931_v31 = vpop.permute.xlu0 %930 }
 0x1bc   : > { %2976 = vmatpush.xpose.msk.msrb.mxu2 %vm932_vm4, %v931_v31  ;;  %2982 = vmatpush.xpose.msk.msrb.mxu0 %vm932_vm4, %v1028_v30  ;;  %v1130_v30 = vld [vmem:[%s4537_s16 + $0x18] sm:$0xff]  ;;  %v1129_v31 = vld [vmem:[%s4537_s16 + $0x10] sm:$0xff] }
 0x1bd   : > { %1153 = vmatpush.msrb.mxu1 %v1130_v30 }
 0x1bf   : > { %1154 = vmatpush.msrb.mxu1 %v1129_v31 }
 0x1c3   : > { %v1026_v32 = vpop.permute.xlu1 %1025  ;;  %v929_v33 = vpop.permute.xlu0 %928 }
 0x1c4   : > { %2977 = vmatpush.xpose.msk.msrb.mxu2 %vm932_vm4, %v929_v33  ;;  %2983 = vmatpush.xpose.msk.msrb.mxu0 %vm932_vm4, %v1026_v32  ;;  %v1128_v32 = vld [vmem:[%s4537_s16 + $0x8] sm:$0xff] }
 0x1c5   : > { %1155 = vmatpush.msrb.mxu1 %v1128_v32 }
 0x1c7   : > { %2978 = vmatmul.msk.f32.vlgmr.msrb.gmra.mxu2 %vm932_vm4, %v921_v27  ;;  %2984 = vmatmul.msk.f32.vlgmr.msrb.gmra.mxu0 %vm932_vm4, %v1022_v34 }
 0x1c8   : > { %1156 = vmatpush.msrb.mxu1 %v1127_v37  ;;  %v3213_v37 = vld [vmem:[%s4472_s19] ss:$0 sm:$0xff] }
 0x1cf   : > { %2979 = vmatmul.msk.f32.gmra.mxu2 %vm932_vm4, %v924_v29  ;;  %2985 = vmatmul.msk.f32.gmra.mxu0 %vm932_vm4, %v1024_v35 }
 0x244   : > { %v1054_v39 = vpop.f32.mrf.mxu0 }
 0x245   : > { %v1055_v40 = vadd.f32 %v1054_v39, %v3671_v38 }
 0x247   : > { %v1060_v41 = vsel %vm932_vm4, %v1055_v40, -inf }
 0x248   : > { %1061 = vmax.xlane.f32.xlu2 %v1060_v41 }
 0x24a   : > { %v958_v42 = vpop.f32.mrf.mxu2 }
 0x24b   : > { %v959_v43 = vadd.f32 %v958_v42, %v3671_v38 }
 0x24c   : > { %v1057_v44 = vpop.f32.mrf.mxu0 }
 0x24d   : > { %v1058_v45 = vadd.f32 %v1057_v44, %v3671_v38  ;;  %v964_v46 = vsel %vm932_vm4, %v959_v43, -inf }
 0x24e   : > { %965 = vmax.xlane.f32.xlu0 %v964_v46 }
 0x24f   : > { %v1063_v47 = vsel %vm932_vm4, %v1058_v45, -inf }
 0x250   : > { %1064 = vmax.xlane.f32.xlu2 %v1063_v47 }
 0x252   : > { %v961_v48 = vpop.f32.mrf.mxu2 }
 0x253   : > { %v962_v49 = vadd.f32 %v961_v48, %v3671_v38 }
 0x255   : > { %v967_v50 = vsel %vm932_vm4, %v962_v49, -inf }
 0x256   : > { %968 = vmax.xlane.f32.xlu1 %v967_v50 }
 0x26f   : > { %3190 = vrot.lane.b32.xlu1 %v3189_v51, %s4491_s30  ;;  %s4539_s30 = smov 112  }
 0x2bb   : > { %v1062_v52 = vpop.xlane.xlu2 %1061 }
 0x2bc   : > { %v1066_v55 = vsub.f32 %v1055_v40, %v1062_v52  ;;  %v3411_v52 = vmov 32.0  }
 0x2be   : > { %v1068_v57 = vmul.f32 1.442695, %v1066_v55 }
 0x2c1   : > { %v966_v53 = vpop.xlane.xlu0 %965 }
 0x2c2   : > { %v970_v54 = vsub.f32 %v959_v43, %v966_v53  ;;  %v3211_v43 = vld [vmem:[%s4470_s17] ss:$0 sm:$0xff] }
 0x2c3   : > { %v1065_v58 = vpop.xlane.xlu2 %1064 }
 0x2c4   : > { %v972_v56 = vmul.f32 1.442695, %v970_v54  ;;  %v1067_v62 = vsub.f32 %v1058_v45, %v1065_v58 }
 0x2c6   : > { %3230 = vpow2.f32 %v972_v56  ;;  %v1070_v1 = vmul.f32 1.442695, %v1067_v62 }
 0x2c7   : > { %3232 = vpow2.f32 %v1068_v57 }
 0x2c9   : > { %v969_v59 = vpop.xlane.xlu1 %968 }
 0x2ca   : > { %v971_v60 = vsub.f32 %v962_v49, %v969_v59 }
 0x2cc   : > { %v3231_v61 = vpop.eup %3230  ;;  %v974_v63 = vmul.f32 1.442695, %v971_v60 }
 0x2cd   : > { %v976_v0 = vsel %vm932_vm4, %v3231_v61, 0.0  ;;  %v3233_v2 = vpop.eup %3232 }
 0x2ce   : > { %3234 = vpow2.f32 %v974_v63  ;;  %977 = vadd.xlane.f32.xlu0 %v976_v0  ;;  %v1072_v5 = vsel %vm932_vm4, %v3233_v2, 0.0 }
 0x2cf   : > { %3236 = vpow2.f32 %v1070_v1 }
 0x2d4   : > { %v3235_v3 = vpop.eup %3234 }
 0x2d5   : > { %v979_v4 = vsel %vm932_vm4, %v3235_v3, 0.0  ;;  %v3237_v6 = vpop.eup %3236 }
 0x2d6   : > { %980 = vadd.xlane.f32.xlu2 %v979_v4  ;;  %1073 = vadd.xlane.f32.xlu0 %v1072_v5  ;;  %v1075_v7 = vsel %vm932_vm4, %v3237_v6, 0.0  ;;  %v1233_v4 = vld [vmem:[%s4473_s20 + $0x10] sm:$0xff]  ;;  %v1232_v5 = vld [vmem:[%s4473_s20 + $0x8] sm:$0xff] }
 0x2de   : > { %1076 = vadd.xlane.f32.xlu0 %v1075_v7 }
 0x2e1   : > { %v3191_v8 = vpop.permute.xlu1 %3190 }
 0x2e2   : > { %v3192_v9 = vunpack.i.l.bf16 %v3191_v8  ;;  %v3193_v10 = vunpack.i.h.bf16 %v3191_v8  ;;  %v1231_v8 = vld [vmem:[%s4473_s20] sm:$0xff] }
 0x2e4   : > { %1012 = vmatpush.msra.mxu3 %v3192_v9  ;;  %v1238_v9 = vld [vmem:[%s4473_s20 + $0x38] sm:$0xff] }
 0x2e5   : > { %1311 = vmatpush.msra.mxu0 %v1238_v9  ;;  %v1375_v9 = vld [vmem:[%s4475_s22 + $0x70] sm:$0xff] }
 0x2e6   : > { %1013 = vmatpush.msra.mxu3 %v3193_v10  ;;  %v1242_v10 = vld [vmem:[%s4473_s20 + $0x58] sm:$0xff] }
 0x2ee   : > { %3195 = vrot.lane.b32.xlu2 %v3189_v51, %s4492_s10  ;;  %s4493_s10 = smov 16  }
 0x341   : > { %v978_v12 = vpop.xlane.xlu0 %977 }
 0x342   : > { %3238 = vrcp.f32 %v978_v12  ;;  %v1237_v12 = vld [vmem:[%s4473_s20 + $0x30] sm:$0xff] }
 0x343   : > { %1312 = vmatpush.msra.mxu0 %v1237_v12  ;;  %v1361_v12 = vld [vmem:[%s4475_s22] sm:$0xff] }
 0x348   : > { %v3239_v13 = vpop.eup %3238 }
 0x349   : > { %v981_v14 = vpop.xlane.xlu2 %980  ;;  %v984_v15 = vmul.f32 %v3239_v13, %v3231_v61  ;;  %v1074_v16 = vpop.xlane.xlu0 %1073 }
 0x34a   : > { %3240 = vrcp.f32 %v981_v14  ;;  %v1241_v14 = vld [vmem:[%s4473_s20 + $0x50] sm:$0xff] }
 0x34b   : > { %2980 = vmatmul.msk.f32.vlgmr.msra.gmra.mxu3 %vm932_vm4, %v984_v15  ;;  %3242 = vrcp.f32 %v1074_v16 }
 0x350   : > { %v3241_v17 = vpop.eup %3240 }
 0x351   : > { %v3196_v20 = vpop.permute.xlu2 %3195  ;;  %v985_v21 = vmul.f32 %v3241_v17, %v3235_v3  ;;  %v1077_v25 = vpop.xlane.xlu0 %1076  ;;  %v1234_v3 = vld [vmem:[%s4473_s20 + $0x18] sm:$0xff]  ;;  %v1236_v17 = vld [vmem:[%s4473_s20 + $0x28] sm:$0xff] }
 0x352   : > { %v3197_v22 = vunpack.i.l.bf16 %v3196_v20  ;;  %v3198_v23 = vunpack.i.h.bf16 %v3196_v20  ;;  %v3243_v26 = vpop.eup %3242  ;;  %3244 = vrcp.f32 %v1077_v25  ;;  %1275 = vmatpush.msra.mxu2 %v1234_v3  ;;  %v1240_v20 = vld [vmem:[%s4473_s20 + $0x48] sm:$0xff]  ;;  %1313 = vmatpush.msra.mxu0 %v1236_v17  ;;  %v1239_v25 = vld [vmem:[%s4473_s20 + $0x40] sm:$0xff]  ;;  %v1372_v17 = vld [vmem:[%s4475_s22 + $0x58] sm:$0xff] }
 0x353   : > { %2981 = vmatmul.msk.f32.gmra.mxu3 %vm932_vm4, %v985_v21  ;;  %v1080_v27 = vmul.f32 %v3243_v26, %v3233_v2  ;;  %3246 = vrcp.f32 %v3411_v52  ;;  %v1235_v21 = vld [vmem:[%s4473_s20 + $0x20] sm:$0xff] }
 0x354   : > { %1108 = vmatpush.msrb.mxu3 %v3197_v22  ;;  %1276 = vmatpush.msra.mxu2 %v1233_v4  ;;  %v1365_v3 = vld [vmem:[%s4475_s22 + $0x20] sm:$0xff]  ;;  %v1364_v4 = vld [vmem:[%s4475_s22 + $0x18] sm:$0xff] }
 0x355   : > { %1314 = vmatpush.msra.mxu0 %v1235_v21  ;;  %v1371_v21 = vld [vmem:[%s4475_s22 + $0x50] sm:$0xff] }
 0x356   : > { %1109 = vmatpush.msrb.mxu3 %v3198_v23  ;;  %1277 = vmatpush.msra.mxu2 %v1232_v5  ;;  %v1363_v5 = vld [vmem:[%s4475_s22 + $0x10] sm:$0xff] }
 0x358   : > { %v3245_v28 = vpop.eup %3244  ;;  %1278 = vmatpush.msra.mxu2 %v1231_v8  ;;  %1346 = vmatpush.msra.mxu3 %v1242_v10  ;;  %v1362_v8 = vld [vmem:[%s4475_s22 + $0x8] sm:$0xff]  ;;  %v1383_v10 = vld [vmem:[%s4475_s22 + $0xb0] sm:$0xff] }
 0x359   : > { %v1081_v29 = vmul.f32 %v3245_v28, %v3237_v6  ;;  %v3247_v53 = vpop.eup %3246 }
 0x35a   : > { %v1175_v54 = vmul.f32 32.0, %v3247_v53  ;;  %vm1179_vm6 = vweird.f32 %v3247_v53  ;;  %1347 = vmatpush.msra.mxu3 %v1241_v14  ;;  %v1382_v14 = vld [vmem:[%s4475_s22 + $0xa8] sm:$0xff] }
 0x35b   : > { %2986 = vmatmul.msk.f32.vlgmr.msrb.gmra.mxu3 %vm932_vm4, %v1080_v27 }
 0x35c   : > { %v1176_v55 = vsub.f32 1.0, %v1175_v54  ;;  %1348 = vmatpush.msra.mxu3 %v1240_v20  ;;  %v1380_v20 = vld [vmem:[%s4475_s22 + $0x98] sm:$0xff] }
 0x35e   : > { %v1177_v56 = vmul.f32 %v3247_v53, %v1176_v55  ;;  %1349 = vmatpush.msra.mxu3 %v1239_v25  ;;  %v1378_v25 = vld [vmem:[%s4475_s22 + $0x88] sm:$0xff] }
 0x360   : > { %v1178_v57 = vadd.f32 %v3247_v53, %v1177_v56 }
 0x362   : > { %v3716_v58 = vsel %vm1179_vm6, %v3247_v53, %v1178_v57 }
 0x363   : > { %2987 = vmatmul.msk.f32.gmra.mxu3 %vm932_vm4, %v1081_v29 }
 0x3ce   : > { %v1015_v33 = vpop.f32.mrf.mxu3 }
 0x3d6   : > { %v1018_v34 = vpop.f32.mrf.mxu3 }
 0x3de   : > { %v1111_v35 = vpop.f32.mrf.mxu3 }
 0x3df   : > { %1119 = vrot.lane.b32.xlu0 %v1111_v35, %s4493_s10 }
 0x3e6   : > { %v1114_v36 = vpop.f32.mrf.mxu3 }
 0x3e7   : > { %1121 = vrot.lane.b32.xlu1 %v1114_v36, %s4493_s10  ;;  %s4541_s10 = smov 48  }
 0x451   : > { %v1120_v39 = vpop.permute.xlu0 %1119 }
 0x452   : > { %v1125_v40 = vsel %vm932_vm4, %v1015_v33, %v1120_v39  ;;  %v3212_v33 = vld [vmem:[%s4471_s18] ss:$0 sm:$0xff] }
 0x453   : > { %2988 = vmatmul.msk.f32.vlgmr.msrb.gmra.mxu1 %vm896_vm3, %v1125_v40 }
 0x459   : > { %v1122_v41 = vpop.permute.xlu1 %1121 }
 0x45a   : > { %v1126_v42 = vsel %vm932_vm4, %v1018_v34, %v1122_v41 }
 0x45b   : > { %2989 = vmatmul.msk.f32.gmra.mxu1 %vm896_vm3, %v1126_v42 }
 0x4d0   : > { %v1158_v44 = vpop.f32.mrf.mxu1 }
 0x4d1   : > { %v1159_v45 = vadd.f32 %v3211_v43, %v1158_v44 }
 0x4d3   : > { %v1164_v46 = vadd.f32 %v1159_v45, %v3640_v18 }
 0x4d5   : > { %v1168_v47 = vsel %vm896_vm3, %v1164_v46, 0.0 }
 0x4d6   : > { %1169 = vadd.xlane.f32.xlu1 %v1168_v47 }
 0x4d8   : > { %v1161_v48 = vpop.f32.mrf.mxu1 }
 0x4d9   : > { %v1162_v49 = vadd.f32 %v3211_v43, %v1161_v48 }
 0x4db   : > { %v1165_v50 = vadd.f32 %v1162_v49, %v3650_v24 }
 0x4dd   : > { %v1171_v51 = vsel %vm896_vm3, %v1165_v50, 0.0 }
 0x4de   : > { %1172 = vadd.xlane.f32.xlu2 %v1171_v51 }
 0x549   : > { %v1170_v18 = vpop.xlane.xlu1 %1169 }
 0x54a   : > { %v1181_v59 = vmul.f32 %v3716_v58, %v1170_v18 }
 0x54c   : > { %v1183_v60 = vsub.f32 %v1164_v46, %v1181_v59 }
 0x54e   : > { %v1185_v61 = vmul.f32 %v1183_v60, %v1183_v60 }
 0x550   : > { %v1187_v24 = vsel %vm896_vm3, %v1185_v61, 0.0 }
 0x551   : > { %v1173_v62 = vpop.xlane.xlu2 %1172  ;;  %1188 = vadd.xlane.f32.xlu0 %v1187_v24 }
 0x552   : > { %v1182_v63 = vmul.f32 %v3716_v58, %v1173_v62 }
 0x554   : > { %v3721_v0 = vsub.f32 %v1165_v50, %v1182_v63 }
 0x556   : > { %v1186_v1 = vmul.f32 %v3721_v0, %v3721_v0 }
 0x558   : > { %v1190_v2 = vsel %vm896_vm3, %v1186_v1, 0.0  ;;  %v1367_v1 = vld [vmem:[%s4475_s22 + $0x30] sm:$0xff] }
 0x559   : > { %1191 = vadd.xlane.f32.xlu1 %v1190_v2  ;;  %v1366_v2 = vld [vmem:[%s4475_s22 + $0x28] sm:$0xff] }
 0x5c4   : > { %v1189_v6 = vpop.xlane.xlu0 %1188 }
 0x5c5   : > { %v1193_v7 = vmul.f32 %v1189_v6, %v3716_v58  ;;  %v1376_v6 = vld [vmem:[%s4475_s22 + $0x78] sm:$0xff] }
 0x5c6   : > { %1448 = vmatpush.msrb.mxu2 %v1376_v6 }
 0x5c7   : > { %v1195_v13 = vadd.f32 1e-05, %v1193_v7  ;;  %v1384_v7 = vld [vmem:[%s4475_s22 + $0xb8] sm:$0xff] }
 0x5c8   : > { %1482 = vmatpush.msrb.mxu0 %v1384_v7  ;;  %1449 = vmatpush.msrb.mxu2 %v1375_v9 }
 0x5c9   : > { %3248 = vrsqrt.f32 %v1195_v13  ;;  %vm1203_vm8 = vweird.f32 %v1195_v13 }
 0x5ca   : > { %1483 = vmatpush.msrb.mxu0 %v1383_v10 }
 0x5cc   : > { %v1192_v15 = vpop.xlane.xlu1 %1191  ;;  %1484 = vmatpush.msrb.mxu0 %v1382_v14 }
 0x5cd   : > { %v1194_v16 = vmul.f32 %v1192_v15, %v3716_v58  ;;  %v1373_v15 = vld [vmem:[%s4475_s22 + $0x60] sm:$0xff] }
 0x5cf   : > { %v3249_v22 = vpop.eup %3248  ;;  %v1196_v23 = vadd.f32 1e-05, %v1194_v16  ;;  %v1381_v16 = vld [vmem:[%s4475_s22 + $0xa0] sm:$0xff] }
 0x5d0   : > { %v1198_v26 = vmul.f32 %v3249_v22, %v1195_v13  ;;  %vm1204_vm7 = vweird.f32 %v3249_v22  ;;  %v1374_v13 = vld [vmem:[%s4475_s22 + $0x68] sm:$0xff]  ;;  %1485 = vmatpush.msrb.mxu0 %v1381_v16 }
 0x5d1   : > { %3250 = vrsqrt.f32 %v1196_v23  ;;  %vm1205_vm9 = vmor %vm1203_vm8, %vm1204_vm7  ;;  %vm1213_vm11 = vweird.f32 %v1196_v23  ;;  %1450 = vmatpush.msrb.mxu2 %v1374_v13 }
 0x5d2   : > { %v1199_v27 = vmul.f32 %v3249_v22, %v1198_v26  ;;  %1486 = vmatpush.msrb.mxu0 %v1380_v20  ;;  %v1369_v26 = vld [vmem:[%s4475_s22 + $0x40] sm:$0xff] }
 0x5d3   : > { %1451 = vmatpush.msrb.mxu2 %v1373_v15 }
 0x5d4   : > { %v1200_v28 = vmul.f32 0.5, %v1199_v27  ;;  %v1377_v27 = vld [vmem:[%s4475_s22 + $0x80] sm:$0xff] }
 0x5d5   : > { %1452 = vmatpush.msrb.mxu2 %v1372_v17 }
 0x5d6   : > { %v1201_v29 = vsub.f32 1.5, %v1200_v28 }
 0x5d7   : > { %v3251_v30 = vpop.eup %3250  ;;  %1453 = vmatpush.msrb.mxu2 %v1371_v21 }
 0x5d8   : > { %v1202_v31 = vmul.f32 %v3249_v22, %v1201_v29  ;;  %v1208_v32 = vmul.f32 %v3251_v30, %v1196_v23  ;;  %vm1214_vm10 = vweird.f32 %v3251_v30  ;;  %v1370_v23 = vld [vmem:[%s4475_s22 + $0x48] sm:$0xff]  ;;  %v3214_v29 = vld [vmem:[%s4474_s21] ss:$0 sm:$0xff] }
 0x5d9   : > { %vm1215_vm12 = vmor %vm1213_vm11, %vm1214_vm10  ;;  %1454 = vmatpush.msrb.mxu2 %v1370_v23 }
 0x5da   : > { %v1206_v34 = vsel %vm1205_vm9, %v3249_v22, %v1202_v31  ;;  %v1209_v35 = vmul.f32 %v3251_v30, %v1208_v32  ;;  %v1379_v22 = vld [vmem:[%s4475_s22 + $0x90] sm:$0xff] }
 0x5db   : > { %v1217_v36 = vmul.f32 %v1206_v34, %v1183_v60  ;;  %1487 = vmatpush.msrb.mxu0 %v1379_v22  ;;  %1455 = vmatpush.msrb.mxu2 %v1369_v26  ;;  %v3004_v26 = vld [vmem:[%s4531_s14 + $0x30] sm:$0xff] }
 0x5dc   : > { %v1210_v39 = vmul.f32 0.5, %v1209_v35 }
 0x5dd   : > { %v1222_v40 = vmul.f32 %v3212_v33, %v1217_v36  ;;  %1488 = vmatpush.msrb.mxu0 %v1378_v25 }
 0x5de   : > { %v1211_v41 = vsub.f32 1.5, %v1210_v39 }
 0x5df   : > { %v1227_v42 = vadd.f32 %v3213_v37, %v1222_v40  ;;  %1489 = vmatpush.msrb.mxu0 %v1377_v27  ;;  %v3003_v27 = vld [vmem:[%s4531_s14 + $0x28] sm:$0xff] }
 0x5e0   : > { %v1212_v43 = vmul.f32 %v3251_v30, %v1211_v41 }
 0x5e1   : > { %v3771_v44 = vmul.f32 %v3631_v11, %v1227_v42 }
 0x5e2   : > { %v1216_v45 = vsel %vm1215_vm12, %v3251_v30, %v1212_v43 }
 0x5e3   : > { %v1218_v46 = vmul.f32 %v1216_v45, %v3721_v0  ;;  %v1247_v47 = vrot.slane %v3771_v44, 7  ;;  %v1368_v0 = vld [vmem:[%s4475_s22 + $0x38] sm:$0xff] }
 0x5e4   : > { %1413 = vmatpush.msra.mxu1 %v1368_v0 }
 0x5e5   : > { %v1223_v48 = vmul.f32 %v3212_v33, %v1218_v46  ;;  %v1252_v49 = vsel %vm1246_vm13, 0.0, %v1247_v47 }
 0x5e6   : > { %2990 = vmatmul.msk.f32.vlgmr.msra.gmra.mxu2 %vm896_vm3, %v1252_v49  ;;  %v1290_v54 = vrot.slane %v1252_v49, 1  ;;  %v1325_v55 = vrot.slane %v1252_v49, 2  ;;  %1414 = vmatpush.msra.mxu1 %v1367_v1 }
 0x5e7   : > { %v1228_v50 = vadd.f32 %v3213_v37, %v1223_v48 }
 0x5e8   : > { %1415 = vmatpush.msra.mxu1 %v1366_v2 }
 0x5e9   : > { %v3778_v51 = vmul.f32 %v3642_v19, %v1228_v50 }
 0x5ea   : > { %1416 = vmatpush.msra.mxu1 %v1365_v3 }
 0x5eb   : > { %v1248_v52 = vrot.slane %v3778_v51, 7 }
 0x5ec   : > { %1417 = vmatpush.msra.mxu1 %v1364_v4 }
 0x5ed   : > { %v1249_v53 = vsel %vm1246_vm13, %v1247_v47, %v1248_v52  ;;  %v1253_v60 = vsel %vm1246_vm13, %v1248_v52, 0.0 }
 0x5ee   : > { %2991 = vmatmul.msk.f32.gmra.mxu2 %vm896_vm3, %v1249_v53  ;;  %v1291_v56 = vrot.slane %v1249_v53, 1  ;;  %v1326_v57 = vrot.slane %v1249_v53, 2  ;;  %v1293_v61 = vrot.slane %v1253_v60, 1  ;;  %v1328_v24 = vrot.slane %v1253_v60, 2  ;;  %1418 = vmatpush.msra.mxu1 %v1363_v5 }
 0x5f0   : > { %v1292_v18 = vsel %vm1289_vm14, %v1290_v54, %v1291_v56  ;;  %v1327_v59 = vsel %vm1324_vm15, %v1325_v55, %v1326_v57  ;;  %v1294_v62 = vsel %vm1289_vm14, %v1291_v56, %v1293_v61  ;;  %v1329_v63 = vsel %vm1324_vm15, %v1326_v57, %v1328_v24  ;;  %1419 = vmatpush.msra.mxu1 %v1362_v8  ;;  %v3215_v24 = vld [vmem:[%s4476_s23] ss:$0 sm:$0xff] }
 0x5f1   : > { %2992 = vmatmul.msk.f32.vlgmr.msra.gmra.mxu0 %vm896_vm3, %v1292_v18  ;;  %2994 = vmatmul.msk.f32.vlgmr.msra.gmra.mxu3 %vm896_vm3, %v1327_v59 }
 0x5f2   : > { %1420 = vmatpush.msra.mxu1 %v1361_v12 }
 0x5f9   : > { %2993 = vmatmul.msk.f32.gmra.mxu0 %vm896_vm3, %v1294_v62  ;;  %2995 = vmatmul.msk.f32.gmra.mxu3 %vm896_vm3, %v1329_v63 }
 0x669   : > { %v1280_v28 = vpop.f32.mrf.mxu2 }
 0x66a   : > { %v1286_v31 = vadd.f32 %v3214_v29, %v1280_v28  ;;  %v3002_v28 = vld [vmem:[%s4531_s14 + $0x20] sm:$0xff] }
 0x66e   : > { %v1316_v30 = vpop.f32.mrf.mxu0 }
 0x66f   : > { %v1322_v32 = vadd.f32 %v1316_v30, %v1286_v31 }
 0x671   : > { %v1283_v35 = vpop.f32.mrf.mxu2 }
 0x672   : > { %v1287_v39 = vadd.f32 %v3214_v29, %v1283_v35 }
 0x674   : > { %v1351_v33 = vpop.f32.mrf.mxu3 }
 0x675   : > { %v1357_v34 = vadd.f32 %v1351_v33, %v1322_v32 }
 0x676   : > { %v1319_v37 = vpop.f32.mrf.mxu0 }
 0x677   : > { %v1359_v36 = vmax.f32 %v1357_v34, 0.0  ;;  %v1323_v42 = vadd.f32 %v1319_v37, %v1287_v39 }
 0x679   : > { %v1388_v40 = vrot.slane %v1359_v36, 7 }
 0x67b   : > { %v1393_v41 = vsel %vm1246_vm13, 0.0, %v1388_v40 }
 0x67c   : > { %v1354_v43 = vpop.f32.mrf.mxu3  ;;  %2996 = vmatmul.msk.f32.vlgmr.msra.gmra.mxu1 %vm1399_vm0, %v1393_v41  ;;  %v1431_v49 = vrot.slane %v1393_v41, 1  ;;  %v1465_v50 = vrot.slane %v1393_v41, 2 }
 0x67d   : > { %v1358_v45 = vadd.f32 %v1354_v43, %v1323_v42 }
 0x67f   : > { %v1360_v46 = vmax.f32 %v1358_v45, 0.0  ;;  %v3216_v45 = vld [vmem:[%s4477_s24] ss:$0 sm:$0xff] }
 0x681   : > { %v1389_v47 = vrot.slane %v1360_v46, 7 }
 0x683   : > { %v1390_v48 = vsel %vm1246_vm13, %v1388_v40, %v1389_v47  ;;  %v1394_v56 = vsel %vm1246_vm13, %v1389_v47, 0.0 }
 0x684   : > { %2997 = vmatmul.msk.f32.gmra.mxu1 %vm1399_vm0, %v1390_v48  ;;  %v1432_v52 = vrot.slane %v1390_v48, 1  ;;  %v1466_v53 = vrot.slane %v1390_v48, 2  ;;  %v1434_v57 = vrot.slane %v1394_v56, 1  ;;  %v1468_v18 = vrot.slane %v1394_v56, 2  ;;  %v3217_v48 = vld [vmem:[%s4478_s25] ss:$0 sm:$0xff] }
 0x686   : > { %v1433_v54 = vsel %vm1289_vm14, %v1431_v49, %v1432_v52  ;;  %v1467_v55 = vsel %vm1324_vm15, %v1465_v50, %v1466_v53  ;;  %v1435_v59 = vsel %vm1289_vm14, %v1432_v52, %v1434_v57  ;;  %v1469_v60 = vsel %vm1324_vm15, %v1466_v53, %v1468_v18 }
 0x687   : > { %2998 = vmatmul.msk.f32.vlgmr.msrb.gmra.mxu2 %vm1399_vm0, %v1433_v54  ;;  %3000 = vmatmul.msk.f32.vlgmr.msrb.gmra.mxu0 %vm1399_vm0, %v1467_v55 }
 0x68f   : > { %2999 = vmatmul.msk.f32.gmra.mxu2 %vm1399_vm0, %v1435_v59  ;;  %3001 = vmatmul.msk.f32.gmra.mxu0 %vm1399_vm0, %v1469_v60 }
 0x6f9   : > { %v1422_v61 = vpop.f32.mrf.mxu1 }
 0x6fa   : > { %v1428_v62 = vadd.f32 %v3215_v24, %v1422_v61 }
 0x701   : > { %v1425_v3 = vpop.f32.mrf.mxu1 }
 0x702   : > { %v1429_v5 = vadd.f32 %v3215_v24, %v1425_v3  ;;  %v3218_v24 = vld [vmem:[%s4536_s15 + $0x1] ss:$0 sm:$0xff]  ;;  %s4545_s15 = sld [smem:[#allocation18_spill]] }
 0x704   : > { %v1491_v63 = vpop.f32.mrf.mxu0 }
 0x708   : > { %s829_s28 = scalar_lea.vmem %s4545_s15, %s4544_s7  ;;  %s4358_s15 = sand.u32 1, %s3392_s5  }
 0x70a   : > { %v1457_v0 = vpop.f32.mrf.mxu2 }
 0x70b   : > { %v1463_v1 = vadd.f32 %v1457_v0, %v1428_v62 }
 0x70c   : > { %v1494_v9 = vpop.f32.mrf.mxu0 }
 0x70d   : > { %v1497_v2 = vadd.f32 %v1491_v63, %v1463_v1 }
 0x70f   : > { %v1499_v4 = vadd.f32 %v1497_v2, %v3771_v44 }
 0x711   : > { %v1503_v6 = vsel %vm896_vm3, %v1499_v4, 0.0 }
 0x712   : > { %1504 = vadd.xlane.f32.xlu2 %v1503_v6  ;;  %v1460_v7 = vpop.f32.mrf.mxu2 }
 0x713   : > { %v1464_v8 = vadd.f32 %v1460_v7, %v1429_v5 }
 0x715   : > { %v1498_v10 = vadd.f32 %v1494_v9, %v1464_v8 }
 0x717   : > { %v1500_v12 = vadd.f32 %v1498_v10, %v3778_v51  ;;  %v3005_v51 = vld [vmem:[%s4531_s14 + $0x38] sm:$0xff] }
 0x718   : > { %1587 = vmatpush.msrb.mxu3 %v3005_v51 }
 0x719   : > { %v1506_v13 = vsel %vm896_vm3, %v1500_v12, 0.0 }
 0x71a   : > { %1507 = vadd.xlane.f32.xlu1 %v1506_v13  ;;  %1588 = vmatpush.msrb.mxu3 %v3004_v26 }
 0x71c   : > { %1589 = vmatpush.msrb.mxu3 %v3003_v27 }
 0x71e   : > { %1590 = vmatpush.msrb.mxu3 %v3002_v28 }
 0x785   : > { %v1505_v14 = vpop.xlane.xlu2 %1504 }
 0x786   : > { %v1509_v15 = vmul.f32 %v1505_v14, %v3716_v58 }
 0x788   : > { %v1511_v16 = vsub.f32 %v1499_v4, %v1509_v15 }
 0x78a   : > { %v1513_v17 = vmul.f32 %v1511_v16, %v1511_v16 }
 0x78c   : > { %v1515_v44 = vsel %vm896_vm3, %v1513_v17, 0.0 }
 0x78d   : > { %1516 = vadd.xlane.f32.xlu0 %v1515_v44  ;;  %v1508_v20 = vpop.xlane.xlu1 %1507 }
 0x78e   : > { %v1510_v21 = vmul.f32 %v1508_v20, %v3716_v58 }
 0x790   : > { %v1512_v22 = vsub.f32 %v1500_v12, %v1510_v21 }
 0x792   : > { %v1514_v23 = vmul.f32 %v1512_v22, %v1512_v22 }
 0x794   : > { %v1518_v25 = vsel %vm896_vm3, %v1514_v23, 0.0 }
 0x795   : > { %1519 = vadd.xlane.f32.xlu2 %v1518_v25 }
 0x800   : > { %v1517_v29 = vpop.xlane.xlu0 %1516 }
 0x801   : > { %v1521_v30 = vmul.f32 %v1517_v29, %v3716_v58 }
 0x803   : > { %v1523_v31 = vadd.f32 1e-05, %v1521_v30 }
 0x805   : > { %3252 = vrsqrt.f32 %v1523_v31  ;;  %vm1531_vm2 = vweird.f32 %v1523_v31 }
 0x808   : > { %v1520_v32 = vpop.xlane.xlu2 %1519 }
 0x809   : > { %v1522_v33 = vmul.f32 %v1520_v32, %v3716_v58 }
 0x80b   : > { %v3253_v34 = vpop.eup %3252  ;;  %v1524_v35 = vadd.f32 1e-05, %v1522_v33 }
 0x80c   : > { %v1526_v36 = vmul.f32 %v3253_v34, %v1523_v31  ;;  %vm1532_vm1 = vweird.f32 %v3253_v34 }
 0x80d   : > { %3254 = vrsqrt.f32 %v1524_v35  ;;  %vm1533_vm5 = vmor %vm1531_vm2, %vm1532_vm1  ;;  %vm1541_vm7 = vweird.f32 %v1524_v35  ;;  %vm2243_vm2 = vcmask 1042432  }
 0x80e   : > { %v1527_v37 = vmul.f32 %v3253_v34, %v1526_v36 }
 0x810   : > { %v1528_v39 = vmul.f32 0.5, %v1527_v37 }
 0x812   : > { %v1529_v40 = vsub.f32 1.5, %v1528_v39 }
 0x813   : > { %v3255_v41 = vpop.eup %3254 }
 0x814   : > { %v1530_v42 = vmul.f32 %v3253_v34, %v1529_v40  ;;  %v1536_v43 = vmul.f32 %v3255_v41, %v1524_v35  ;;  %vm1542_vm6 = vweird.f32 %v3255_v41 }
 0x815   : > { %vm1543_vm8 = vmor %vm1541_vm7, %vm1542_vm6  ;;  %vm2255_vm6 = vcmask 15360   ;;  %vm2403_vm7 = vcmask 1043456  }
 0x816   : > { %v1534_v46 = vsel %vm1533_vm5, %v3253_v34, %v1530_v42  ;;  %v1537_v47 = vmul.f32 %v3255_v41, %v1536_v43  ;;  %vm2261_vm5 = vcmask 1041408  }
 0x817   : > { %v1545_v49 = vmul.f32 %v1534_v46, %v1511_v16 }
 0x818   : > { %v1538_v50 = vmul.f32 0.5, %v1537_v47 }
 0x819   : > { %v1550_v52 = vmul.f32 %v3216_v45, %v1545_v49 }
 0x81a   : > { %v1539_v53 = vsub.f32 1.5, %v1538_v50 }
 0x81b   : > { %v1555_v54 = vadd.f32 %v3217_v48, %v1550_v52 }
 0x81c   : > { %v1540_v55 = vmul.f32 %v3255_v41, %v1539_v53 }
 0x81d   : > { %v3912_v56 = vmul.f32 %v3631_v11, %v1555_v54 }
 0x81e   : > { %v1544_v57 = vsel %vm1543_vm8, %v3255_v41, %v1540_v55  ;;  %vm2365_vm8 = vcmask 1044480  }
 0x81f   : > { %v1546_v18 = vmul.f32 %v1544_v57, %v1512_v22  ;;  %3007 = vmatmul.msk.f32.vlgmr.msrb.gmra.mxu3 %vm896_vm3, %v3912_v56 }
 0x821   : > { %v1551_v59 = vmul.f32 %v3216_v45, %v1546_v18 }
 0x823   : > { %v1556_v60 = vadd.f32 %v3217_v48, %v1551_v59 }
 0x825   : > { %v3917_v61 = vmul.f32 %v3642_v19, %v1556_v60 }
 0x827   : > { %3008 = vmatmul.msk.f32.gmra.mxu3 %vm896_vm3, %v3917_v61 }
 0x8a2   : > { %v1592_v62 = vpop.f32.mrf.mxu3 }
 0x8a3   : > { %v1593_v63 = vadd.f32 %v3218_v24, %v1592_v62 }
 0x8a5   : > { %1696 = vrot.lane.b32.xlu0 %v1593_v63, %s4538_s6  ;;  %1692 = vrot.lane.b32.xlu2 %v1593_v63, %s4539_s30 }
 0x8aa   : > { %v1595_v0 = vpop.f32.mrf.mxu3 }
 0x8ab   : > { %v1596_v1 = vadd.f32 %v3218_v24, %v1595_v0 }
 0x8ad   : > { %1600 = vrot.lane.b32.xlu2 %v1593_v63, %s4540_s8  ;;  %1694 = vrot.lane.b32.xlu0 %v1596_v1, %s4539_s30  ;;  %v3199_v22 = vpack.i.bf16 %v1593_v63, %v1596_v1 }
 0x8ae   : > { %1698 = vrot.lane.b32.xlu1 %v1596_v1, %s4538_s6  ;;  %s4552_s6 = sld [smem:[#allocation27_spill]] }
 0x8b6   : > { %1602 = vrot.lane.b32.xlu1 %v1596_v1, %s4540_s8  ;;  %s4550_s8 = sld [smem:[#allocation25_spill]] }
 0x8ff   : > { %v1693_v3 = vpop.permute.xlu2 %1692 }
 0x907   : > { %v1601_v6 = vpop.permute.xlu2 %1600 }
 0x917   : > { %v1697_v4 = vpop.permute.xlu0 %1696 }
 0x91f   : > { %v1695_v7 = vpop.permute.xlu0 %1694 }
 0x920   : > { %v1699_v2 = vpop.permute.xlu1 %1698 }
 0x921   : > { %3015 = vmatpush.xpose.msk.msra.mxu0 %vm932_vm4, %v1699_v2  ;;  %v3024_v2 = vld [vmem:[%s4537_s16 + $0x38] sm:$0xff] }
 0x925   : > { %3016 = vmatpush.xpose.msk.msra.mxu0 %vm932_vm4, %v1697_v4  ;;  %v3022_v4 = vld [vmem:[%s4537_s16 + $0x28] sm:$0xff] }
 0x928   : > { %v1603_v5 = vpop.permute.xlu1 %1602  ;;  %3017 = vmatmul.msk.f32.vlgmr.msra.gmra.mxu0 %vm932_vm4, %v1693_v3  ;;  %v3023_v3 = vld [vmem:[%s4537_s16 + $0x30] sm:$0xff] }
 0x929   : > { %3009 = vmatpush.xpose.msk.msrb.mxu1 %vm932_vm4, %v1603_v5  ;;  %v3021_v5 = vld [vmem:[%s4537_s16 + $0x20] sm:$0xff]  ;;  %s4547_s16 = sld [smem:[#allocation24_spill]] }
 0x92d   : > { %3010 = vmatpush.xpose.msk.msrb.mxu1 %vm932_vm4, %v1601_v6 }
 0x930   : > { %3011 = vmatmul.msk.f32.vlgmr.msrb.gmra.mxu1 %vm932_vm4, %v1593_v63  ;;  %3018 = vmatmul.msk.f32.gmra.mxu0 %vm932_vm4, %v1695_v7 }
 0x931   : > { %1826 = vmatpush.msra.mxu1 %v3024_v2 }
 0x933   : > { %1827 = vmatpush.msra.mxu1 %v3023_v3 }
 0x935   : > { %1828 = vmatpush.msra.mxu1 %v3022_v4 }
 0x937   : > { %1829 = vmatpush.msra.mxu1 %v3021_v5 }
 0x938   : > { %3012 = vmatmul.msk.f32.gmra.mxu1 %vm932_vm4, %v1596_v1 }
 0x9a5   : > { %v1725_v8 = vpop.f32.mrf.mxu0 }
 0x9a6   : > { %v1726_v9 = vadd.f32 %v1725_v8, %v3671_v38 }
 0x9a8   : > { %v1731_v10 = vsel %vm932_vm4, %v1726_v9, -inf }
 0x9a9   : > { %1732 = vmax.xlane.f32.xlu0 %v1731_v10 }
 0x9ad   : > { %v1629_v12 = vpop.f32.mrf.mxu1  ;;  %v1728_v13 = vpop.f32.mrf.mxu0 }
 0x9ae   : > { %v1630_v14 = vadd.f32 %v1629_v12, %v3671_v38  ;;  %v1729_v15 = vadd.f32 %v1728_v13, %v3671_v38  ;;  %v3219_v13 = vld [vmem:[%s4470_s17 + $0x1] ss:$0 sm:$0xff] }
 0x9b0   : > { %v1734_v16 = vsel %vm932_vm4, %v1729_v15, -inf  ;;  %v1635_v17 = vsel %vm932_vm4, %v1630_v14, -inf }
 0x9b1   : > { %1735 = vmax.xlane.f32.xlu1 %v1734_v16  ;;  %1636 = vmax.xlane.f32.xlu2 %v1635_v17 }
 0x9b5   : > { %v1632_v44 = vpop.f32.mrf.mxu1 }
 0x9b6   : > { %v1633_v20 = vadd.f32 %v1632_v44, %v3671_v38 }
 0x9b8   : > { %v1638_v21 = vsel %vm932_vm4, %v1633_v20, -inf }
 0x9b9   : > { %1639 = vmax.xlane.f32.xlu0 %v1638_v21 }
 0x9c9   : > { %3200 = vrot.lane.b32.xlu2 %v3199_v22, %s4541_s10  ;;  %s4546_s10 = sld [smem:[#allocation22_spill]] }
 0xa1c   : > { %v1733_v23 = vpop.xlane.xlu0 %1732 }
 0xa1d   : > { %v1737_v25 = vsub.f32 %v1726_v9, %v1733_v23 }
 0xa1f   : > { %v1739_v51 = vmul.f32 1.442695, %v1737_v25 }
 0xa21   : > { %3256 = vpow2.f32 %v1739_v51 }
 0xa24   : > { %v1736_v26 = vpop.xlane.xlu1 %1735  ;;  %v1637_v27 = vpop.xlane.xlu2 %1636 }
 0xa25   : > { %v1738_v28 = vsub.f32 %v1729_v15, %v1736_v26  ;;  %v1641_v29 = vsub.f32 %v1630_v14, %v1637_v27 }
 0xa27   : > { %v3257_v30 = vpop.eup %3256  ;;  %v1741_v31 = vmul.f32 1.442695, %v1738_v28  ;;  %v1643_v32 = vmul.f32 1.442695, %v1641_v29 }
 0xa28   : > { %v1743_v33 = vsel %vm932_vm4, %v3257_v30, 0.0 }
 0xa29   : > { %3258 = vpow2.f32 %v1741_v31  ;;  %1744 = vadd.xlane.f32.xlu1 %v1743_v33  ;;  %v3033_v31 = vld [vmem:[%s4473_s20 + $0x78] sm:$0xff]  ;;  %v3031_v33 = vld [vmem:[%s4473_s20 + $0x68] sm:$0xff] }
 0xa2a   : > { %3260 = vpow2.f32 %v1643_v32  ;;  %v3032_v32 = vld [vmem:[%s4473_s20 + $0x70] sm:$0xff] }
 0xa2c   : > { %v1640_v38 = vpop.xlane.xlu0 %1639  ;;  %v3201_v34 = vpop.permute.xlu2 %3200 }
 0xa2d   : > { %v1642_v35 = vsub.f32 %v1633_v20, %v1640_v38  ;;  %v3202_v36 = vunpack.i.l.bf16 %v3201_v34  ;;  %v3203_v40 = vunpack.i.h.bf16 %v3201_v34 }
 0xa2f   : > { %v3259_v37 = vpop.eup %3258  ;;  %v1645_v39 = vmul.f32 1.442695, %v1642_v35  ;;  %1779 = vmatpush.msra.mxu3 %v3202_v36  ;;  %v3030_v35 = vld [vmem:[%s4473_s20 + $0x60] sm:$0xff]  ;;  %v3037_v36 = vld [vmem:[%s4473_s20 + $0x98] sm:$0xff] }
 0xa30   : > { %v3261_v41 = vpop.eup %3260  ;;  %v1746_v42 = vsel %vm932_vm4, %v3259_v37, 0.0  ;;  %1979 = vmatpush.msrb.mxu0 %v3037_v36  ;;  %v3071_v36 = vld [vmem:[%s4475_s22 + $0x170] sm:$0xff] }
 0xa31   : > { %3262 = vpow2.f32 %v1645_v39  ;;  %1747 = vadd.xlane.f32.xlu0 %v1746_v42  ;;  %v1647_v43 = vsel %vm932_vm4, %v3261_v41, 0.0  ;;  %1780 = vmatpush.msra.mxu3 %v3203_v40  ;;  %v3036_v39 = vld [vmem:[%s4473_s20 + $0x90] sm:$0xff] }
 0xa32   : > { %1648 = vadd.xlane.f32.xlu1 %v1647_v43  ;;  %1980 = vmatpush.msrb.mxu0 %v3036_v39  ;;  %v3062_v39 = vld [vmem:[%s4475_s22 + $0x128] sm:$0xff] }
 0xa37   : > { %v3263_v45 = vpop.eup %3262 }
 0xa38   : > { %v1650_v46 = vsel %vm932_vm4, %v3263_v45, 0.0 }
 0xa3a   : > { %1651 = vadd.xlane.f32.xlu1 %v1650_v46  ;;  %v3039_v46 = vld [vmem:[%s4473_s20 + $0xa8] sm:$0xff] }
 0xa45   : > { %3205 = vrot.lane.b32.xlu0 %v3199_v22, %s4542_s11 }
 0xa9c   : > { %v1745_v47 = vpop.xlane.xlu1 %1744 }
 0xa9d   : > { %3264 = vrcp.f32 %v1745_v47  ;;  %v3034_v47 = vld [vmem:[%s4473_s20 + $0x80] sm:$0xff] }
 0xaa3   : > { %v3265_v48 = vpop.eup %3264 }
 0xaa4   : > { %v1751_v49 = vmul.f32 %v3265_v48, %v3257_v30  ;;  %v1748_v50 = vpop.xlane.xlu0 %1747 }
 0xaa5   : > { %3266 = vrcp.f32 %v1748_v50  ;;  %v1649_v54 = vpop.xlane.xlu1 %1648  ;;  %v3038_v50 = vld [vmem:[%s4473_s20 + $0xa0] sm:$0xff] }
 0xaa6   : > { %3019 = vmatmul.msk.f32.vlgmr.msra.gmra.mxu3 %vm932_vm4, %v1751_v49  ;;  %3268 = vrcp.f32 %v1649_v54 }
 0xaab   : > { %v3267_v52 = vpop.eup %3266 }
 0xaac   : > { %v1752_v53 = vmul.f32 %v3267_v52, %v3259_v37  ;;  %v3269_v18 = vpop.eup %3268  ;;  %v3041_v37 = vld [vmem:[%s4473_s20 + $0xb8] sm:$0xff] }
 0xaad   : > { %v1652_v55 = vpop.xlane.xlu1 %1651  ;;  %v1655_v24 = vmul.f32 %v3269_v18, %v3261_v41  ;;  %2013 = vmatpush.msrb.mxu3 %v3041_v37  ;;  %v3040_v41 = vld [vmem:[%s4473_s20 + $0xb0] sm:$0xff]  ;;  %v3049_v37 = vld [vmem:[%s4475_s22 + $0xc0] sm:$0xff] }
 0xaae   : > { %3020 = vmatmul.msk.f32.gmra.mxu3 %vm932_vm4, %v1752_v53  ;;  %3270 = vrcp.f32 %v1652_v55 }
 0xaaf   : > { %2014 = vmatpush.msrb.mxu3 %v3040_v41  ;;  %v3061_v41 = vld [vmem:[%s4475_s22 + $0x120] sm:$0xff] }
 0xab1   : > { %2015 = vmatpush.msrb.mxu3 %v3039_v46  ;;  %v2231_v46 = vld [vmem:[%s829_s28] sm:$0xff] }
 0xab3   : > { %2016 = vmatpush.msrb.mxu3 %v3038_v50  ;;  %v3066_v50 = vld [vmem:[%s4475_s22 + $0x148] sm:$0xff] }
 0xab4   : > { %v3271_v62 = vpop.eup %3270 }
 0xab5   : > { %v1656_v63 = vmul.f32 %v3271_v62, %v3263_v45  ;;  %v3035_v45 = vld [vmem:[%s4473_s20 + $0x88] sm:$0xff] }
 0xab6   : > { %1981 = vmatpush.msrb.mxu0 %v3035_v45  ;;  %v3068_v45 = vld [vmem:[%s4475_s22 + $0x158] sm:$0xff] }
 0xab7   : > { %v3206_v57 = vpop.permute.xlu0 %3205 }
 0xab8   : > { %v3207_v59 = vunpack.i.l.bf16 %v3206_v57  ;;  %v3208_v60 = vunpack.i.h.bf16 %v3206_v57  ;;  %1982 = vmatpush.msrb.mxu0 %v3034_v47  ;;  %v3059_v47 = vld [vmem:[%s4475_s22 + $0x110] sm:$0xff] }
 0xaba   : > { %1683 = vmatpush.msra.mxu2 %v3207_v59 }
 0xabc   : > { %1684 = vmatpush.msra.mxu2 %v3208_v60  ;;  %v3220_v60 = vld [vmem:[%s4471_s18 + $0x1] ss:$0 sm:$0xff] }
 0xabd   : > { %3013 = vmatmul.msk.f32.vlgmr.msra.gmra.mxu2 %vm932_vm4, %v1655_v24 }
 0xabe   : > { %1944 = vmatpush.msrb.mxu2 %v3033_v31  ;;  %v3052_v31 = vld [vmem:[%s4475_s22 + $0xd8] sm:$0xff] }
 0xac0   : > { %1945 = vmatpush.msrb.mxu2 %v3032_v32  ;;  %v3051_v32 = vld [vmem:[%s4475_s22 + $0xd0] sm:$0xff] }
 0xac2   : > { %1946 = vmatpush.msrb.mxu2 %v3031_v33  ;;  %v3064_v33 = vld [vmem:[%s4475_s22 + $0x138] sm:$0xff] }
 0xac4   : > { %1947 = vmatpush.msrb.mxu2 %v3030_v35  ;;  %v3063_v35 = vld [vmem:[%s4475_s22 + $0x130] sm:$0xff] }
 0xac5   : > { %3014 = vmatmul.msk.f32.gmra.mxu2 %vm932_vm4, %v1656_v63 }
 0xac6   : > { %2116 = vmatpush.msra.mxu2 %v3064_v33 }
 0xac8   : > { %2117 = vmatpush.msra.mxu2 %v3063_v35 }
 0xaca   : > { %2118 = vmatpush.msra.mxu2 %v3062_v39 }
 0xacc   : > { %2119 = vmatpush.msra.mxu2 %v3061_v41 }
 0xb29   : > { %v1782_v0 = vpop.f32.mrf.mxu3 }
 0xb2a   : > { %1790 = vrot.lane.b32.xlu1 %v1782_v0, %s4543_s4  ;;  %v3221_v0 = vld [vmem:[%s4472_s19 + $0x1] ss:$0 sm:$0xff] }
 0xb31   : > { %v1785_v1 = vpop.f32.mrf.mxu3 }
 0xb32   : > { %1792 = vrot.lane.b32.xlu2 %v1785_v1, %s4543_s4  ;;  %s2816_s4 = scalar_lea.sflag [#allocation5], %s4358_s15 }
 0xb40   : > { %v1686_v6 = vpop.f32.mrf.mxu2 }
 0xb48   : > { %v1689_v10 = vpop.f32.mrf.mxu2 }
 0xb8c   : > { %v1793_v9 = vpop.permute.xlu2 %1792 }
 0xb8d   : > { %v1797_v12 = vsel %vm932_vm4, %v1689_v10, %v1793_v9 }
 0xb9c   : > { %v1791_v7 = vpop.permute.xlu1 %1790 }
 0xb9d   : > { %v1796_v8 = vsel %vm932_vm4, %v1686_v6, %v1791_v7 }
 0xb9e   : > { %3026 = vmatmul.msk.f32.vlgmr.msra.gmra.mxu1 %vm896_vm3, %v1796_v8 }
 0xba6   : > { %3027 = vmatmul.msk.f32.gmra.mxu1 %vm896_vm3, %v1797_v12 }
 0xc1b   : > { %v1831_v14 = vpop.f32.mrf.mxu1 }
 0xc1c   : > { %v1832_v15 = vadd.f32 %v3219_v13, %v1831_v14 }
 0xc1e   : > { %v1837_v16 = vadd.f32 %v1832_v15, %v3912_v56 }
 0xc20   : > { %v1843_v17 = vsel %vm896_vm3, %v1837_v16, 0.0 }
 0xc21   : > { %1844 = vadd.xlane.f32.xlu0 %v1843_v17 }
 0xc23   : > { %v1834_v44 = vpop.f32.mrf.mxu1 }
 0xc24   : > { %v1835_v20 = vadd.f32 %v3219_v13, %v1834_v44 }
 0xc26   : > { %v1838_v21 = vadd.f32 %v1835_v20, %v3917_v61 }
 0xc28   : > { %v1846_v22 = vsel %vm896_vm3, %v1838_v21, 0.0 }
 0xc29   : > { %1847 = vadd.xlane.f32.xlu2 %v1846_v22 }
 0xc94   : > { %v1845_v23 = vpop.xlane.xlu0 %1844 }
 0xc95   : > { %v1849_v25 = vmul.f32 %v1845_v23, %v3716_v58 }
 0xc97   : > { %v1851_v51 = vsub.f32 %v1837_v16, %v1849_v25 }
 0xc99   : > { %v1853_v26 = vmul.f32 %v1851_v51, %v1851_v51 }
 0xc9b   : > { %v1855_v27 = vsel %vm896_vm3, %v1853_v26, 0.0 }
 0xc9c   : > { %1856 = vadd.xlane.f32.xlu1 %v1855_v27  ;;  %v1848_v28 = vpop.xlane.xlu2 %1847 }
 0xc9d   : > { %v1850_v56 = vmul.f32 %v1848_v28, %v3716_v58 }
 0xc9f   : > { %v3984_v29 = vsub.f32 %v1838_v21, %v1850_v56  ;;  %v3056_v56 = vld [vmem:[%s4475_s22 + $0xf8] sm:$0xff] }
 0xca0   : > { %2081 = vmatpush.msrb.mxu1 %v3056_v56 }
 0xca1   : > { %v1854_v30 = vmul.f32 %v3984_v29, %v3984_v29 }
 0xca3   : > { %v1858_v61 = vsel %vm896_vm3, %v1854_v30, 0.0  ;;  %v3054_v30 = vld [vmem:[%s4475_s22 + $0xe8] sm:$0xff] }
 0xca4   : > { %1859 = vadd.xlane.f32.xlu0 %v1858_v61  ;;  %v3053_v61 = vld [vmem:[%s4475_s22 + $0xe0] sm:$0xff] }
 0xd0f   : > { %v1857_v38 = vpop.xlane.xlu1 %1856 }
 0xd10   : > { %v1861_v34 = vmul.f32 %v1857_v38, %v3716_v58  ;;  %v3072_v38 = vld [vmem:[%s4475_s22 + $0x178] sm:$0xff] }
 0xd11   : > { %2150 = vmatpush.msra.mxu0 %v3072_v38 }
 0xd12   : > { %v1863_v40 = vadd.f32 1e-05, %v1861_v34  ;;  %v3050_v34 = vld [vmem:[%s4475_s22 + $0xc8] sm:$0xff] }
 0xd13   : > { %2151 = vmatpush.msra.mxu0 %v3071_v36 }
 0xd14   : > { %3272 = vrsqrt.f32 %v1863_v40  ;;  %vm1871_vm9 = vweird.f32 %v1863_v40 }
 0xd17   : > { %v1860_v42 = vpop.xlane.xlu0 %1859 }
 0xd18   : > { %v1862_v43 = vmul.f32 %v1860_v42, %v3716_v58  ;;  %v3069_v42 = vld [vmem:[%s4475_s22 + $0x160] sm:$0xff] }
 0xd1a   : > { %v3273_v48 = vpop.eup %3272  ;;  %v1864_v49 = vadd.f32 1e-05, %v1862_v43  ;;  %v3060_v43 = vld [vmem:[%s4475_s22 + $0x118] sm:$0xff] }
 0xd1b   : > { %v1866_v52 = vmul.f32 %v3273_v48, %v1863_v40  ;;  %vm1872_vm4 = vweird.f32 %v3273_v48  ;;  %v3070_v40 = vld [vmem:[%s4475_s22 + $0x168] sm:$0xff]  ;;  %2120 = vmatpush.msra.mxu2 %v3060_v43 }
 0xd1c   : > { %3274 = vrsqrt.f32 %v1864_v49  ;;  %vm1873_vm10 = vmor %vm1871_vm9, %vm1872_vm4  ;;  %vm1881_vm12 = vweird.f32 %v1864_v49  ;;  %2152 = vmatpush.msra.mxu0 %v3070_v40 }
 0xd1d   : > { %v1867_v53 = vmul.f32 %v3273_v48, %v1866_v52  ;;  %2121 = vmatpush.msra.mxu2 %v3059_v47  ;;  %v3057_v52 = vld [vmem:[%s4475_s22 + $0x100] sm:$0xff] }
 0xd1e   : > { %2153 = vmatpush.msra.mxu0 %v3069_v42 }
 0xd1f   : > { %v1868_v54 = vmul.f32 0.5, %v1867_v53  ;;  %v2244_v53 = vrot.slane %v2231_v46, 5 }
 0xd20   : > { %2154 = vmatpush.msra.mxu0 %v3068_v45 }
 0xd21   : > { %v1869_v55 = vsub.f32 1.5, %v1868_v54  ;;  %v3065_v54 = vld [vmem:[%s4475_s22 + $0x140] sm:$0xff] }
 0xd22   : > { %v3275_v57 = vpop.eup %3274 }
 0xd23   : > { %v1870_v18 = vmul.f32 %v3273_v48, %v1869_v55  ;;  %v1876_v59 = vmul.f32 %v3275_v57, %v1864_v49  ;;  %vm1882_vm11 = vweird.f32 %v3275_v57  ;;  %v3058_v49 = vld [vmem:[%s4475_s22 + $0x108] sm:$0xff]  ;;  %v2233_v55 = vld [vmem:[%s4546_s10] sm:$0x3] }
 0xd24   : > { %vm1883_vm1 = vmor %vm1881_vm12, %vm1882_vm11  ;;  %2122 = vmatpush.msra.mxu2 %v3058_v49  ;;  %3082 = vmatpush.msk.msra.mxu3 %vm2261_vm5, %v2233_v55 }
 0xd25   : > { %v1874_v24 = vsel %vm1873_vm10, %v3273_v48, %v1870_v18  ;;  %v1877_v62 = vmul.f32 %v3275_v57, %v1876_v59  ;;  %v3067_v48 = vld [vmem:[%s4475_s22 + $0x150] sm:$0xff]  ;;  %v2232_v18 = vld [vmem:[%s829_s28 + $0x8] sm:$0xff]  ;;  %s4501_s28 = sshll.u32 %s4358_s15, 4 }
 0xd26   : > { %v1885_v63 = vmul.f32 %v1874_v24, %v1851_v51  ;;  %2155 = vmatpush.msra.mxu0 %v3067_v48  ;;  %2123 = vmatpush.msra.mxu2 %v3057_v52  ;;  %s4369_s7 = scalar_lea.vmem [#allocation4], %s4501_s28  ;;  %s3127_s28 = sshll.u32 %s3578_s13, 4 }
 0xd27   : > { %v1878_v1 = vmul.f32 0.5, %v1877_v62  ;;  %v2245_v62 = vrot.slane %v2232_v18, 5  ;;  %s2832_s1 = scalar_lea.hbm %s4479_s26, %s3127_s28  ;;  %s2833_s14 = sshll.u32 %s4369_s7, 4  ;;  %s2834_s14 = int_to_ptr.vmem [resolvable:$true] %s2833_s14 }
 0xd28   : > { %v1890_v2 = vmul.f32 %v3220_v60, %v1885_v63  ;;  %2156 = vmatpush.msra.mxu0 %v3066_v50  ;;  %v2235_v63 = vld [vmem:[%s4546_s10 + $0x4] sm:$0x3]  ;;  %s2835_s11 = sshll.u32 %s2832_s1, 4  ;;  %s3324_s13 = scalar_lea.hbm %s4479_s26, 32  ;;  %s2836_s11 = int_to_ptr.hbm [resolvable:$true] %s2835_s11 }
 0xd29   : > { %v1879_v3 = vsub.f32 1.5, %v1878_v1 }
 0xd2a   : > { %v1895_v4 = vadd.f32 %v3221_v0, %v1890_v2  ;;  %2157 = vmatpush.msra.mxu0 %v3065_v54  ;;  %v4153_v2 = vsel %vm2243_vm2, %v2244_v53, %v2245_v62 }
 0xd2b   : > { %v1880_v5 = vmul.f32 %v3275_v57, %v1879_v3  ;;  %v2292_v38 = vrot.slane %v4153_v2, 1  ;;  %v2479_v39 = vrot.slane %v4153_v2, 6  ;;  %v2329_v50 = vrot.slane %v4153_v2, 2 }
 0xd2c   : > { %v4034_v6 = vmul.f32 %v3631_v11, %v1895_v4 }
 0xd2d   : > { %v1884_v7 = vsel %vm1883_vm1, %v3275_v57, %v1880_v5  ;;  %v4137_v57 = vsel %vm2243_vm2, 0.0, %v2244_v53  ;;  %v2367_v53 = vrot.slane %v4153_v2, 3 }
 0xd2e   : > { %v1886_v8 = vmul.f32 %v1884_v7, %v3984_v29  ;;  %v1916_v9 = vrot.slane %v4034_v6, 7  ;;  %v3055_v29 = vld [vmem:[%s4475_s22 + $0xf0] sm:$0xff]  ;;  %v2291_v33 = vrot.slane %v4137_v57, 1  ;;  %v2328_v49 = vrot.slane %v4137_v57, 2 }
 0xd2f   : > { %2082 = vmatpush.msrb.mxu1 %v3055_v29  ;;  %v2366_v52 = vrot.slane %v4137_v57, 3 }
 0xd30   : > { %v1891_v10 = vmul.f32 %v3220_v60, %v1886_v8  ;;  %v1921_v12 = vsel %vm1246_vm13, 0.0, %v1916_v9  ;;  %v3222_v60 = vld [vmem:[%s4474_s21 + $0x1] ss:$0 sm:$0xff]  ;;  %v2293_v41 = vsel %vm1289_vm14, %v2291_v33, %v2292_v38  ;;  %v2330_v55 = vsel %vm1324_vm15, %v2328_v49, %v2329_v50 }
 0xd31   : > { %3043 = vmatmul.msk.f32.vlgmr.msrb.gmra.mxu2 %vm896_vm3, %v1921_v12  ;;  %v1958_v17 = vrot.slane %v1921_v12, 1  ;;  %v1992_v44 = vrot.slane %v1921_v12, 2  ;;  %2083 = vmatpush.msrb.mxu1 %v3054_v30  ;;  %v2368_v18 = vsel %vm2365_vm8, %v2366_v52, %v2367_v53 }
 0xd32   : > { %v1896_v13 = vadd.f32 %v3221_v0, %v1891_v10  ;;  %v2234_v0 = vld [vmem:[%s4546_s10 + $0x2] sm:$0x3]  ;;  %3088 = vmatpush.msk.msrb.mxu2 %vm2261_vm5, %v2235_v63 }
 0xd33   : > { %2084 = vmatpush.msrb.mxu1 %v3053_v61 }
 0xd34   : > { %v4041_v14 = vmul.f32 %v3642_v19, %v1896_v13 }
 0xd35   : > { %2085 = vmatpush.msrb.mxu1 %v3052_v31 }
 0xd36   : > { %v1917_v15 = vrot.slane %v4041_v14, 7 }
 0xd37   : > { %2086 = vmatpush.msrb.mxu1 %v3051_v32 }
 0xd38   : > { %v1918_v16 = vsel %vm1246_vm13, %v1916_v9, %v1917_v15  ;;  %v1922_v25 = vsel %vm1246_vm13, %v1917_v15, 0.0  ;;  %v2237_v9 = vld [vmem:[%s4546_s10 + $0x8] sm:$0x3]  ;;  %v2404_v15 = vrot.slane %v4137_v57, 4 }
 0xd39   : > { %3044 = vmatmul.msk.f32.gmra.mxu2 %vm896_vm3, %v1918_v16  ;;  %v1959_v20 = vrot.slane %v1918_v16, 1  ;;  %v1993_v21 = vrot.slane %v1918_v16, 2  ;;  %v1961_v51 = vrot.slane %v1922_v25, 1  ;;  %v1995_v26 = vrot.slane %v1922_v25, 2  ;;  %2087 = vmatpush.msrb.mxu1 %v3050_v34  ;;  %v2239_v34 = vld [vmem:[%s4546_s10 + $0xc] sm:$0x3] }
 0xd3a   : > { %v2405_v16 = vrot.slane %v4153_v2, 4 }
 0xd3b   : > { %v1960_v22 = vsel %vm1289_vm14, %v1958_v17, %v1959_v20  ;;  %v1994_v23 = vsel %vm1324_vm15, %v1992_v44, %v1993_v21  ;;  %v1962_v27 = vsel %vm1289_vm14, %v1959_v20, %v1961_v51  ;;  %v1996_v28 = vsel %vm1324_vm15, %v1993_v21, %v1995_v26  ;;  %2088 = vmatpush.msrb.mxu1 %v3049_v37  ;;  %v2238_v51 = vld [vmem:[%s4546_s10 + $0xa] sm:$0x3] }
 0xd3c   : > { %3045 = vmatmul.msk.f32.vlgmr.msrb.gmra.mxu0 %vm896_vm3, %v1960_v22  ;;  %3047 = vmatmul.msk.f32.vlgmr.msrb.gmra.mxu3 %vm896_vm3, %v1994_v23  ;;  %v2406_v21 = vsel %vm2403_vm7, %v2404_v15, %v2405_v16  ;;  %v2236_v23 = vld [vmem:[%s4546_s10 + $0x6] sm:$0x3]  ;;  %v2250_v26 = vsel %vm2243_vm2, %v2245_v62, 0.0 }
 0xd3d   : > { %3085 = vmatpush.msk.msra.mxu1 %vm2261_vm5, %v2234_v0  ;;  %3094 = vmatpush.msk.msrb.mxu3 %vm2261_vm5, %v2237_v9  ;;  %v2481_v40 = vrot.slane %v2250_v26, 6  ;;  %v2294_v46 = vrot.slane %v2250_v26, 1  ;;  %v2369_v62 = vrot.slane %v2250_v26, 3 }
 0xd3e   : > { %3091 = vmatpush.msk.msrb.mxu0 %vm2261_vm5, %v2236_v23  ;;  %v3224_v23 = vld [vmem:[%s4548_s9] ss:$0 sm:$0xff]  ;;  %s3318_s9 = sshra.s32 %s2836_s11, 4  ;;  %s3319_s9 = int_to_ptr.hbm [resolvable:$true] %s3318_s9 }
 0xd3f   : > { %v2482_v42 = vsel %vm2261_vm5, %v2479_v39, %v2481_v40  ;;  %v2295_v54 = vsel %vm1289_vm14, %v2292_v38, %v2294_v46  ;;  %v2527_v40 = vld [vmem:[%s4547_s16 + $0x50] sm:$0xff]  ;;  %v2525_v46 = vld [vmem:[%s4547_s16 + $0x40] sm:$0xff]  ;;  %p3325_p0 = scmp.lt.s32.totalorder %s3319_s9, %s4479_s26 }
 0xd44   : > { %3046 = vmatmul.msk.f32.gmra.mxu0 %vm896_vm3, %v1962_v27  ;;  %3048 = vmatmul.msk.f32.gmra.mxu3 %vm896_vm3, %v1996_v28  ;;  %v2407_v28 = vrot.slane %v2250_v26, 4 }
 0xd46   : > { %v2408_v29 = vsel %vm2403_vm7, %v2405_v16, %v2407_v28 }
 0xd4c   : > { %3083 = vmatmul.msk.f32.vlgmr.msra.gmra.mxu3 %vm2255_vm6, %v4137_v57 }
 0xd54   : > { %3084 = vmatmul.msk.f32.gmra.mxu3 %vm2255_vm6, %v4153_v2 }
 0xd5c   : > { %3095 = vmatmul.msk.f32.vlgmr.msrb.gmra.mxu3 %vm2255_vm6, %v2406_v21 }
 0xd64   : > { %3096 = vmatmul.msk.f32.gmra.mxu3 %vm2255_vm6, %v2408_v29 }
 0xdb4   : > { %v1949_v59 = vpop.f32.mrf.mxu2 }
 0xdb5   : > { %v1955_v1 = vadd.f32 %v3222_v60, %v1949_v59  ;;  %v2441_v59 = vrot.slane %v4137_v57, 5 }
 0xdb9   : > { %v1984_v24 = vpop.f32.mrf.mxu0 }
 0xdba   : > { %v1990_v3 = vadd.f32 %v1984_v24, %v1955_v1  ;;  %v2331_v24 = vrot.slane %v2250_v26, 2  ;;  %v2370_v1 = vsel %vm2365_vm8, %v2367_v53, %v2369_v62 }
 0xdbc   : > { %v1952_v7 = vpop.f32.mrf.mxu2  ;;  %v2332_v0 = vsel %vm1324_vm15, %v2329_v50, %v2331_v24 }
 0xdbd   : > { %v1956_v12 = vadd.f32 %v3222_v60, %v1952_v7  ;;  %v2442_v60 = vrot.slane %v4153_v2, 5  ;;  %v2478_v2 = vrot.slane %v4137_v57, 6 }
 0xdbf   : > { %v2018_v4 = vpop.f32.mrf.mxu3  ;;  %v2443_v63 = vsel %vm2243_vm2, %v2441_v59, %v2442_v60 }
 0xdc0   : > { %v2024_v5 = vadd.f32 %v2018_v4, %v1990_v3  ;;  %v2444_v3 = vrot.slane %v2250_v26, 5 }
 0xdc1   : > { %v1987_v10 = vpop.f32.mrf.mxu0 }
 0xdc2   : > { %v2026_v8 = vmax.f32 %v2024_v5, 0.0  ;;  %v1991_v44 = vadd.f32 %v1987_v10, %v1956_v12  ;;  %v2445_v4 = vsel %vm2243_vm2, %v2442_v60, %v2444_v3  ;;  %v2480_v5 = vsel %vm2261_vm5, %v2478_v2, %v2479_v39  ;;  %v2523_v39 = vld [vmem:[%s4547_s16 + $0x30] sm:$0xff] }
 0xdc4   : > { %v2057_v13 = vrot.slane %v2026_v8, 7  ;;  %v3223_v8 = vld [vmem:[%s4476_s23 + $0x1] ss:$0 sm:$0xff] }
 0xdc6   : > { %v2062_v17 = vsel %vm1246_vm13, 0.0, %v2057_v13 }
 0xdc7   : > { %v2021_v20 = vpop.f32.mrf.mxu3  ;;  %3074 = vmatmul.msk.f32.vlgmr.msrb.gmra.mxu1 %vm1399_vm0, %v2062_v17  ;;  %v2099_v30 = vrot.slane %v2062_v17, 1  ;;  %v2133_v61 = vrot.slane %v2062_v17, 2 }
 0xdc8   : > { %v2025_v22 = vadd.f32 %v2021_v20, %v1991_v44  ;;  %3097 = vmatpush.msk.msrb.mxu1 %vm2261_vm5, %v2238_v51  ;;  %v2520_v20 = vld [vmem:[%s4547_s16 + $0x18] sm:$0xff] }
 0xdca   : > { %v2027_v25 = vmax.f32 %v2025_v22, 0.0 }
 0xdcc   : > { %v2058_v27 = vrot.slane %v2027_v25, 7 }
 0xdce   : > { %v2059_v56 = vsel %vm1246_vm13, %v2057_v13, %v2058_v27  ;;  %v2063_v37 = vsel %vm1246_vm13, %v2058_v27, 0.0  ;;  %v2518_v27 = vld [vmem:[%s4547_s16 + $0x8] sm:$0xff] }
 0xdcf   : > { %3075 = vmatmul.msk.f32.gmra.mxu1 %vm1399_vm0, %v2059_v56  ;;  %v2100_v31 = vrot.slane %v2059_v56, 1  ;;  %v2134_v32 = vrot.slane %v2059_v56, 2  ;;  %v2102_v43 = vrot.slane %v2063_v37, 1  ;;  %v2136_v45 = vrot.slane %v2063_v37, 2  ;;  %v2282_v15 = vpop.f32.mrf.mxu3 }
 0xdd0   : > { %v2288_v56 = vadd.f32 %v3224_v23, %v2282_v15 }
 0xdd1   : > { %v2101_v35 = vsel %vm1289_vm14, %v2099_v30, %v2100_v31  ;;  %v2135_v36 = vsel %vm1324_vm15, %v2133_v61, %v2134_v32  ;;  %v2103_v47 = vsel %vm1289_vm14, %v2100_v31, %v2102_v43  ;;  %v2137_v48 = vsel %vm1324_vm15, %v2134_v32, %v2136_v45  ;;  %v2517_v30 = vld [vmem:[%s4547_s16] sm:$0xff] }
 0xdd2   : > { %3076 = vmatmul.msk.f32.vlgmr.msra.gmra.mxu2 %vm1399_vm0, %v2101_v35  ;;  %3078 = vmatmul.msk.f32.vlgmr.msra.gmra.mxu0 %vm1399_vm0, %v2135_v36  ;;  %v2528_v35 = vld [vmem:[%s4547_s16 + $0x58] sm:$0xff]  ;;  %v2521_v43 = vld [vmem:[%s4547_s16 + $0x20] sm:$0xff] }
 0xdd3   : > { %3100 = vmatpush.msk.msra.mxu2 %vm2261_vm5, %v2239_v34  ;;  %2560 = vmatpush.msra.mxu0 %v2520_v20  ;;  %v2524_v34 = vld [vmem:[%s4547_s16 + $0x38] sm:$0xff] }
 0xdd4   : > { %2595 = vmatpush.msra.mxu3 %v2524_v34  ;;  %v2655_v34 = vld [vmem:[%s4549_s3 + $0x58] sm:$0xff] }
 0xdd6   : > { %2596 = vmatpush.msra.mxu3 %v2523_v39  ;;  %v2648_v39 = vld [vmem:[%s4549_s3 + $0x20] sm:$0xff] }
 0xdd7   : > { %3086 = vmatmul.msk.f32.vlgmr.msra.gmra.mxu1 %vm2255_vm6, %v2293_v41  ;;  %v2285_v29 = vpop.f32.mrf.mxu3  ;;  %v2522_v41 = vld [vmem:[%s4547_s16 + $0x28] sm:$0xff] }
 0xdd8   : > { %2629 = vmatpush.msra.mxu1 %v2528_v35  ;;  %v2289_v37 = vadd.f32 %v3224_v23, %v2285_v29  ;;  %2597 = vmatpush.msra.mxu3 %v2522_v41  ;;  %v2650_v35 = vld [vmem:[%s4549_s3 + $0x30] sm:$0xff] }
 0xdda   : > { %3077 = vmatmul.msk.f32.gmra.mxu2 %vm1399_vm0, %v2103_v47  ;;  %3079 = vmatmul.msk.f32.gmra.mxu0 %vm1399_vm0, %v2137_v48 }
 0xddb   : > { %2630 = vmatpush.msra.mxu1 %v2527_v40  ;;  %2598 = vmatpush.msra.mxu3 %v2521_v43  ;;  %v2652_v40 = vld [vmem:[%s4549_s3 + $0x40] sm:$0xff] }
 0xddd   : > { %2756 = vmatpush.msrb.mxu3 %v2655_v34 }
 0xddf   : > { %3087 = vmatmul.msk.f32.gmra.mxu1 %vm2255_vm6, %v2295_v54  ;;  %v2433_v45 = vpop.f32.mrf.mxu3 }
 0xde2   : > { %3089 = vmatmul.msk.f32.vlgmr.msrb.gmra.mxu2 %vm2255_vm6, %v2330_v55  ;;  %3092 = vmatmul.msk.f32.vlgmr.msrb.gmra.mxu0 %vm2255_vm6, %v2368_v18 }
 0xde7   : > { %3098 = vmatmul.msk.f32.vlgmr.msrb.gmra.mxu1 %vm2255_vm6, %v2443_v63  ;;  %v2436_v60 = vpop.f32.mrf.mxu3 }
 0xdea   : > { %3090 = vmatmul.msk.f32.gmra.mxu2 %vm2255_vm6, %v2332_v0  ;;  %3093 = vmatmul.msk.f32.gmra.mxu0 %vm2255_vm6, %v2370_v1 }
 0xdef   : > { %3099 = vmatmul.msk.f32.gmra.mxu1 %vm2255_vm6, %v2445_v4 }
 0xdf2   : > { %3101 = vmatmul.msk.f32.vlgmr.msra.gmra.mxu2 %vm2255_vm6, %v2480_v5 }
 0xdfa   : > { %3102 = vmatmul.msk.f32.gmra.mxu2 %vm2255_vm6, %v2482_v42  ;;  %v2526_v42 = vld [vmem:[%s4547_s16 + $0x48] sm:$0xff] }
 0xdfb   : > { %2631 = vmatpush.msra.mxu1 %v2526_v42  ;;  %v3225_v42 = vld [vmem:[%s4550_s8] ss:$0 sm:$0xff] }
 0xdfd   : > { %2632 = vmatpush.msra.mxu1 %v2525_v46 }
 0xe44   : > { %v2090_v7 = vpop.f32.mrf.mxu1 }
 0xe45   : > { %v2096_v10 = vadd.f32 %v3223_v8, %v2090_v7 }
 0xe4c   : > { %v2093_v9 = vpop.f32.mrf.mxu1 }
 0xe4d   : > { %v2097_v21 = vadd.f32 %v3223_v8, %v2093_v9 }
 0xe4f   : > { %v2159_v12 = vpop.f32.mrf.mxu0 }
 0xe54   : > { %v2320_v44 = vpop.f32.mrf.mxu1 }
 0xe55   : > { %v2125_v13 = vpop.f32.mrf.mxu2  ;;  %v2326_v31 = vadd.f32 %v2320_v44, %v2288_v56 }
 0xe56   : > { %v2131_v57 = vadd.f32 %v2125_v13, %v2096_v10 }
 0xe57   : > { %v2162_v26 = vpop.f32.mrf.mxu0 }
 0xe58   : > { %v2165_v16 = vadd.f32 %v2159_v12, %v2131_v57 }
 0xe5a   : > { %v4225_v17 = vadd.f32 %v2165_v16, %v4034_v6  ;;  %v2519_v6 = vld [vmem:[%s4547_s16 + $0x10] sm:$0xff] }
 0xe5b   : > { %2561 = vmatpush.msra.mxu0 %v2519_v6 }
 0xe5c   : > { %v2173_v22 = vsel %vm896_vm3, %v4225_v17, 0.0  ;;  %v2323_v38 = vpop.f32.mrf.mxu1 }
 0xe5d   : > { %2174 = vadd.xlane.f32.xlu2 %v2173_v22  ;;  %v2128_v25 = vpop.f32.mrf.mxu2  ;;  %2562 = vmatpush.msra.mxu0 %v2518_v27  ;;  %v2327_v47 = vadd.f32 %v2323_v38, %v2289_v37  ;;  %v2651_v38 = vld [vmem:[%s4549_s3 + $0x38] sm:$0xff]  ;;  %v2653_v37 = vld [vmem:[%s4549_s3 + $0x48] sm:$0xff] }
 0xe5e   : > { %v2132_v51 = vadd.f32 %v2128_v25, %v2097_v21 }
 0xe5f   : > { %2563 = vmatpush.msra.mxu0 %v2517_v30  ;;  %v2395_v36 = vpop.f32.mrf.mxu0 }
 0xe60   : > { %v2166_v28 = vadd.f32 %v2162_v26, %v2132_v51 }
 0xe61   : > { %2722 = vmatpush.msrb.mxu0 %v2651_v38 }
 0xe62   : > { %v4245_v61 = vadd.f32 %v2166_v28, %v4041_v14 }
 0xe63   : > { %2723 = vmatpush.msrb.mxu0 %v2650_v35 }
 0xe64   : > { %v2176_v32 = vsel %vm896_vm3, %v4245_v61, 0.0  ;;  %v2470_v50 = vpop.f32.mrf.mxu1 }
 0xe65   : > { %v2357_v33 = vpop.f32.mrf.mxu2  ;;  %2177 = vadd.xlane.f32.xlu0 %v2176_v32  ;;  %v2646_v32 = vld [vmem:[%s4549_s3 + $0x10] sm:$0xff] }
 0xe66   : > { %v2363_v14 = vadd.f32 %v2357_v33, %v2326_v31  ;;  %v2644_v33 = vld [vmem:[%s4549_s3] sm:$0xff] }
 0xe67   : > { %v2398_v54 = vpop.f32.mrf.mxu0 }
 0xe68   : > { %v2401_v48 = vadd.f32 %v2395_v36, %v2363_v14  ;;  %v2654_v36 = vld [vmem:[%s4549_s3 + $0x50] sm:$0xff]  ;;  %v2649_v14 = vld [vmem:[%s4549_s3 + $0x28] sm:$0xff] }
 0xe69   : > { %2757 = vmatpush.msrb.mxu3 %v2654_v36  ;;  %2724 = vmatpush.msrb.mxu0 %v2649_v14 }
 0xe6a   : > { %v2439_v53 = vadd.f32 %v2433_v45, %v2401_v48 }
 0xe6b   : > { %2758 = vmatpush.msrb.mxu3 %v2653_v37  ;;  %2725 = vmatpush.msrb.mxu0 %v2648_v39 }
 0xe6c   : > { %v2476_v55 = vadd.f32 %v2470_v50, %v2439_v53  ;;  %v2473_v63 = vpop.f32.mrf.mxu1 }
 0xe6d   : > { %v2360_v49 = vpop.f32.mrf.mxu2  ;;  %2759 = vmatpush.msrb.mxu3 %v2652_v40  ;;  %v2772_v40 = vld [vmem:[%s4551_s12 + $0x8] sm:$0xff] }
 0xe6e   : > { %v2364_v52 = vadd.f32 %v2360_v49, %v2327_v47 }
 0xe70   : > { %v2402_v18 = vadd.f32 %v2398_v54, %v2364_v52 }
 0xe72   : > { %v2440_v62 = vadd.f32 %v2436_v60, %v2402_v18 }
 0xe74   : > { %v2477_v0 = vadd.f32 %v2473_v63, %v2440_v62 }
 0xe75   : > { %v2507_v59 = vpop.f32.mrf.mxu2 }
 0xe76   : > { %v2513_v24 = vadd.f32 %v2507_v59, %v2476_v55 }
 0xe78   : > { %3276 = vtanh.f32 %v2513_v24 }
 0xe7d   : > { %v2510_v1 = vpop.f32.mrf.mxu2 }
 0xe7e   : > { %v3277_v3 = vpop.eup %3276  ;;  %v2514_v2 = vadd.f32 %v2510_v1, %v2477_v0 }
 0xe7f   : > { %v2532_v4 = vrot.slane %v3277_v3, 7 }
 0xe80   : > { %3278 = vtanh.f32 %v2514_v2 }
 0xe81   : > { %v2537_v5 = vsel %vm1246_vm13, 0.0, %v2532_v4 }
 0xe82   : > { %3103 = vmatmul.msk.f32.vlgmr.msra.gmra.mxu0 %vm896_vm3, %v2537_v5  ;;  %v2574_v10 = vrot.slane %v2537_v5, 1  ;;  %v2608_v12 = vrot.slane %v2537_v5, 2 }
 0xe86   : > { %v3279_v7 = vpop.eup %3278 }
 0xe87   : > { %v2533_v8 = vrot.slane %v3279_v7, 7 }
 0xe89   : > { %v2534_v9 = vsel %vm1246_vm13, %v2532_v4, %v2533_v8  ;;  %v2538_v44 = vsel %vm1246_vm13, %v2533_v8, 0.0 }
 0xe8a   : > { %3104 = vmatmul.msk.f32.gmra.mxu0 %vm896_vm3, %v2534_v9  ;;  %v2575_v13 = vrot.slane %v2534_v9, 1  ;;  %v2609_v57 = vrot.slane %v2534_v9, 2  ;;  %v2577_v20 = vrot.slane %v2538_v44, 1  ;;  %v2611_v21 = vrot.slane %v2538_v44, 2 }
 0xe8c   : > { %v2576_v15 = vsel %vm1289_vm14, %v2574_v10, %v2575_v13  ;;  %v2610_v16 = vsel %vm1324_vm15, %v2608_v12, %v2609_v57  ;;  %v2578_v22 = vsel %vm1289_vm14, %v2575_v13, %v2577_v20  ;;  %v2612_v23 = vsel %vm1324_vm15, %v2609_v57, %v2611_v21 }
 0xe8d   : > { %3105 = vmatmul.msk.f32.vlgmr.msra.gmra.mxu3 %vm896_vm3, %v2576_v15  ;;  %3107 = vmatmul.msk.f32.vlgmr.msra.gmra.mxu1 %vm896_vm3, %v2610_v16 }
 0xe95   : > { %3106 = vmatmul.msk.f32.gmra.mxu3 %vm896_vm3, %v2578_v22  ;;  %3108 = vmatmul.msk.f32.gmra.mxu1 %vm896_vm3, %v2612_v23 }
 0xed0   : > { %v2175_v25 = vpop.xlane.xlu2 %2174 }
 0xed1   : > { %v2179_v6 = vmul.f32 %v2175_v25, %v3716_v58 }
 0xed3   : > { %v4288_v51 = vsub.f32 %v4225_v17, %v2179_v6  ;;  %v2647_v17 = vld [vmem:[%s4549_s3 + $0x18] sm:$0xff] }
 0xed4   : > { %2687 = vmatpush.msrb.mxu2 %v2647_v17  ;;  %v3228_v17 = vld [vmem:[%s4478_s25 + $0x1] ss:$0 sm:$0xff] }
 0xed5   : > { %v2183_v26 = vmul.f32 %v4288_v51, %v4288_v51 }
 0xed6   : > { %2688 = vmatpush.msrb.mxu2 %v2646_v32 }
 0xed7   : > { %v2185_v27 = vsel %vm896_vm3, %v2183_v26, 0.0 }
 0xed8   : > { %2186 = vadd.xlane.f32.xlu2 %v2185_v27  ;;  %v2178_v28 = vpop.xlane.xlu0 %2177 }
 0xed9   : > { %v2180_v56 = vmul.f32 %v2178_v28, %v3716_v58 }
 0xedb   : > { %v4295_v29 = vsub.f32 %v4245_v61, %v2180_v56  ;;  %v2645_v61 = vld [vmem:[%s4549_s3 + $0x8] sm:$0xff]  ;;  %v3227_v56 = vld [vmem:[%s4477_s24 + $0x1] ss:$0 sm:$0xff] }
 0xedc   : > { %2689 = vmatpush.msrb.mxu2 %v2645_v61 }
 0xedd   : > { %v2184_v30 = vmul.f32 %v4295_v29, %v4295_v29 }
 0xede   : > { %2690 = vmatpush.msrb.mxu2 %v2644_v33 }
 0xedf   : > { %v2188_v31 = vsel %vm896_vm3, %v2184_v30, 0.0 }
 0xee0   : > { %2189 = vadd.xlane.f32.xlu1 %v2188_v31 }
 0xeff   : > { %v2565_v41 = vpop.f32.mrf.mxu0 }
 0xf00   : > { %v2571_v43 = vadd.f32 %v3225_v42, %v2565_v41 }
 0xf07   : > { %v2568_v49 = vpop.f32.mrf.mxu0 }
 0xf08   : > { %v2572_v50 = vadd.f32 %v3225_v42, %v2568_v49  ;;  %v3226_v42 = vld [vmem:[%s4552_s6] ss:$0 sm:$0xff]  ;;  %s3320_s6 = scalar_lea.hbm %s3319_s9, 16 }
 0xf09   : > { %p3321_p11 = scmp.ne.s32.totalorder %s3319_s9, %s3320_s6  ;;  %p3326_p1 = scmp.lt.s32.totalorder %s3324_s13, %s3320_s6 }
 0xf0a   : > { %v2634_v45 = vpop.f32.mrf.mxu1 }
 0xf0b   : > { %p3322_p12 = pnand %p3321_p11, %p3595_p5  ;;  %p3327_p2 = por %p3326_p1, %p3325_p0 }
 0xf0d   : > { %p3323_p13 = pneg %p3322_p12 }
 0xf0f   : > { %p3328_p3 = pnand %p3327_p2, %p3323_p13 }
 0xf10   : > { %v2600_v46 = vpop.f32.mrf.mxu3 }
 0xf11   : > { %v2606_v47 = vadd.f32 %v2600_v46, %v2571_v43 }
 0xf12   : > { %v2637_v54 = vpop.f32.mrf.mxu1 }
 0xf13   : > { %v2640_v48 = vadd.f32 %v2634_v45, %v2606_v47 }
 0xf15   : > { %3280 = vtanh.f32 %v2640_v48 }
 0xf18   : > { %v2603_v52 = vpop.f32.mrf.mxu3 }
 0xf19   : > { %v2607_v53 = vadd.f32 %v2603_v52, %v2572_v50 }
 0xf1b   : > { %v3281_v55 = vpop.eup %3280  ;;  %v2641_v18 = vadd.f32 %v2637_v54, %v2607_v53 }
 0xf1c   : > { %v2659_v59 = vrot.slane %v3281_v55, 7 }
 0xf1d   : > { %3282 = vtanh.f32 %v2641_v18 }
 0xf1e   : > { %v2664_v60 = vsel %vm1246_vm13, 0.0, %v2659_v59 }
 0xf1f   : > { %3109 = vmatmul.msk.f32.vlgmr.msrb.gmra.mxu2 %vm896_vm3, %v2664_v60  ;;  %v2701_v0 = vrot.slane %v2664_v60, 1  ;;  %v2735_v1 = vrot.slane %v2664_v60, 2 }
 0xf23   : > { %v3283_v24 = vpop.eup %3282 }
 0xf24   : > { %v2660_v62 = vrot.slane %v3283_v24, 7 }
 0xf26   : > { %v2661_v63 = vsel %vm1246_vm13, %v2659_v59, %v2660_v62  ;;  %v2665_v7 = vsel %vm1246_vm13, %v2660_v62, 0.0 }
 0xf27   : > { %3110 = vmatmul.msk.f32.gmra.mxu2 %vm896_vm3, %v2661_v63  ;;  %v2702_v3 = vrot.slane %v2661_v63, 1  ;;  %v2736_v2 = vrot.slane %v2661_v63, 2  ;;  %v2704_v8 = vrot.slane %v2665_v7, 1  ;;  %v2738_v9 = vrot.slane %v2665_v7, 2 }
 0xf29   : > { %v2703_v4 = vsel %vm1289_vm14, %v2701_v0, %v2702_v3  ;;  %v2737_v5 = vsel %vm1324_vm15, %v2735_v1, %v2736_v2  ;;  %v2705_v10 = vsel %vm1289_vm14, %v2702_v3, %v2704_v8  ;;  %v2739_v12 = vsel %vm1324_vm15, %v2736_v2, %v2738_v9 }
 0xf2a   : > { %3111 = vmatmul.msk.f32.vlgmr.msrb.gmra.mxu0 %vm896_vm3, %v2703_v4  ;;  %3113 = vmatmul.msk.f32.vlgmr.msrb.gmra.mxu3 %vm896_vm3, %v2737_v5 }
 0xf32   : > { %3112 = vmatmul.msk.f32.gmra.mxu0 %vm896_vm3, %v2705_v10  ;;  %3114 = vmatmul.msk.f32.gmra.mxu3 %vm896_vm3, %v2739_v12 }
 0xf4b   : > { %v2187_v13 = vpop.xlane.xlu2 %2186 }
 0xf4c   : > { %v2191_v57 = vmul.f32 %v2187_v13, %v3716_v58 }
 0xf4e   : > { %v2193_v15 = vadd.f32 1e-05, %v2191_v57 }
 0xf50   : > { %3284 = vrsqrt.f32 %v2193_v15  ;;  %vm2201_vm14 = vweird.f32 %v2193_v15 }
 0xf53   : > { %v2190_v16 = vpop.xlane.xlu1 %2189 }
 0xf54   : > { %v2192_v44 = vmul.f32 %v2190_v16, %v3716_v58 }
 0xf56   : > { %v3285_v20 = vpop.eup %3284  ;;  %v2194_v21 = vadd.f32 1e-05, %v2192_v44 }
 0xf57   : > { %v2196_v22 = vmul.f32 %v3285_v20, %v2193_v15  ;;  %vm2202_vm13 = vweird.f32 %v3285_v20 }
 0xf58   : > { %3286 = vrsqrt.f32 %v2194_v21  ;;  %vm2203_vm15 = vmor %vm2201_vm14, %vm2202_vm13  ;;  %vm2211_vm4 = vweird.f32 %v2194_v21 }
 0xf59   : > { %v2197_v23 = vmul.f32 %v3285_v20, %v2196_v22 }
 0xf5b   : > { %v2198_v25 = vmul.f32 0.5, %v2197_v23 }
 0xf5d   : > { %v2199_v6 = vsub.f32 1.5, %v2198_v25 }
 0xf5e   : > { %v3287_v26 = vpop.eup %3286 }
 0xf5f   : > { %v2200_v27 = vmul.f32 %v3285_v20, %v2199_v6  ;;  %v2206_v28 = vmul.f32 %v3287_v26, %v2194_v21  ;;  %vm2212_vm0 = vweird.f32 %v3287_v26 }
 0xf60   : > { %vm2213_vm9 = vmor %vm2211_vm4, %vm2212_vm0 }
 0xf61   : > { %v2204_v30 = vsel %vm2203_vm15, %v3285_v20, %v2200_v27  ;;  %v2207_v58 = vmul.f32 %v3287_v26, %v2206_v28 }
 0xf62   : > { %v2215_v31 = vmul.f32 %v2204_v30, %v4288_v51 }
 0xf63   : > { %v2208_v32 = vmul.f32 0.5, %v2207_v58 }
 0xf64   : > { %v2220_v61 = vmul.f32 %v3227_v56, %v2215_v31 }
 0xf65   : > { %v2209_v33 = vsub.f32 1.5, %v2208_v32 }
 0xf66   : > { %v2225_v38 = vadd.f32 %v3228_v17, %v2220_v61 }
 0xf67   : > { %v2210_v34 = vmul.f32 %v3287_v26, %v2209_v33 }
 0xf68   : > { %v2227_v35 = vmul.f32 %v3631_v11, %v2225_v38  ;;  %v2774_v11 = vld [vmem:[%s4551_s12 + $0x18] sm:$0xff] }
 0xf69   : > { %v2214_v36 = vsel %vm2213_vm9, %v3287_v26, %v2210_v34  ;;  %2798 = vmatpush.msrb.mxu1 %v2774_v11 }
 0xf6a   : > { %v2216_v14 = vmul.f32 %v2214_v36, %v4295_v29  ;;  %2229 = vst.msk [vmem:[%s4369_s7] sm:$0xff] %vm896_vm3, %v2227_v35  ;;  %v2773_v29 = vld [vmem:[%s4551_s12 + $0x10] sm:$0xff] }
 0xf6b   : > { %2799 = vmatpush.msrb.mxu1 %v2773_v29 }
 0xf6c   : > { %v2221_v51 = vmul.f32 %v3227_v56, %v2216_v14 }
 0xf6d   : > { %2800 = vmatpush.msrb.mxu1 %v2772_v40 }
 0xf6e   : > { %v2226_v37 = vadd.f32 %v3228_v17, %v2221_v51 }
 0xf70   : > { %v2228_v39 = vmul.f32 %v3642_v19, %v2226_v37  ;;  %v2771_v19 = vld [vmem:[%s4551_s12] sm:$0xff] }
 0xf71   : > { %2801 = vmatpush.msrb.mxu1 %v2771_v19 }
 0xf72   : > { %2230 = vst.msk [vmem:[%s4369_s7 + $0x8] sm:$0xff] %vm896_vm3, %v2228_v39 }
 0xfa2   : > { %v2692_v41 = vpop.f32.mrf.mxu2 }
 0xfa3   : > { %v2698_v45 = vadd.f32 %v3226_v42, %v2692_v41 }
 0xfa7   : > { %v2727_v43 = vpop.f32.mrf.mxu0 }
 0xfa8   : > { %v2733_v46 = vadd.f32 %v2727_v43, %v2698_v45 }
 0xfaa   : > { %v2695_v49 = vpop.f32.mrf.mxu2 }
 0xfab   : > { %v2699_v52 = vadd.f32 %v3226_v42, %v2695_v49 }
 0xfad   : > { %v2761_v47 = vpop.f32.mrf.mxu3 }
 0xfae   : > { %v2767_v48 = vadd.f32 %v2761_v47, %v2733_v46 }
 0xfaf   : > { %v2730_v50 = vpop.f32.mrf.mxu0 }
 0xfb0   : > { %3288 = vtanh.f32 %v2767_v48  ;;  %v2734_v53 = vadd.f32 %v2730_v50, %v2699_v52 }
 0xfb5   : > { %v2764_v54 = vpop.f32.mrf.mxu3 }
 0xfb6   : > { %v3289_v55 = vpop.eup %3288  ;;  %v2768_v18 = vadd.f32 %v2764_v54, %v2734_v53 }
 0xfb7   : > { %3115 = vmatmul.msk.f32.vlgmr.msrb.gmra.mxu1 %vm896_vm3, %v3289_v55 }
 0xfb8   : > { %3290 = vtanh.f32 %v2768_v18 }
 0xfbe   : > { %v3291_v59 = vpop.eup %3290 }
 0xfbf   : > { %3116 = vmatmul.msk.f32.gmra.mxu1 %vm896_vm3, %v3291_v59 }
 0xfc0   : > { %3331 = shalt.err (!%p3328_p3)
}
 0xfc1   : > { %s3412_s7 = smov 128   ;;  %s3413_s30 = smov 8  }
 0xfc2   : > { %3133 = dma.vmem_to_hbm [thread:$0]  (%p3595_p5), %s2834_s14, 256, %s2836_s11, %s2816_s4, %s3412_s7, %s3412_s7, %s3413_s30  }
 0xfc3   : > { %s4553_s3 = sld [smem:[#allocation29_spill]]  ;;  %s4554_s12 = sshll.u32 %s4358_s15, 4 }
 0xfc4   : > { %s819_s16 = scalar_lea.vmem [#allocation6], %s4554_s12  ;;  %s2849_s6 = scalar_lea.hbm %s4480_s27, %s3127_s28 }
 0xfc5   : > { %s2850_s13 = sshll.u32 %s819_s16, 4  ;;  %s2852_s14 = sshll.u32 %s2849_s6, 4  ;;  %s2851_s13 = int_to_ptr.vmem [resolvable:$true] %s2850_s13  ;;  %s2853_s14 = int_to_ptr.hbm [resolvable:$true] %s2852_s14 }
 0xfc6   : > { %s2821_s11 = scalar_lea.sflag [#allocation7], %s4358_s15  ;;  %s3346_s4 = sshra.s32 %s2853_s14, 4  ;;  %s3347_s4 = int_to_ptr.hbm [resolvable:$true] %s3346_s4 }
 0xfc7   : > { %s3348_s8 = scalar_lea.hbm %s3347_s4, 16  ;;  %s3352_s28 = scalar_lea.hbm %s4480_s27, 32 }
 0xfc8   : > { %p3349_p4 = scmp.ne.s32.totalorder %s3347_s4, %s3348_s8  ;;  %p3353_p9 = scmp.lt.s32.totalorder %s3347_s4, %s4480_s27 }
 0xfc9   : > { %v3229_v60 = vld [vmem:[%s4553_s3] ss:$0 sm:$0xff]  ;;  %p3354_p10 = scmp.lt.s32.totalorder %s3352_s28, %s3348_s8 }
 0xfca   : > { %p3350_p7 = pnand %p3349_p4, %p3595_p5 }
 0xfcb   : > { %p3355_p11 = por %p3354_p10, %p3353_p9 }
 0xfcc   : > { %p3351_p8 = pneg %p3350_p7 }
 0xfce   : > { %p3356_p12 = pnand %p3355_p11, %p3351_p8 }
0x1034   : > { %v2803_v24 = vpop.f32.mrf.mxu1 }
0x1035   : > { %v2809_v62 = vadd.f32 %v3229_v60, %v2803_v24 }
0x1037   : > { %v2811_v63 = vadd.f32 %v2809_v62, %v2227_v35 }
0x1039   : > { %2813 = vst.msk [vmem:[%s819_s16] sm:$0xff] %vm896_vm3, %v2811_v63 }
0x103c   : > { %v2806_v0 = vpop.f32.mrf.mxu1 }
0x103d   : > { %v2810_v1 = vadd.f32 %v3229_v60, %v2806_v0 }
0x103f   : > { %v2812_v3 = vadd.f32 %v2810_v1, %v2228_v39 }
0x1041   : > { %2814 = vst.msk [vmem:[%s819_s16 + $0x8] sm:$0xff] %vm896_vm3, %v2812_v3 }
0x1042   : > { %3359 = shalt.err (!%p3356_p12)
}
0x1043   : > { %3134 = dma.vmem_to_hbm [thread:$0]  (%p3595_p5), %s2851_s13, 256, %s2853_s14, %s2821_s11, %s3412_s7, %s3412_s7, %s3413_s30  }
0x1044 PF: > { %s4555_s15 = sld [smem:[#allocation11_spill]]  ;;  %p3144_p13 = scmp.ge.s32.totalorder %s3400_s0, 2 }
0x1046   : > { %p3138_p0 = pnand %p3144_p13, %p3599_p6 }
0x1048   : > { %p3139_p1 = pneg %p3138_p0 }
0x104a   : > { %s2867_s9 = sand.u32 1, %s4555_s15  }
0x104b   : > { %s2868_s6 = scalar_lea.sflag [#allocation5], %s2867_s9 }
0x104c   : > { %3379 = dma.done.wait (%p3139_p1), %s2868_s6, 256  }
0x104d   : > { %3381 = vsyncadd (%p3139_p1), %s2868_s6, 4294967040  ;;  %s2878_s4 = scalar_lea.sflag [#allocation7], %s2867_s9 }
0x104e   : > { %3383 = dma.done.wait (%p3139_p1), %s2878_s4, 256  }
0x104f   : > { %3385 = vsyncadd (%p3139_p1), %s2878_s4, 4294967040  ;;  %s4557_s0 = sld [smem:[#allocation13_spill]]  ;;  %s4560_s9 = smov %s3392_s5 }
0x1050   : > { %s4558_s2 = sld [smem:[#allocation12_spill]] }
0x1051   : > { %s4559_s28 = sld [smem:[#allocation14_spill]] }
0x1055   : > { %p49_p5 = scmp.ge.s32.totalorder %s4557_s0, 4  }
0x1056   : > { %s4561_s5 = smov %s4558_s2 }
0x1057   :  { %51 = sbr.rel (!%p49_p5) target bundleno = 34 (0x22), region = 187 }
0x105c   :  { %2884 = vsyncpa [#allocation5], 1 }
0x105d   :  { %2886 = vsyncpa [#allocation5 + $0x1], 1 }
0x105e   :  { %2887 = vsyncpa [#allocation7], 1 }
0x105f   :  { %2889 = vsyncpa [#allocation7 + $0x1], 1 }

</bundles_post_ra>
